<compile_context>
chip_gen: v5e
topology: v5e:2x2
jax: 0.10.0
libtpu: 0.0.40
codegen_flags: <defaults>
</compile_context>

<pallas_src>
import functools
import math

import jax
import jax.numpy as jnp
from jax.experimental import pallas as pl
from jax.experimental.pallas import tpu as pltpu


def _round_up(n, m):
    return ((n + m - 1) // m) * m


_MAX_TM, _MAX_TK, _MAX_TN = 512, 512, 256
_VMEM_LIMIT = 48 * 1024 * 1024   # > 16/32 MiB scoped defaults, < v7x 64 MiB phys.


def _pick_tile(size, granule, max_tile):
    """Largest tile <= max_tile dividing `size`.

    If size <= max_tile the whole dimension is one full-extent block (always a
    legal TPU block regardless of (8,128) alignment).  Otherwise the caller
    guarantees `size` is a multiple of `granule`, so a divisor exists.
    """
    if size <= max_tile:
        return size
    for t in range(max_tile, 0, -granule):
        if size % t == 0:
            return t
    return granule


# ----------------------------------------------------------------------------
# Pallas kernel 1: tiled  y = x @ w + b (+ optional ReLU), f32 accumulation.
# ----------------------------------------------------------------------------
def _gemm_kernel(x_ref, w_ref, b_ref, o_ref, acc_ref, *, relu):
    k = pl.program_id(2)

    @pl.when(k == 0)
    def _():
        acc_ref[...] = jnp.zeros_like(acc_ref)

    acc_ref[...] += jnp.dot(x_ref[...], w_ref[...],
                            preferred_element_type=jnp.float32)

    @pl.when(k == pl.num_programs(2) - 1)
    def _():
        y = acc_ref[...] + b_ref[...]
        if relu:
            y = jnp.maximum(y, 0.0)
        o_ref[...] = y.astype(o_ref.dtype)


def fused_matmul(x, w, b, *, relu, out_dtype):
    """x:(M,K) @ w:(Kp,Np) + b:(1,Np).  w/b are pre-transposed/fused at init."""
    if x.dtype != jnp.bfloat16:
        x = x.astype(jnp.bfloat16)
    M, K = x.shape
    Kp, Np = w.shape
    n_true = Np

    # Robustness path only: weights coming from preprocess_rnd_params never
    # need runtime padding (it is hoisted), but keep the kernel general.
    Kt = Kp if Kp <= _MAX_TK else _round_up(Kp, 128)
    Nt = Np if Np <= _MAX_TN else _round_up(Np, 128)
    if (Kt, Nt) != (Kp, Np):
        w = jnp.zeros((Kt, Nt), w.dtype).at[:Kp, :Np].set(w)
        b = jnp.zeros((1, Nt), b.dtype).at[:, :Np].set(b)
        Kp, Np = Kt, Nt

    tm = min(_MAX_TM, _round_up(M, 8))
    Mp = _round_up(M, tm)
    tk = _pick_tile(Kp, 128, _MAX_TK)
    tn = _pick_tile(Np, 128, _MAX_TN)

    if (Mp, Kp) != (M, K):
        x = jnp.zeros((Mp, Kp), x.dtype).at[:M, :K].set(x)

    grid = (Mp // tm, Np // tn, Kp // tk)
    out = pl.pallas_call(
        functools.partial(_gemm_kernel, relu=relu),
        out_shape=jax.ShapeDtypeStruct((Mp, Np), out_dtype),
        grid=grid,
        in_specs=[
            pl.BlockSpec((tm, tk), lambda i, j, k: (i, k)),
            pl.BlockSpec((tk, tn), lambda i, j, k: (k, j)),
            pl.BlockSpec((1, tn), lambda i, j, k: (0, j)),
        ],
        out_specs=pl.BlockSpec((tm, tn), lambda i, j, k: (i, j)),
        scratch_shapes=[pltpu.VMEM((tm, tn), jnp.float32)],
        compiler_params=pltpu.CompilerParams(
            dimension_semantics=("parallel", "parallel", "arbitrary"),
            vmem_limit_bytes=_VMEM_LIMIT,
        ),
    )(x, w, b)
    if Mp != M or Np != n_true:
        out = out[:M, :n_true]
    return out


# ----------------------------------------------------------------------------
# Pallas kernel 2: fused MLP head for BOTH networks in one call.
#   t = relu(xt @ W1t + b1t) @ W2t + b2t ; p = relu(xp @ W1p + b1p) @ W2p + b2p
# ----------------------------------------------------------------------------
def _head_kernel(xt_ref, xp_ref,
                 w1t_ref, b1t_ref, w2t_ref, b2t_ref,
                 w1p_ref, b1p_ref, w2p_ref, b2p_ref,
                 ot_ref, op_ref):
    def one(x_ref, w1_ref, b1_ref, w2_ref, b2_ref, o_ref):
        h = jnp.dot(x_ref[...], w1_ref[...], preferred_element_type=jnp.float32)
        h = jnp.maximum(h + b1_ref[...], 0.0).astype(w2_ref.dtype)
        y = jnp.dot(h, w2_ref[...], preferred_element_type=jnp.float32)
        o_ref[...] = (y + b2_ref[...]).astype(o_ref.dtype)

    one(xt_ref, w1t_ref, b1t_ref, w2t_ref, b2t_ref, ot_ref)
    one(xp_ref, w1p_ref, b1p_ref, w2p_ref, b2p_ref, op_ref)


def mlp_head(xt, xp, head_params):
    (w1t, b1t, w2t, b2t), (w1p, b1p, w2p, b2p) = head_params
    B, F = xt.shape
    hidden = w2t.shape[1]

    if B <= 256:
        tb, Bp = B, B
    else:
        tb, Bp = 256, _round_up(B, 256)
    if Bp != B:
        xt = jnp.zeros((Bp, F), xt.dtype).at[:B].set(xt)
        xp = jnp.zeros((Bp, F), xp.dtype).at[:B].set(xp)

    full = lambda a: pl.BlockSpec(a.shape, lambda i: (0, 0))  # weights resident
    out_t, out_p = pl.pallas_call(
        _head_kernel,
        out_shape=(jax.ShapeDtypeStruct((Bp, hidden), jnp.float32),
                   jax.ShapeDtypeStruct((Bp, hidden), jnp.float32)),
        grid=(Bp // tb,),
        in_specs=[
            pl.BlockSpec((tb, F), lambda i: (i, 0)),
            pl.BlockSpec((tb, F), lambda i: (i, 0)),
            full(w1t), full(b1t), full(w2t), full(b2t),
            full(w1p), full(b1p), full(w2p), full(b2p),
        ],
        out_specs=(pl.BlockSpec((tb, hidden), lambda i: (i, 0)),
                   pl.BlockSpec((tb, hidden), lambda i: (i, 0))),
        compiler_params=pltpu.CompilerParams(
            dimension_semantics=("parallel",),
            vmem_limit_bytes=_VMEM_LIMIT,
        ),
    )(xt, xp, w1t, b1t, w2t, b2t, w1p, b1p, w2p, b2p)
    if Bp != B:
        out_t, out_p = out_t[:B], out_p[:B]
    return out_t, out_p


# ----------------------------------------------------------------------------
# im2col (NHWC, bf16).  Patch feature order is (dh, dw, c), matching the
# weight preprocessing below.
# ----------------------------------------------------------------------------
# TODO(synk): fold the kh*kw taps into the Pallas pipeline (tap grid axis /
# in-kernel band gather) so the patch matrix never round-trips HBM; today it
# is materialized once in bf16 and shared by both fused networks.
def _im2col_nhwc(x, kh, kw, stride):
    N, H, W, C = x.shape
    OH = (H - kh) // stride + 1
    OW = (W - kw) // stride + 1
    cols = []
    for dh in range(kh):
        for dw in range(kw):
            cols.append(x[:, dh:dh + stride * OH:stride,
                          dw:dw + stride * OW:stride, :])       # (N,OH,OW,C)
    p = jnp.concatenate(cols, axis=-1)                           # (N,OH,OW,kh*kw*C)
    return p.reshape(N * OH * OW, kh * kw * C), OH, OW


# ----------------------------------------------------------------------------
# Parameter init (PyTorch layout) + one-time preprocessing into fused,
# GEMM-ready, bf16 weights.
# ----------------------------------------------------------------------------
def _conv_out_hw(h, k, s):
    return (h - k) // s + 1


def init_network_params(key, input_shape):
    C, H, W = input_shape
    h1, w1 = _conv_out_hw(H, 8, 4), _conv_out_hw(W, 8, 4)
    h2, w2 = _conv_out_hw(h1, 4, 2), _conv_out_hw(w1, 4, 2)
    h3, w3 = _conv_out_hw(h2, 3, 1), _conv_out_hw(w2, 3, 1)
    conv_out_size = 64 * h3 * w3

    specs = [
        (32, C, 8, 8),
        (64, 32, 4, 4),
        (64, 64, 3, 3),
        (512, conv_out_size),   # Linear: (out, in)
        (512, 512),
    ]
    params = []
    for shape in specs:
        key, kw_, kb_ = jax.random.split(key, 3)
        fan_in = int(math.prod(shape[1:]))
        bound = 1.0 / math.sqrt(fan_in)     # PyTorch-style uniform init
        wv = jax.random.uniform(kw_, shape, jnp.float32, -bound, bound)
        bv = jax.random.uniform(kb_, (shape[0],), jnp.float32, -bound, bound)
        params.append((wv, bv))
    return params, key


def preprocess_rnd_params(target_params, predictor_params, input_shape):
    """One-time weight fusion / transposition / layout fixup (hoisted)."""
    C, H, W = input_shape
    h1, w1 = _conv_out_hw(H, 8, 4), _conv_out_hw(W, 8, 4)
    h2, w2 = _conv_out_hw(h1, 4, 2), _conv_out_hw(w1, 4, 2)
    h3, w3 = _conv_out_hw(h2, 3, 1), _conv_out_hw(w2, 3, 1)

    (tw1, tb1), (tw2, tb2), (tw3, tb3), (twl1, tbl1), (twl2, tbl2) = target_params
    (pw1, pb1), (pw2, pb2), (pw3, pb3), (pwl1, pbl1), (pwl2, pbl2) = predictor_params
    bf, f32 = jnp.bfloat16, jnp.float32

    def conv_w(w):  # torch (O,C,kh,kw) -> (kh*kw*C, O), (dh,dw,c) row order
        O, Ci, kh, kw = w.shape
        return jnp.transpose(w, (2, 3, 1, 0)).reshape(kh * kw * Ci, O)

    # conv1: both nets consume the same 3-channel patches -> concat outputs.
    W1 = jnp.concatenate([conv_w(tw1), conv_w(pw1)], axis=1).astype(bf)   # (192, 64)
    B1 = jnp.concatenate([tb1, pb1]).reshape(1, -1).astype(f32)           # (1, 64)

    def block_diag(wt, wp, cin_total):
        O, Ci, kh, kw = wt.shape
        Wf = jnp.zeros((kh, kw, cin_total, 2 * O), f32)
        Wf = Wf.at[:, :, :Ci, :O].set(jnp.transpose(wt, (2, 3, 1, 0)))
        Wf = Wf.at[:, :, Ci:2 * Ci, O:].set(jnp.transpose(wp, (2, 3, 1, 0)))
        return Wf.reshape(kh * kw * cin_total, 2 * O).astype(bf)

    W2 = block_diag(tw2, pw2, 64)                                         # (1024, 128)
    B2 = jnp.concatenate([tb2, pb2]).reshape(1, -1).astype(f32)
    W3 = block_diag(tw3, pw3, 128)                                        # (1152, 128)
    B3 = jnp.concatenate([tb3, pb3]).reshape(1, -1).astype(f32)

    def head_w1(wl1):  # torch (512, 64*h3*w3) NCHW-flat -> (h3*w3*64, 512) NHWC-flat
        out_dim = wl1.shape[0]
        return (wl1.reshape(out_dim, 64, h3, w3)
                    .transpose(2, 3, 1, 0)
                    .reshape(h3 * w3 * 64, out_dim).astype(bf))

    head = (
        (head_w1(twl1), tbl1.reshape(1, -1).astype(f32),
         twl2.T.astype(bf), tbl2.reshape(1, -1).astype(f32)),
        (head_w1(pwl1), pbl1.reshape(1, -1).astype(f32),
         pwl2.T.astype(bf), pbl2.reshape(1, -1).astype(f32)),
    )
    return {"w1": W1, "b1": B1, "w2": W2, "b2": B2, "w3": W3, "b3": B3,
            "head": head}


# ----------------------------------------------------------------------------
# Forward: fused conv trunk (3 pallas_calls) + fused MLP heads (1 pallas_call).
# ----------------------------------------------------------------------------
def rnd_forward(prep, x):
    """x: (B, 3, H, W) float32 NCHW.  Returns (pred_out, target_out)."""
    B = x.shape[0]
    bf = jnp.bfloat16
    y = jnp.transpose(x, (0, 2, 3, 1)).astype(bf)            # NHWC, bf16

    # conv1 (8x8 /4): target & predictor share the same patch stream.
    p, oh, ow = _im2col_nhwc(y, 8, 8, 4)
    y = fused_matmul(p, prep["w1"], prep["b1"], relu=True, out_dtype=bf)
    y = y.reshape(B, oh, ow, 64)                              # [32 tgt | 32 pred]

    # conv2 (4x4 /2): block-diagonal fused weights.
    p, oh, ow = _im2col_nhwc(y, 4, 4, 2)
    y = fused_matmul(p, prep["w2"], prep["b2"], relu=True, out_dtype=bf)
    y = y.reshape(B, oh, ow, 128)                             # [64 tgt | 64 pred]

    # conv3 (3x3 /1)
    p, oh, ow = _im2col_nhwc(y, 3, 3, 1)
    y = fused_matmul(p, prep["w3"], prep["b3"], relu=True, out_dtype=bf)
    y = y.reshape(B, oh, ow, 128)

    # flatten in NHWC order (head W1 rows were re-ordered at init to match
    # PyTorch's NCHW flatten semantics).
    xt = y[..., :64].reshape(B, -1)
    xp = y[..., 64:].reshape(B, -1)
    target_out, pred_out = mlp_head(xt, xp, prep["head"])
    return pred_out, target_out


# ----------------------------------------------------------------------------
if __name__ == "__main__":
    input_shape = (3, 44, 44)   # conv trunk -> (10,10) -> (4,4) -> (2,2)
    batch = 2

    key = jax.random.PRNGKey(0)
    target_params, key = init_network_params(key, input_shape)
    predictor_params, key = init_network_params(key, input_shape)
    prep = preprocess_rnd_params(target_params, predictor_params, input_shape)

    key, kx = jax.random.split(key)
    x = jax.random.normal(kx, (batch,) + input_shape, jnp.float32)

    fwd = jax.jit(rnd_forward)
    pred_out, target_out = fwd(prep, x)
    jax.block_until_ready((pred_out, target_out))

    assert pred_out.shape == (batch, 512) and target_out.shape == (batch, 512)
    assert pred_out.dtype == jnp.float32 and target_out.dtype == jnp.float32
    assert bool(jnp.all(jnp.isfinite(pred_out)))
    assert bool(jnp.all(jnp.isfinite(target_out)))
    print("KERNEL_OK")
</pallas_src>

<mosaic_0001>
module attributes {stable_mosaic.version = 11 : i64} {
  func.func @_gemm_kernel(%arg0: i32, %arg1: i32, %arg2: i32, %arg3: memref<200x192xbf16, #tpu.memory_space<vmem>>, %arg4: memref<192x64xbf16, #tpu.memory_space<vmem>>, %arg5: memref<1x64xf32, #tpu.memory_space<vmem>>, %arg6: memref<200x64xbf16, #tpu.memory_space<vmem>>, %arg7: memref<200x64xf32, #tpu.memory_space<vmem>>) attributes {dimension_semantics = [#tpu.dimension_semantics<parallel>, #tpu.dimension_semantics<parallel>, #tpu.dimension_semantics<arbitrary>], iteration_bounds = array<i64: 1, 1, 1>, scalar_prefetch = 0 : i64, scratch_operands = 1 : i64, tpu.core_type = #tpu.core_type<tc>, window_params = [{transform_indices = @transform_0, window_bounds = array<i64: 200, 192>}, {transform_indices = @transform_1, window_bounds = array<i64: 192, 64>}, {transform_indices = @transform_2, window_bounds = array<i64: 1, 64>}, {transform_indices = @transform_3, window_bounds = array<i64: 200, 64>}]} {
    %c0_i32 = arith.constant 0 : i32
    %0 = arith.cmpi eq, %arg2, %c0_i32 : i32
    %1 = arith.extui %0 : i1 to i32
    %c0_i32_0 = arith.constant 0 : i32
    %2 = arith.cmpi ne, %1, %c0_i32_0 : i32
    scf.if %2 {
      %cst_10 = arith.constant 0.000000e+00 : f32
      %12 = vector.broadcast %cst_10 : f32 to vector<200x64xf32>
      %c0_11 = arith.constant 0 : index
      %c0_12 = arith.constant 0 : index
      %13 = vector.load %arg7[%c0_11, %c0_12] : memref<200x64xf32, #tpu.memory_space<vmem>>, vector<200x64xf32>
      tpu.vector_store %arg7[%c0_11, %c0_12], %12 {strides = array<i32>} : memref<200x64xf32, #tpu.memory_space<vmem>>, vector<200x64xf32>,
    } else {
    }
    %c0 = arith.constant 0 : index
    %c0_1 = arith.constant 0 : index
    %3 = vector.load %arg7[%c0, %c0_1] : memref<200x64xf32, #tpu.memory_space<vmem>>, vector<200x64xf32>
    %c0_2 = arith.constant 0 : index
    %c0_3 = arith.constant 0 : index
    %4 = vector.load %arg3[%c0_2, %c0_3] : memref<200x192xbf16, #tpu.memory_space<vmem>>, vector<200x192xbf16>
    %c0_4 = arith.constant 0 : index
    %c0_5 = arith.constant 0 : index
    %5 = vector.load %arg4[%c0_4, %c0_5] : memref<192x64xbf16, #tpu.memory_space<vmem>>, vector<192x64xbf16>
    %cst = arith.constant dense<0.000000e+00> : vector<200x64xf32>
    %6 = tpu.matmul %4, %5, %cst {dimension_numbers = #tpu.dot_dimension_numbers<[1], [0], [0], [1], [0, 0, 1, 1], [], []>} : vector<200x192xbf16>, vector<192x64xbf16>, vector<200x64xf32> -> vector<200x64xf32>
    %7 = arith.addf %3, %6 : vector<200x64xf32>
    %c0_6 = arith.constant 0 : index
    %c0_7 = arith.constant 0 : index
    %8 = vector.load %arg7[%c0_6, %c0_7] : memref<200x64xf32, #tpu.memory_space<vmem>>, vector<200x64xf32>
    tpu.vector_store %arg7[%c0_6, %c0_7], %7 {strides = array<i32>} : memref<200x64xf32, #tpu.memory_space<vmem>>, vector<200x64xf32>,
    %c0_i32_8 = arith.constant 0 : i32
    %9 = arith.cmpi eq, %arg2, %c0_i32_8 : i32
    %10 = arith.extui %9 : i1 to i32
    %c0_i32_9 = arith.constant 0 : i32
    %11 = arith.cmpi ne, %10, %c0_i32_9 : i32
    scf.if %11 {
      %c0_10 = arith.constant 0 : index
      %c0_11 = arith.constant 0 : index
      %12 = vector.load %arg7[%c0_10, %c0_11] : memref<200x64xf32, #tpu.memory_space<vmem>>, vector<200x64xf32>
      %c0_12 = arith.constant 0 : index
      %c0_13 = arith.constant 0 : index
      %13 = vector.load %arg5[%c0_12, %c0_13] : memref<1x64xf32, #tpu.memory_space<vmem>>, vector<1x64xf32>
      %14 = vector.broadcast %13 : vector<1x64xf32> to vector<200x64xf32>
      %15 = arith.addf %12, %14 : vector<200x64xf32>
      %cst_14 = arith.constant 0.000000e+00 : f32
      %16 = vector.broadcast %cst_14 : f32 to vector<200x64xf32>
      %17 = arith.maximumf %15, %16 : vector<200x64xf32>
      %18 = arith.truncf %17 : vector<200x64xf32> to vector<200x64xbf16>
      %c0_15 = arith.constant 0 : index
      %c0_16 = arith.constant 0 : index
      %19 = vector.load %arg6[%c0_15, %c0_16] : memref<200x64xbf16, #tpu.memory_space<vmem>>, vector<200x64xbf16>
      tpu.vector_store %arg6[%c0_15, %c0_16], %18 {strides = array<i32>} : memref<200x64xbf16, #tpu.memory_space<vmem>>, vector<200x64xbf16>,
    } else {
    }
    return
  }
  func.func @transform_0(%arg0: i32, %arg1: i32, %arg2: i32) -> (i32, i32) {
    %c0_i32 = arith.constant 0 : i32
    return %arg0, %arg2 : i32, i32
  }
  func.func @transform_1(%arg0: i32, %arg1: i32, %arg2: i32) -> (i32, i32) {
    %c0_i32 = arith.constant 0 : i32
    return %arg2, %arg1 : i32, i32
  }
  func.func @transform_2(%arg0: i32, %arg1: i32, %arg2: i32) -> (i32, i32) {
    %c0_i32 = arith.constant 0 : i32
    %c0_i32_0 = arith.constant 0 : i32
    return %c0_i32, %arg1 : i32, i32
  }
  func.func @transform_3(%arg0: i32, %arg1: i32, %arg2: i32) -> (i32, i32) {
    %c0_i32 = arith.constant 0 : i32
    return %arg0, %arg1 : i32, i32
  }
}

module attributes {stable_mosaic.version = 11 : i64} {
  func.func @_gemm_kernel(%arg0: i32, %arg1: i32, %arg2: i32, %arg3: memref<32x512xbf16, #tpu.memory_space<vmem>>, %arg4: memref<512x128xbf16, #tpu.memory_space<vmem>>, %arg5: memref<1x128xf32, #tpu.memory_space<vmem>>, %arg6: memref<32x128xbf16, #tpu.memory_space<vmem>>, %arg7: memref<32x128xf32, #tpu.memory_space<vmem>>) attributes {dimension_semantics = [#tpu.dimension_semantics<parallel>, #tpu.dimension_semantics<parallel>, #tpu.dimension_semantics<arbitrary>], iteration_bounds = array<i64: 1, 1, 2>, scalar_prefetch = 0 : i64, scratch_operands = 1 : i64, tpu.core_type = #tpu.core_type<tc>, window_params = [{transform_indices = @transform_0, window_bounds = array<i64: 32, 512>}, {transform_indices = @transform_1, window_bounds = array<i64: 512, 128>}, {transform_indices = @transform_2, window_bounds = array<i64: 1, 128>}, {transform_indices = @transform_3, window_bounds = array<i64: 32, 128>}]} {
    %c0_i32 = arith.constant 0 : i32
    %0 = arith.cmpi eq, %arg2, %c0_i32 : i32
    %1 = arith.extui %0 : i1 to i32
    %c0_i32_0 = arith.constant 0 : i32
    %2 = arith.cmpi ne, %1, %c0_i32_0 : i32
    scf.if %2 {
      %cst_9 = arith.constant 0.000000e+00 : f32
      %12 = vector.broadcast %cst_9 : f32 to vector<32x128xf32>
      %c0_10 = arith.constant 0 : index
      %c0_11 = arith.constant 0 : index
      %13 = vector.load %arg7[%c0_10, %c0_11] : memref<32x128xf32, #tpu.memory_space<vmem>>, vector<32x128xf32>
      tpu.vector_store %arg7[%c0_10, %c0_11], %12 {strides = array<i32>} : memref<32x128xf32, #tpu.memory_space<vmem>>, vector<32x128xf32>,
    } else {
    }
    %c0 = arith.constant 0 : index
    %c0_1 = arith.constant 0 : index
    %3 = vector.load %arg7[%c0, %c0_1] : memref<32x128xf32, #tpu.memory_space<vmem>>, vector<32x128xf32>
    %c0_2 = arith.constant 0 : index
    %c0_3 = arith.constant 0 : index
    %4 = vector.load %arg3[%c0_2, %c0_3] : memref<32x512xbf16, #tpu.memory_space<vmem>>, vector<32x512xbf16>
    %c0_4 = arith.constant 0 : index
    %c0_5 = arith.constant 0 : index
    %5 = vector.load %arg4[%c0_4, %c0_5] : memref<512x128xbf16, #tpu.memory_space<vmem>>, vector<512x128xbf16>
    %cst = arith.constant dense<0.000000e+00> : vector<32x128xf32>
    %6 = tpu.matmul %4, %5, %cst {dimension_numbers = #tpu.dot_dimension_numbers<[1], [0], [0], [1], [0, 0, 1, 1], [], []>} : vector<32x512xbf16>, vector<512x128xbf16>, vector<32x128xf32> -> vector<32x128xf32>
    %7 = arith.addf %3, %6 : vector<32x128xf32>
    %c0_6 = arith.constant 0 : index
    %c0_7 = arith.constant 0 : index
    %8 = vector.load %arg7[%c0_6, %c0_7] : memref<32x128xf32, #tpu.memory_space<vmem>>, vector<32x128xf32>
    tpu.vector_store %arg7[%c0_6, %c0_7], %7 {strides = array<i32>} : memref<32x128xf32, #tpu.memory_space<vmem>>, vector<32x128xf32>,
    %c1_i32 = arith.constant 1 : i32
    %9 = arith.cmpi eq, %arg2, %c1_i32 : i32
    %10 = arith.extui %9 : i1 to i32
    %c0_i32_8 = arith.constant 0 : i32
    %11 = arith.cmpi ne, %10, %c0_i32_8 : i32
    scf.if %11 {
      %c0_9 = arith.constant 0 : index
      %c0_10 = arith.constant 0 : index
      %12 = vector.load %arg7[%c0_9, %c0_10] : memref<32x128xf32, #tpu.memory_space<vmem>>, vector<32x128xf32>
      %c0_11 = arith.constant 0 : index
      %c0_12 = arith.constant 0 : index
      %13 = vector.load %arg5[%c0_11, %c0_12] : memref<1x128xf32, #tpu.memory_space<vmem>>, vector<1x128xf32>
      %14 = vector.broadcast %13 : vector<1x128xf32> to vector<32x128xf32>
      %15 = arith.addf %12, %14 : vector<32x128xf32>
      %cst_13 = arith.constant 0.000000e+00 : f32
      %16 = vector.broadcast %cst_13 : f32 to vector<32x128xf32>
      %17 = arith.maximumf %15, %16 : vector<32x128xf32>
      %18 = arith.truncf %17 : vector<32x128xf32> to vector<32x128xbf16>
      %c0_14 = arith.constant 0 : index
      %c0_15 = arith.constant 0 : index
      %19 = vector.load %arg6[%c0_14, %c0_15] : memref<32x128xbf16, #tpu.memory_space<vmem>>, vector<32x128xbf16>
      tpu.vector_store %arg6[%c0_14, %c0_15], %18 {strides = array<i32>} : memref<32x128xbf16, #tpu.memory_space<vmem>>, vector<32x128xbf16>,
    } else {
    }
    return
  }
  func.func @transform_0(%arg0: i32, %arg1: i32, %arg2: i32) -> (i32, i32) {
    %c0_i32 = arith.constant 0 : i32
    return %arg0, %arg2 : i32, i32
  }
  func.func @transform_1(%arg0: i32, %arg1: i32, %arg2: i32) -> (i32, i32) {
    %c0_i32 = arith.constant 0 : i32
    return %arg2, %arg1 : i32, i32
  }
  func.func @transform_2(%arg0: i32, %arg1: i32, %arg2: i32) -> (i32, i32) {
    %c0_i32 = arith.constant 0 : i32
    %c0_i32_0 = arith.constant 0 : i32
    return %c0_i32, %arg1 : i32, i32
  }
  func.func @transform_3(%arg0: i32, %arg1: i32, %arg2: i32) -> (i32, i32) {
    %c0_i32 = arith.constant 0 : i32
    return %arg0, %arg1 : i32, i32
  }
}

module attributes {stable_mosaic.version = 11 : i64} {
  func.func @_gemm_kernel(%arg0: i32, %arg1: i32, %arg2: i32, %arg3: memref<8x384xbf16, #tpu.memory_space<vmem>>, %arg4: memref<384x128xbf16, #tpu.memory_space<vmem>>, %arg5: memref<1x128xf32, #tpu.memory_space<vmem>>, %arg6: memref<8x128xbf16, #tpu.memory_space<vmem>>, %arg7: memref<8x128xf32, #tpu.memory_space<vmem>>) attributes {dimension_semantics = [#tpu.dimension_semantics<parallel>, #tpu.dimension_semantics<parallel>, #tpu.dimension_semantics<arbitrary>], iteration_bounds = array<i64: 1, 1, 3>, scalar_prefetch = 0 : i64, scratch_operands = 1 : i64, tpu.core_type = #tpu.core_type<tc>, window_params = [{transform_indices = @transform_0, window_bounds = array<i64: 8, 384>}, {transform_indices = @transform_1, window_bounds = array<i64: 384, 128>}, {transform_indices = @transform_2, window_bounds = array<i64: 1, 128>}, {transform_indices = @transform_3, window_bounds = array<i64: 8, 128>}]} {
    %c0_i32 = arith.constant 0 : i32
    %0 = arith.cmpi eq, %arg2, %c0_i32 : i32
    %1 = arith.extui %0 : i1 to i32
    %c0_i32_0 = arith.constant 0 : i32
    %2 = arith.cmpi ne, %1, %c0_i32_0 : i32
    scf.if %2 {
      %cst_9 = arith.constant 0.000000e+00 : f32
      %12 = vector.broadcast %cst_9 : f32 to vector<8x128xf32>
      %c0_10 = arith.constant 0 : index
      %c0_11 = arith.constant 0 : index
      %13 = vector.load %arg7[%c0_10, %c0_11] : memref<8x128xf32, #tpu.memory_space<vmem>>, vector<8x128xf32>
      tpu.vector_store %arg7[%c0_10, %c0_11], %12 {strides = array<i32>} : memref<8x128xf32, #tpu.memory_space<vmem>>, vector<8x128xf32>,
    } else {
    }
    %c0 = arith.constant 0 : index
    %c0_1 = arith.constant 0 : index
    %3 = vector.load %arg7[%c0, %c0_1] : memref<8x128xf32, #tpu.memory_space<vmem>>, vector<8x128xf32>
    %c0_2 = arith.constant 0 : index
    %c0_3 = arith.constant 0 : index
    %4 = vector.load %arg3[%c0_2, %c0_3] : memref<8x384xbf16, #tpu.memory_space<vmem>>, vector<8x384xbf16>
    %c0_4 = arith.constant 0 : index
    %c0_5 = arith.constant 0 : index
    %5 = vector.load %arg4[%c0_4, %c0_5] : memref<384x128xbf16, #tpu.memory_space<vmem>>, vector<384x128xbf16>
    %cst = arith.constant dense<0.000000e+00> : vector<8x128xf32>
    %6 = tpu.matmul %4, %5, %cst {dimension_numbers = #tpu.dot_dimension_numbers<[1], [0], [0], [1], [0, 0, 1, 1], [], []>} : vector<8x384xbf16>, vector<384x128xbf16>, vector<8x128xf32> -> vector<8x128xf32>
    %7 = arith.addf %3, %6 : vector<8x128xf32>
    %c0_6 = arith.constant 0 : index
    %c0_7 = arith.constant 0 : index
    %8 = vector.load %arg7[%c0_6, %c0_7] : memref<8x128xf32, #tpu.memory_space<vmem>>, vector<8x128xf32>
    tpu.vector_store %arg7[%c0_6, %c0_7], %7 {strides = array<i32>} : memref<8x128xf32, #tpu.memory_space<vmem>>, vector<8x128xf32>,
    %c2_i32 = arith.constant 2 : i32
    %9 = arith.cmpi eq, %arg2, %c2_i32 : i32
    %10 = arith.extui %9 : i1 to i32
    %c0_i32_8 = arith.constant 0 : i32
    %11 = arith.cmpi ne, %10, %c0_i32_8 : i32
    scf.if %11 {
      %c0_9 = arith.constant 0 : index
      %c0_10 = arith.constant 0 : index
      %12 = vector.load %arg7[%c0_9, %c0_10] : memref<8x128xf32, #tpu.memory_space<vmem>>, vector<8x128xf32>
      %c0_11 = arith.constant 0 : index
      %c0_12 = arith.constant 0 : index
      %13 = vector.load %arg5[%c0_11, %c0_12] : memref<1x128xf32, #tpu.memory_space<vmem>>, vector<1x128xf32>
      %14 = vector.broadcast %13 : vector<1x128xf32> to vector<8x128xf32>
      %15 = arith.addf %12, %14 : vector<8x128xf32>
      %cst_13 = arith.constant 0.000000e+00 : f32
      %16 = vector.broadcast %cst_13 : f32 to vector<8x128xf32>
      %17 = arith.maximumf %15, %16 : vector<8x128xf32>
      %18 = arith.truncf %17 : vector<8x128xf32> to vector<8x128xbf16>
      %c0_14 = arith.constant 0 : index
      %c0_15 = arith.constant 0 : index
      %19 = vector.load %arg6[%c0_14, %c0_15] : memref<8x128xbf16, #tpu.memory_space<vmem>>, vector<8x128xbf16>
      tpu.vector_store %arg6[%c0_14, %c0_15], %18 {strides = array<i32>} : memref<8x128xbf16, #tpu.memory_space<vmem>>, vector<8x128xbf16>,
    } else {
    }
    return
  }
  func.func @transform_0(%arg0: i32, %arg1: i32, %arg2: i32) -> (i32, i32) {
    %c0_i32 = arith.constant 0 : i32
    return %arg0, %arg2 : i32, i32
  }
  func.func @transform_1(%arg0: i32, %arg1: i32, %arg2: i32) -> (i32, i32) {
    %c0_i32 = arith.constant 0 : i32
    return %arg2, %arg1 : i32, i32
  }
  func.func @transform_2(%arg0: i32, %arg1: i32, %arg2: i32) -> (i32, i32) {
    %c0_i32 = arith.constant 0 : i32
    %c0_i32_0 = arith.constant 0 : i32
    return %c0_i32, %arg1 : i32, i32
  }
  func.func @transform_3(%arg0: i32, %arg1: i32, %arg2: i32) -> (i32, i32) {
    %c0_i32 = arith.constant 0 : i32
    return %arg0, %arg1 : i32, i32
  }
}

module attributes {stable_mosaic.version = 11 : i64} {
  func.func @_head_kernel(%arg0: i32, %arg1: memref<2x256xbf16, #tpu.memory_space<vmem>>, %arg2: memref<2x256xbf16, #tpu.memory_space<vmem>>, %arg3: memref<256x512xbf16, #tpu.memory_space<vmem>>, %arg4: memref<1x512xf32, #tpu.memory_space<vmem>>, %arg5: memref<512x512xbf16, #tpu.memory_space<vmem>>, %arg6: memref<1x512xf32, #tpu.memory_space<vmem>>, %arg7: memref<256x512xbf16, #tpu.memory_space<vmem>>, %arg8: memref<1x512xf32, #tpu.memory_space<vmem>>, %arg9: memref<512x512xbf16, #tpu.memory_space<vmem>>, %arg10: memref<1x512xf32, #tpu.memory_space<vmem>>, %arg11: memref<2x512xf32, #tpu.memory_space<vmem>>, %arg12: memref<2x512xf32, #tpu.memory_space<vmem>>) attributes {dimension_semantics = [#tpu.dimension_semantics<parallel>], iteration_bounds = array<i64: 1>, scalar_prefetch = 0 : i64, scratch_operands = 0 : i64, tpu.core_type = #tpu.core_type<tc>, window_params = [{transform_indices = @transform_0, window_bounds = array<i64: 2, 256>}, {transform_indices = @transform_1, window_bounds = array<i64: 2, 256>}, {pipeline_mode = #tpu.pipeline_mode<synchronous>, transform_indices = @transform_2, window_bounds = array<i64: 256, 512>}, {pipeline_mode = #tpu.pipeline_mode<synchronous>, transform_indices = @transform_3, window_bounds = array<i64: 1, 512>}, {pipeline_mode = #tpu.pipeline_mode<synchronous>, transform_indices = @transform_4, window_bounds = array<i64: 512, 512>}, {pipeline_mode = #tpu.pipeline_mode<synchronous>, transform_indices = @transform_5, window_bounds = array<i64: 1, 512>}, {pipeline_mode = #tpu.pipeline_mode<synchronous>, transform_indices = @transform_6, window_bounds = array<i64: 256, 512>}, {pipeline_mode = #tpu.pipeline_mode<synchronous>, transform_indices = @transform_7, window_bounds = array<i64: 1, 512>}, {pipeline_mode = #tpu.pipeline_mode<synchronous>, transform_indices = @transform_8, window_bounds = array<i64: 512, 512>}, {pipeline_mode = #tpu.pipeline_mode<synchronous>, transform_indices = @transform_9, window_bounds = array<i64: 1, 512>}, {transform_indices = @transform_10, window_bounds = array<i64: 2, 512>}, {transform_indices = @transform_11, window_bounds = array<i64: 2, 512>}]} {
    %c0 = arith.constant 0 : index
    %c0_0 = arith.constant 0 : index
    %0 = vector.load %arg1[%c0, %c0_0] : memref<2x256xbf16, #tpu.memory_space<vmem>>, vector<2x256xbf16>
    %c0_1 = arith.constant 0 : index
    %c0_2 = arith.constant 0 : index
    %1 = vector.load %arg3[%c0_1, %c0_2] : memref<256x512xbf16, #tpu.memory_space<vmem>>, vector<256x512xbf16>
    %cst = arith.constant dense<0.000000e+00> : vector<2x512xf32>
    %2 = tpu.matmul %0, %1, %cst {dimension_numbers = #tpu.dot_dimension_numbers<[1], [0], [0], [1], [0, 0, 1, 1], [], []>} : vector<2x256xbf16>, vector<256x512xbf16>, vector<2x512xf32> -> vector<2x512xf32>
    %c0_3 = arith.constant 0 : index
    %c0_4 = arith.constant 0 : index
    %3 = vector.load %arg4[%c0_3, %c0_4] : memref<1x512xf32, #tpu.memory_space<vmem>>, vector<1x512xf32>
    %4 = vector.broadcast %3 : vector<1x512xf32> to vector<2x512xf32>
    %5 = arith.addf %2, %4 : vector<2x512xf32>
    %cst_5 = arith.constant 0.000000e+00 : f32
    %6 = vector.broadcast %cst_5 : f32 to vector<2x512xf32>
    %7 = arith.maximumf %5, %6 : vector<2x512xf32>
    %8 = arith.truncf %7 : vector<2x512xf32> to vector<2x512xbf16>
    %c0_6 = arith.constant 0 : index
    %c0_7 = arith.constant 0 : index
    %9 = vector.load %arg5[%c0_6, %c0_7] : memref<512x512xbf16, #tpu.memory_space<vmem>>, vector<512x512xbf16>
    %cst_8 = arith.constant dense<0.000000e+00> : vector<2x512xf32>
    %10 = tpu.matmul %8, %9, %cst_8 {dimension_numbers = #tpu.dot_dimension_numbers<[1], [0], [0], [1], [0, 0, 1, 1], [], []>} : vector<2x512xbf16>, vector<512x512xbf16>, vector<2x512xf32> -> vector<2x512xf32>
    %c0_9 = arith.constant 0 : index
    %c0_10 = arith.constant 0 : index
    %11 = vector.load %arg6[%c0_9, %c0_10] : memref<1x512xf32, #tpu.memory_space<vmem>>, vector<1x512xf32>
    %12 = vector.broadcast %11 : vector<1x512xf32> to vector<2x512xf32>
    %13 = arith.addf %10, %12 : vector<2x512xf32>
    %c0_11 = arith.constant 0 : index
    %c0_12 = arith.constant 0 : index
    %14 = vector.load %arg11[%c0_11, %c0_12] : memref<2x512xf32, #tpu.memory_space<vmem>>, vector<2x512xf32>
    tpu.vector_store %arg11[%c0_11, %c0_12], %13 {strides = array<i32>} : memref<2x512xf32, #tpu.memory_space<vmem>>, vector<2x512xf32>,
    %c0_13 = arith.constant 0 : index
    %c0_14 = arith.constant 0 : index
    %15 = vector.load %arg2[%c0_13, %c0_14] : memref<2x256xbf16, #tpu.memory_space<vmem>>, vector<2x256xbf16>
    %c0_15 = arith.constant 0 : index
    %c0_16 = arith.constant 0 : index
    %16 = vector.load %arg7[%c0_15, %c0_16] : memref<256x512xbf16, #tpu.memory_space<vmem>>, vector<256x512xbf16>
    %cst_17 = arith.constant dense<0.000000e+00> : vector<2x512xf32>
    %17 = tpu.matmul %15, %16, %cst_17 {dimension_numbers = #tpu.dot_dimension_numbers<[1], [0], [0], [1], [0, 0, 1, 1], [], []>} : vector<2x256xbf16>, vector<256x512xbf16>, vector<2x512xf32> -> vector<2x512xf32>
    %c0_18 = arith.constant 0 : index
    %c0_19 = arith.constant 0 : index
    %18 = vector.load %arg8[%c0_18, %c0_19] : memref<1x512xf32, #tpu.memory_space<vmem>>, vector<1x512xf32>
    %19 = vector.broadcast %18 : vector<1x512xf32> to vector<2x512xf32>
    %20 = arith.addf %17, %19 : vector<2x512xf32>
    %cst_20 = arith.constant 0.000000e+00 : f32
    %21 = vector.broadcast %cst_20 : f32 to vector<2x512xf32>
    %22 = arith.maximumf %20, %21 : vector<2x512xf32>
    %23 = arith.truncf %22 : vector<2x512xf32> to vector<2x512xbf16>
    %c0_21 = arith.constant 0 : index
    %c0_22 = arith.constant 0 : index
    %24 = vector.load %arg9[%c0_21, %c0_22] : memref<512x512xbf16, #tpu.memory_space<vmem>>, vector<512x512xbf16>
    %cst_23 = arith.constant dense<0.000000e+00> : vector<2x512xf32>
    %25 = tpu.matmul %23, %24, %cst_23 {dimension_numbers = #tpu.dot_dimension_numbers<[1], [0], [0], [1], [0, 0, 1, 1], [], []>} : vector<2x512xbf16>, vector<512x512xbf16>, vector<2x512xf32> -> vector<2x512xf32>
    %c0_24 = arith.constant 0 : index
    %c0_25 = arith.constant 0 : index
    %26 = vector.load %arg10[%c0_24, %c0_25] : memref<1x512xf32, #tpu.memory_space<vmem>>, vector<1x512xf32>
    %27 = vector.broadcast %26 : vector<1x512xf32> to vector<2x512xf32>
    %28 = arith.addf %25, %27 : vector<2x512xf32>
    %c0_26 = arith.constant 0 : index
    %c0_27 = arith.constant 0 : index
    %29 = vector.load %arg12[%c0_26, %c0_27] : memref<2x512xf32, #tpu.memory_space<vmem>>, vector<2x512xf32>
    tpu.vector_store %arg12[%c0_26, %c0_27], %28 {strides = array<i32>} : memref<2x512xf32, #tpu.memory_space<vmem>>, vector<2x512xf32>,
    return
  }
  func.func @transform_0(%arg0: i32) -> (i32, i32) {
    %c0_i32 = arith.constant 0 : i32
    %c0_i32_0 = arith.constant 0 : i32
    return %arg0, %c0_i32 : i32, i32
  }
  func.func @transform_1(%arg0: i32) -> (i32, i32) {
    %c0_i32 = arith.constant 0 : i32
    %c0_i32_0 = arith.constant 0 : i32
    return %arg0, %c0_i32 : i32, i32
  }
  func.func @transform_2(%arg0: i32) -> (i32, i32) {
    %c0_i32 = arith.constant 0 : i32
    %c0_i32_0 = arith.constant 0 : i32
    %c0_i32_1 = arith.constant 0 : i32
    return %c0_i32, %c0_i32_0 : i32, i32
  }
  func.func @transform_3(%arg0: i32) -> (i32, i32) {
    %c0_i32 = arith.constant 0 : i32
    %c0_i32_0 = arith.constant 0 : i32
    %c0_i32_1 = arith.constant 0 : i32
    return %c0_i32, %c0_i32_0 : i32, i32
  }
  func.func @transform_4(%arg0: i32) -> (i32, i32) {
    %c0_i32 = arith.constant 0 : i32
    %c0_i32_0 = arith.constant 0 : i32
    %c0_i32_1 = arith.constant 0 : i32
    return %c0_i32, %c0_i32_0 : i32, i32
  }
  func.func @transform_5(%arg0: i32) -> (i32, i32) {
    %c0_i32 = arith.constant 0 : i32
    %c0_i32_0 = arith.constant 0 : i32
    %c0_i32_1 = arith.constant 0 : i32
    return %c0_i32, %c0_i32_0 : i32, i32
  }
  func.func @transform_6(%arg0: i32) -> (i32, i32) {
    %c0_i32 = arith.constant 0 : i32
    %c0_i32_0 = arith.constant 0 : i32
    %c0_i32_1 = arith.constant 0 : i32
    return %c0_i32, %c0_i32_0 : i32, i32
  }
  func.func @transform_7(%arg0: i32) -> (i32, i32) {
    %c0_i32 = arith.constant 0 : i32
    %c0_i32_0 = arith.constant 0 : i32
    %c0_i32_1 = arith.constant 0 : i32
    return %c0_i32, %c0_i32_0 : i32, i32
  }
  func.func @transform_8(%arg0: i32) -> (i32, i32) {
    %c0_i32 = arith.constant 0 : i32
    %c0_i32_0 = arith.constant 0 : i32
    %c0_i32_1 = arith.constant 0 : i32
    return %c0_i32, %c0_i32_0 : i32, i32
  }
  func.func @transform_9(%arg0: i32) -> (i32, i32) {
    %c0_i32 = arith.constant 0 : i32
    %c0_i32_0 = arith.constant 0 : i32
    %c0_i32_1 = arith.constant 0 : i32
    return %c0_i32, %c0_i32_0 : i32, i32
  }
  func.func @transform_10(%arg0: i32) -> (i32, i32) {
    %c0_i32 = arith.constant 0 : i32
    %c0_i32_0 = arith.constant 0 : i32
    return %arg0, %c0_i32 : i32, i32
  }
  func.func @transform_11(%arg0: i32) -> (i32, i32) {
    %c0_i32 = arith.constant 0 : i32
    %c0_i32_0 = arith.constant 0 : i32
    return %arg0, %c0_i32 : i32, i32
  }
}

</mosaic_0001>

<bundles_post_ra>
// kernel: rnd_forward.4
= control target key start
LH: loop header
LB: loop body
LE: loop exit
PB: predicated region body
PF: predicated region fallthrough
CT: control target
= control target key end

     0   :  { %vm19_vm0 = vcmask 523264   ;;  %vm648_vm1 = vcmask 519168   ;;  %s1315_s1 = inlined_call_operand.vmem [shape: bf16[192,64], index: 1, kind: input, shape index: {}]   ;;  %s1316_s0 = inlined_call_operand.vmem [shape: bf16[200,192], index: 0, kind: input, shape index: {}]   ;;  %s1317_s2 = inlined_call_operand.vmem [shape: f32[1,64], index: 2, kind: input, shape index: {}]   ;;  %s1318_s3 = inlined_call_operand.vmem [shape: bf16[200,64], index: 3, kind: output, shape index: {}]  }
   0x1   :  { %v866_v0 = vld [vmem:[%s1315_s1 + $0x38] sm:$0xff]  ;;  %v865_v2 = vld [vmem:[%s1315_s1 + $0x30] sm:$0xff]  ;;  %v864_v4 = vld [vmem:[%s1315_s1 + $0x28] sm:$0xff] }
   0x2   :  { %v870_v1 = vld [vmem:[%s1315_s1 + $0x58] sm:$0xff]  ;;  %345 = vmatpush.bf16.msra.mxu0 %v866_v0  ;;  %871 = vmatpush.bf16.msra.mxu2 %v866_v0  ;;  %v869_v3 = vld [vmem:[%s1315_s1 + $0x50] sm:$0xff]  ;;  %v868_v5 = vld [vmem:[%s1315_s1 + $0x48] sm:$0xff] }
   0x3   :  { %422 = vmatpush.bf16.msra.mxu1 %v870_v1  ;;  %879 = vmatpush.bf16.msra.mxu3 %v870_v1  ;;  %v863_v6 = vld [vmem:[%s1315_s1 + $0x20] sm:$0xff]  ;;  %v682_v9 = vld [vmem:[%s1316_s0 + $0x8] sm:$0xf0]  ;;  %v849_v10 = vld [vmem:[%s1316_s0 + $0x74] sm:$0xf] }
   0x4   :  { %v867_v7 = vld [vmem:[%s1315_s1 + $0x40] sm:$0xff]  ;;  %v738_v11 = vld [vmem:[%s1316_s0 + $0x78] sm:$0xf0]  ;;  %v861_v15 = vld [vmem:[%s1315_s1 + $0x10] sm:$0xff] }
   0x5   :  { %v835_v8 = vld [vmem:[%s1316_s0 + $0x4] sm:$0xf]  ;;  %v862_v13 = vld [vmem:[%s1315_s1 + $0x18] sm:$0xff]  ;;  %v741_v14 = vor.u32 %v849_v10, %v738_v11  ;;  %v860_v16 = vld [vmem:[%s1315_s1 + $0x8] sm:$0xff] }
   0x6   :  { %346 = vmatpush.bf16.msra.mxu0 %v865_v2  ;;  %872 = vmatpush.bf16.msra.mxu2 %v865_v2  ;;  %v685_v12 = vor.u32 %v835_v8, %v682_v9  ;;  %v859_v17 = vld [vmem:[%s1315_s1] sm:$0xff]  ;;  %v836_v19 = vld [vmem:[%s1316_s0 + $0x4] sm:$0xf0]  ;;  %v837_v22 = vld [vmem:[%s1316_s0 + $0x14] sm:$0xf] }
   0x7   :  { %423 = vmatpush.bf16.msra.mxu1 %v869_v3  ;;  %880 = vmatpush.bf16.msra.mxu3 %v869_v3  ;;  %v680_v18 = vld [vmem:[%s1316_s0] sm:$0xf]  ;;  %v848_v21 = vld [vmem:[%s1316_s0 + $0x64] sm:$0xf0]  ;;  %v690_v23 = vld [vmem:[%s1316_s0 + $0x18] sm:$0xf0] }
   0x8   :  { %v728_v20 = vld [vmem:[%s1316_s0 + $0x60] sm:$0xf]  ;;  %v851_v24 = vld [vmem:[%s1316_s0 + $0x84] sm:$0xf]  ;;  %v746_v25 = vld [vmem:[%s1316_s0 + $0x88] sm:$0xf0]  ;;  %v681_v26 = vor.u32 %v836_v19, %v680_v18  ;;  %v693_v28 = vor.u32 %v837_v22, %v690_v23 }
   0x9   :  { %v729_v27 = vor.u32 %v848_v21, %v728_v20  ;;  %v749_v29 = vor.u32 %v851_v24, %v746_v25  ;;  %v688_v30 = vld [vmem:[%s1316_s0 + $0x10] sm:$0xf]  ;;  %v838_v31 = vld [vmem:[%s1316_s0 + $0x14] sm:$0xf0]  ;;  %v839_v34 = vld [vmem:[%s1316_s0 + $0x24] sm:$0xf] }
   0xa   :  { %347 = vmatpush.bf16.msra.mxu0 %v864_v4  ;;  %873 = vmatpush.bf16.msra.mxu2 %v864_v4  ;;  %v736_v32 = vld [vmem:[%s1316_s0 + $0x70] sm:$0xf]  ;;  %v850_v33 = vld [vmem:[%s1316_s0 + $0x74] sm:$0xf0]  ;;  %v698_v35 = vld [vmem:[%s1316_s0 + $0x28] sm:$0xf0]  ;;  %v689_v38 = vor.u32 %v838_v31, %v688_v30 }
   0xb   :  { %424 = vmatpush.bf16.msra.mxu1 %v868_v5  ;;  %881 = vmatpush.bf16.msra.mxu3 %v868_v5  ;;  %v853_v36 = vld [vmem:[%s1316_s0 + $0x94] sm:$0xf]  ;;  %v754_v37 = vld [vmem:[%s1316_s0 + $0x98] sm:$0xf0]  ;;  %v737_v39 = vor.u32 %v850_v33, %v736_v32  ;;  %v701_v40 = vor.u32 %v839_v34, %v698_v35  ;;  %v696_v42 = vld [vmem:[%s1316_s0 + $0x20] sm:$0xf] }
   0xc   :  { %v757_v41 = vor.u32 %v853_v36, %v754_v37  ;;  %v840_v43 = vld [vmem:[%s1316_s0 + $0x24] sm:$0xf0]  ;;  %v744_v44 = vld [vmem:[%s1316_s0 + $0x80] sm:$0xf]  ;;  %v841_v46 = vld [vmem:[%s1316_s0 + $0x34] sm:$0xf] }
   0xd   :  { %v852_v45 = vld [vmem:[%s1316_s0 + $0x84] sm:$0xf0]  ;;  %v706_v47 = vld [vmem:[%s1316_s0 + $0x38] sm:$0xf0]  ;;  %v855_v48 = vld [vmem:[%s1316_s0 + $0xa4] sm:$0xf]  ;;  %v697_v50 = vor.u32 %v840_v43, %v696_v42 }
   0xe   :  { %348 = vmatpush.bf16.msra.mxu0 %v863_v6  ;;  %874 = vmatpush.bf16.msra.mxu2 %v863_v6  ;;  %v762_v49 = vld [vmem:[%s1316_s0 + $0xa8] sm:$0xf0]  ;;  %v745_v51 = vor.u32 %v852_v45, %v744_v44  ;;  %v709_v52 = vor.u32 %v841_v46, %v706_v47  ;;  %v704_v54 = vld [vmem:[%s1316_s0 + $0x30] sm:$0xf]  ;;  %v842_v55 = vld [vmem:[%s1316_s0 + $0x34] sm:$0xf0] }
   0xf   :  { %425 = vmatpush.bf16.msra.mxu1 %v867_v7  ;;  %882 = vmatpush.bf16.msra.mxu3 %v867_v7  ;;  %v765_v53 = vor.u32 %v855_v48, %v762_v49  ;;  %v752_v56 = vld [vmem:[%s1316_s0 + $0x90] sm:$0xf]  ;;  %v854_v57 = vld [vmem:[%s1316_s0 + $0x94] sm:$0xf0]  ;;  %v843_v58 = vld [vmem:[%s1316_s0 + $0x44] sm:$0xf]  ;;  %v705_v62 = vor.u32 %v842_v55, %v704_v54 }
  0x10   :  { %v714_v59 = vld [vmem:[%s1316_s0 + $0x48] sm:$0xf0]  ;;  %v857_v60 = vld [vmem:[%s1316_s0 + $0xb4] sm:$0xf]  ;;  %v770_v61 = vld [vmem:[%s1316_s0 + $0xb8] sm:$0xf0]  ;;  %v753_v63 = vor.u32 %v854_v57, %v752_v56 }
  0x11   :  { %v717_v0 = vor.u32 %v843_v58, %v714_v59  ;;  %v773_v1 = vor.u32 %v857_v60, %v770_v61  ;;  %v94_v2 = vld [vmem:[%s1316_s0 + $0xc0] sm:$0xff]  ;;  %v844_v4 = vld [vmem:[%s1316_s0 + $0x44] sm:$0xf0]  ;;  %v845_v7 = vld [vmem:[%s1316_s0 + $0x54] sm:$0xf]  ;;  %v885_v23 = vmov 0.0  }
  0x12   :  { %822 = vmatmul.msk.bf16.vlgmr.msra.gmra.mxu1 %vm19_vm0, %v685_v12  ;;  %349 = vmatpush.bf16.msra.mxu0 %v862_v13  ;;  %v712_v3 = vld [vmem:[%s1316_s0 + $0x40] sm:$0xf]  ;;  %v856_v6 = vld [vmem:[%s1316_s0 + $0xa4] sm:$0xf0]  ;;  %v722_v8 = vld [vmem:[%s1316_s0 + $0x58] sm:$0xf0]  ;;  %v193_v9 = vunpack.c.h.b16 %v94_v2  ;;  %v192_v24 = vunpack.c.l.b16 %v94_v2 }
  0x13   :  { %875 = vmatpush.bf16.msra.mxu2 %v862_v13  ;;  %829 = vmatmul.msk.bf16.vlgmr.msra.gmra.mxu3 %vm19_vm0, %v741_v14  ;;  %v760_v5 = vld [vmem:[%s1316_s0 + $0xa0] sm:$0xf]  ;;  %v713_v10 = vor.u32 %v844_v4, %v712_v3  ;;  %v725_v12 = vor.u32 %v845_v7, %v722_v8  ;;  %v720_v14 = vld [vmem:[%s1316_s0 + $0x50] sm:$0xf]  ;;  %v847_v18 = vld [vmem:[%s1316_s0 + $0x64] sm:$0xf] }
  0x14   :  { %v761_v11 = vor.u32 %v856_v6, %v760_v5  ;;  %v219_v13 = vpack.c.b16 %v193_v9, %v193_v9  ;;  %v730_v19 = vld [vmem:[%s1316_s0 + $0x68] sm:$0xf0]  ;;  %20 = vst.msk [vmem:[#allocation2] sm:$0xff] %vm19_vm0, %v885_v23  ;;  %v218_v25 = vpack.c.b16 %v192_v24, %v192_v24 }
  0x15   :  { %v733_v22 = vor.u32 %v847_v18, %v730_v19  ;;  %21 = vst.msk [vmem:[#allocation2 + $0x8] sm:$0xff] %vm19_vm0, %v885_v23 }
  0x16   :  { %350 = vmatpush.bf16.msra.mxu0 %v861_v15  ;;  %22 = vst.msk [vmem:[#allocation2 + $0x10] sm:$0xff] %vm19_vm0, %v885_v23 }
  0x17   :  { %876 = vmatpush.bf16.msra.mxu2 %v861_v15  ;;  %v846_v15 = vld [vmem:[%s1316_s0 + $0x54] sm:$0xf0]  ;;  %23 = vst.msk [vmem:[#allocation2 + $0x18] sm:$0xff] %vm19_vm0, %v885_v23 }
  0x18   :  { %v721_v20 = vor.u32 %v846_v15, %v720_v14  ;;  %24 = vst.msk [vmem:[#allocation2 + $0x20] sm:$0xff] %vm19_vm0, %v885_v23 }
  0x19   :  { %25 = vst.msk [vmem:[#allocation2 + $0x28] sm:$0xff] %vm19_vm0, %v885_v23 }
  0x1a   :  { %351 = vmatpush.bf16.msra.mxu0 %v860_v16  ;;  %26 = vst.msk [vmem:[#allocation2 + $0x30] sm:$0xff] %vm19_vm0, %v885_v23 }
  0x1b   :  { %877 = vmatpush.bf16.msra.mxu2 %v860_v16  ;;  %v768_v16 = vld [vmem:[%s1316_s0 + $0xb0] sm:$0xf]  ;;  %27 = vst.msk [vmem:[#allocation2 + $0x38] sm:$0xff] %vm19_vm0, %v885_v23 }
  0x1c   :  { %28 = vst.msk [vmem:[#allocation2 + $0x40] sm:$0xff] %vm19_vm0, %v885_v23  ;;  %v46_v36 = vld [vmem:[#allocation2 + $0x8] sm:$0xff] }
  0x1d   :  { %29 = vst.msk [vmem:[#allocation2 + $0x48] sm:$0xff] %vm19_vm0, %v885_v23  ;;  %v47_v47 = vld [vmem:[#allocation2 + $0x10] sm:$0xff] }
  0x1e   :  { %352 = vmatpush.bf16.msra.mxu0 %v859_v17  ;;  %30 = vst.msk [vmem:[#allocation2 + $0x50] sm:$0xff] %vm19_vm0, %v885_v23  ;;  %v48_v60 = vld [vmem:[#allocation2 + $0x18] sm:$0xff] }
  0x1f   :  { %878 = vmatpush.bf16.msra.mxu2 %v859_v17  ;;  %v858_v17 = vld [vmem:[%s1316_s0 + $0xb4] sm:$0xf0]  ;;  %31 = vst.msk [vmem:[#allocation2 + $0x58] sm:$0xff] %vm19_vm0, %v885_v23 }
  0x20   :  { %v769_v21 = vor.u32 %v858_v17, %v768_v16  ;;  %32 = vst.msk [vmem:[#allocation2 + $0x60] sm:$0xff] %vm19_vm0, %v885_v23 }
  0x21   :  { %353 = vmatmul.bf16.vlgmr.msra.gmra.mxu0 %v681_v26  ;;  %33 = vst.msk [vmem:[#allocation2 + $0x68] sm:$0xff] %vm19_vm0, %v885_v23 }
  0x22   :  { %383 = vmatmul.bf16.vlgmr.msra.gmra.mxu2 %v729_v27  ;;  %823 = vmatmul.msk.bf16.gmra.mxu1 %vm19_vm0, %v693_v28  ;;  %34 = vst.msk [vmem:[#allocation2 + $0x70] sm:$0xff] %vm19_vm0, %v885_v23 }
  0x23   :  { %830 = vmatmul.msk.bf16.gmra.mxu3 %vm19_vm0, %v749_v29  ;;  %35 = vst.msk [vmem:[#allocation2 + $0x78] sm:$0xff] %vm19_vm0, %v885_v23  ;;  %v45_v29 = vld [vmem:[#allocation2] sm:$0xff] }
  0x24   :  { %36 = vst.msk [vmem:[#allocation2 + $0x80] sm:$0xff] %vm19_vm0, %v885_v23 }
  0x25   :  { %37 = vst.msk [vmem:[#allocation2 + $0x88] sm:$0xff] %vm19_vm0, %v885_v23 }
  0x26   :  { %38 = vst.msk [vmem:[#allocation2 + $0x90] sm:$0xff] %vm19_vm0, %v885_v23 }
  0x27   :  { %39 = vst.msk [vmem:[#allocation2 + $0x98] sm:$0xff] %vm19_vm0, %v885_v23 }
  0x28   :  { %40 = vst.msk [vmem:[#allocation2 + $0xa0] sm:$0xff] %vm19_vm0, %v885_v23 }
  0x29   :  { %41 = vst.msk [vmem:[#allocation2 + $0xa8] sm:$0xff] %vm19_vm0, %v885_v23  ;;  %v59_v57 = vld [vmem:[#allocation2 + $0x70] sm:$0xff] }
  0x2a   :  { %42 = vst.msk [vmem:[#allocation2 + $0xb0] sm:$0xff] %vm19_vm0, %v885_v23  ;;  %v60_v7 = vld [vmem:[#allocation2 + $0x78] sm:$0xff] }
  0x2b   :  { %43 = vst.msk [vmem:[#allocation2 + $0xb8] sm:$0xff] %vm19_vm0, %v885_v23  ;;  %v61_v24 = vld [vmem:[#allocation2 + $0x80] sm:$0xff] }
  0x2c   :  { %44 = vst.msk [vmem:[#allocation2 + $0xc0] sm:$0xff] %vm19_vm0, %v885_v23 }
  0x31   :  { %358 = vmatmul.bf16.gmra.mxu0 %v689_v38 }
  0x32   :  { %388 = vmatmul.bf16.gmra.mxu2 %v737_v39  ;;  %824 = vmatmul.msk.bf16.gmra.mxu1 %vm19_vm0, %v701_v40  ;;  %v1135_v39 = vld [vmem:[%s1317_s2] ss:$0 sm:$0xff] }
  0x33   :  { %831 = vmatmul.msk.bf16.gmra.mxu3 %vm19_vm0, %v757_v41 }
  0x41   :  { %363 = vmatmul.bf16.gmra.mxu0 %v697_v50 }
  0x42   :  { %393 = vmatmul.bf16.gmra.mxu2 %v745_v51  ;;  %825 = vmatmul.msk.bf16.gmra.mxu1 %vm19_vm0, %v709_v52 }
  0x43   :  { %832 = vmatmul.msk.bf16.gmra.mxu3 %vm19_vm0, %v765_v53 }
  0x51   :  { %368 = vmatmul.bf16.gmra.mxu0 %v705_v62 }
  0x52   :  { %398 = vmatmul.bf16.gmra.mxu2 %v753_v63  ;;  %826 = vmatmul.msk.bf16.gmra.mxu1 %vm19_vm0, %v717_v0 }
  0x53   :  { %833 = vmatmul.msk.bf16.gmra.mxu3 %vm19_vm0, %v773_v1 }
  0x61   :  { %373 = vmatmul.bf16.gmra.mxu0 %v713_v10  ;;  %v49_v10 = vld [vmem:[#allocation2 + $0x20] sm:$0xff] }
  0x62   :  { %403 = vmatmul.bf16.gmra.mxu2 %v761_v11  ;;  %827 = vmatmul.msk.bf16.gmra.mxu1 %vm19_vm0, %v725_v12 }
  0x63   :  { %834 = vmatmul.msk.bf16.gmra.mxu3 %vm19_vm0, %v219_v13 }
  0x71   :  { %378 = vmatmul.bf16.gmra.mxu0 %v721_v20 }
  0x72   :  { %408 = vmatmul.bf16.gmra.mxu2 %v769_v21  ;;  %828 = vmatmul.msk.bf16.gmra.mxu1 %vm19_vm0, %v733_v22 }
  0x82   :  { %413 = vmatmul.bf16.gmra.mxu2 %v218_v25 }
  0x8f   :  { %v427_v26 = vpop.f32.mrf.mxu1 }
  0x96   :  { %v462_v27 = vpop.f32.mrf.mxu3 }
  0x97   :  { %v429_v28 = vpop.f32.mrf.mxu1 }
  0x9e   :  { %v354_v30 = vpop.f32.mrf.mxu0  ;;  %v464_v31 = vpop.f32.mrf.mxu3 }
  0x9f   :  { %v428_v32 = vadd.f32 %v427_v26, %v354_v30  ;;  %v432_v33 = vpop.f32.mrf.mxu1 }
  0xa1   :  { %v491_v34 = vadd.f32 %v428_v32, %v45_v29 }
  0xa3   :  { %516 = vst.msk [vmem:[#allocation2] sm:$0xff] %vm19_vm0, %v491_v34 }
  0xa5   :  { %v1128_v35 = vpop.f32.mrf.mxu2 }
  0xa6   :  { %v356_v37 = vpop.f32.mrf.mxu0  ;;  %v1130_v38 = vpop.f32.mrf.mxu3 }
  0xa7   :  { %v430_v40 = vadd.f32 %v429_v28, %v356_v37  ;;  %v434_v41 = vpop.f32.mrf.mxu1  ;;  %v50_v28 = vld [vmem:[#allocation2 + $0x28] sm:$0xff] }
  0xa9   :  { %v492_v42 = vadd.f32 %v430_v40, %v46_v36 }
  0xaa   :  { %v544_v43 = vld [vmem:[#allocation2] sm:$0xff] }
  0xab   :  { %v573_v44 = vadd.f32 %v1135_v39, %v544_v43  ;;  %517 = vst.msk [vmem:[#allocation2 + $0x8] sm:$0xff] %vm19_vm0, %v492_v42 }
  0xad   :  { %v598_v45 = vmax.f32 %v573_v44, 0.0  ;;  %v1139_v46 = vpop.f32.mrf.mxu2  ;;  %v62_v44 = vld [vmem:[#allocation2 + $0x88] sm:$0xff] }
  0xae   :  { %v359_v48 = vpop.f32.mrf.mxu0  ;;  %v1141_v49 = vpop.f32.mrf.mxu3 }
  0xaf   :  { %v623_v50 = vpack.c.bf16 %v598_v45, %v598_v45  ;;  %v433_v51 = vadd.f32 %v432_v33, %v359_v48  ;;  %v437_v52 = vpop.f32.mrf.mxu1 }
  0xb1   :  { %649 = vst.msk [vmem:[%s1318_s3] sm:$0xf] %vm648_vm1, %v623_v50  ;;  %v493_v53 = vadd.f32 %v433_v51, %v47_v47  ;;  %v51_v50 = vld [vmem:[#allocation2 + $0x30] sm:$0xff] }
  0xb2   :  { %v545_v54 = vld [vmem:[#allocation2 + $0x8] sm:$0xff] }
  0xb3   :  { %v574_v55 = vadd.f32 %v1135_v39, %v545_v54  ;;  %518 = vst.msk [vmem:[#allocation2 + $0x10] sm:$0xff] %vm19_vm0, %v493_v53 }
  0xb5   :  { %v599_v56 = vmax.f32 %v574_v55, 0.0  ;;  %v389_v58 = vpop.f32.mrf.mxu2 }
  0xb6   :  { %v463_v59 = vadd.f32 %v462_v27, %v389_v58  ;;  %v361_v61 = vpop.f32.mrf.mxu0  ;;  %v1149_v62 = vpop.f32.mrf.mxu3 }
  0xb7   :  { %v624_v63 = vpack.c.bf16 %v599_v56, %v599_v56  ;;  %v435_v0 = vadd.f32 %v434_v41, %v361_v61  ;;  %v439_v1 = vpop.f32.mrf.mxu1 }
  0xb8   :  { %v505_v2 = vadd.f32 %v463_v59, %v59_v57 }
  0xb9   :  { %650 = vst.msk [vmem:[%s1318_s3 + $0x4] sm:$0xf] %vm648_vm1, %v624_v63  ;;  %v494_v3 = vadd.f32 %v435_v0, %v48_v60  ;;  %v63_v0 = vld [vmem:[#allocation2 + $0x90] sm:$0xff] }
  0xba   :  { %v546_v4 = vld [vmem:[#allocation2 + $0x10] sm:$0xff]  ;;  %530 = vst.msk [vmem:[#allocation2 + $0x70] sm:$0xff] %vm19_vm0, %v505_v2 }
  0xbb   :  { %v575_v5 = vadd.f32 %v1135_v39, %v546_v4  ;;  %519 = vst.msk [vmem:[#allocation2 + $0x18] sm:$0xff] %vm19_vm0, %v494_v3  ;;  %v52_v4 = vld [vmem:[#allocation2 + $0x38] sm:$0xff] }
  0xbd   :  { %v600_v6 = vmax.f32 %v575_v5, 0.0  ;;  %v391_v8 = vpop.f32.mrf.mxu2 }
  0xbe   :  { %v465_v9 = vadd.f32 %v464_v31, %v391_v8  ;;  %v364_v11 = vpop.f32.mrf.mxu0  ;;  %v1158_v12 = vpop.f32.mrf.mxu3 }
  0xbf   :  { %v625_v13 = vpack.c.bf16 %v600_v6, %v600_v6  ;;  %v438_v14 = vadd.f32 %v437_v52, %v364_v11  ;;  %v442_v15 = vpop.f32.mrf.mxu1 }
  0xc0   :  { %v506_v16 = vadd.f32 %v465_v9, %v60_v7 }
  0xc1   :  { %651 = vst.msk [vmem:[%s1318_s3 + $0x8] sm:$0xf] %vm648_vm1, %v625_v13  ;;  %v558_v17 = vld [vmem:[#allocation2 + $0x70] sm:$0xff]  ;;  %v495_v18 = vadd.f32 %v438_v14, %v49_v10 }
  0xc2   :  { %v587_v19 = vadd.f32 %v1135_v39, %v558_v17  ;;  %v547_v20 = vld [vmem:[#allocation2 + $0x18] sm:$0xff]  ;;  %531 = vst.msk [vmem:[#allocation2 + $0x78] sm:$0xff] %vm19_vm0, %v506_v16 }
  0xc3   :  { %v576_v21 = vadd.f32 %v1135_v39, %v547_v20  ;;  %520 = vst.msk [vmem:[#allocation2 + $0x20] sm:$0xff] %vm19_vm0, %v495_v18  ;;  %v64_v18 = vld [vmem:[#allocation2 + $0x98] sm:$0xff] }
  0xc4   :  { %v612_v22 = vmax.f32 %v587_v19, 0.0 }
  0xc5   :  { %v601_v23 = vmax.f32 %v576_v21, 0.0  ;;  %v394_v25 = vpop.f32.mrf.mxu2 }
  0xc6   :  { %v637_v26 = vpack.c.bf16 %v612_v22, %v612_v22  ;;  %v468_v27 = vadd.f32 %v1130_v38, %v394_v25  ;;  %v366_v29 = vpop.f32.mrf.mxu0  ;;  %v1169_v30 = vpop.f32.mrf.mxu3  ;;  %v53_v22 = vld [vmem:[#allocation2 + $0x40] sm:$0xff] }
  0xc7   :  { %v626_v31 = vpack.c.bf16 %v601_v23, %v601_v23  ;;  %v440_v32 = vadd.f32 %v439_v1, %v366_v29  ;;  %v444_v33 = vpop.f32.mrf.mxu1 }
  0xc8   :  { %663 = vst.msk [vmem:[%s1318_s3 + $0x38] sm:$0xf] %vm648_vm1, %v637_v26  ;;  %v507_v34 = vadd.f32 %v468_v27, %v61_v24 }
  0xc9   :  { %652 = vst.msk [vmem:[%s1318_s3 + $0xc] sm:$0xf] %vm648_vm1, %v626_v31  ;;  %v559_v36 = vld [vmem:[#allocation2 + $0x78] sm:$0xff]  ;;  %v496_v37 = vadd.f32 %v440_v32, %v50_v28 }
  0xca   :  { %v588_v38 = vadd.f32 %v1135_v39, %v559_v36  ;;  %v548_v40 = vld [vmem:[#allocation2 + $0x20] sm:$0xff]  ;;  %532 = vst.msk [vmem:[#allocation2 + $0x80] sm:$0xff] %vm19_vm0, %v507_v34 }
  0xcb   :  { %v577_v41 = vadd.f32 %v1135_v39, %v548_v40  ;;  %521 = vst.msk [vmem:[#allocation2 + $0x28] sm:$0xff] %vm19_vm0, %v496_v37  ;;  %v65_v37 = vld [vmem:[#allocation2 + $0xa0] sm:$0xff] }
  0xcc   :  { %v613_v42 = vmax.f32 %v588_v38, 0.0 }
  0xcd   :  { %v602_v43 = vmax.f32 %v577_v41, 0.0  ;;  %v396_v45 = vpop.f32.mrf.mxu2 }
  0xce   :  { %v638_v47 = vpack.c.bf16 %v613_v42, %v613_v42  ;;  %v470_v48 = vadd.f32 %v1141_v49, %v396_v45  ;;  %v369_v51 = vpop.f32.mrf.mxu0  ;;  %v1184_v52 = vpop.f32.mrf.mxu3  ;;  %v54_v42 = vld [vmem:[#allocation2 + $0x48] sm:$0xff] }
  0xcf   :  { %v627_v53 = vpack.c.bf16 %v602_v43, %v602_v43  ;;  %v443_v54 = vadd.f32 %v442_v15, %v369_v51  ;;  %v447_v55 = vpop.f32.mrf.mxu1 }
  0xd0   :  { %664 = vst.msk [vmem:[%s1318_s3 + $0x3c] sm:$0xf] %vm648_vm1, %v638_v47  ;;  %v508_v56 = vadd.f32 %v470_v48, %v62_v44 }
  0xd1   :  { %653 = vst.msk [vmem:[%s1318_s3 + $0x10] sm:$0xf] %vm648_vm1, %v627_v53  ;;  %v560_v57 = vld [vmem:[#allocation2 + $0x80] sm:$0xff]  ;;  %v497_v49 = vadd.f32 %v443_v54, %v51_v50 }
  0xd2   :  { %v589_v58 = vadd.f32 %v1135_v39, %v560_v57  ;;  %v549_v59 = vld [vmem:[#allocation2 + $0x28] sm:$0xff]  ;;  %533 = vst.msk [vmem:[#allocation2 + $0x88] sm:$0xff] %vm19_vm0, %v508_v56 }
  0xd3   :  { %v578_v60 = vadd.f32 %v1135_v39, %v549_v59  ;;  %522 = vst.msk [vmem:[#allocation2 + $0x30] sm:$0xff] %vm19_vm0, %v497_v49  ;;  %v66_v49 = vld [vmem:[#allocation2 + $0xa8] sm:$0xff] }
  0xd4   :  { %v614_v61 = vmax.f32 %v589_v58, 0.0 }
  0xd5   :  { %v603_v63 = vmax.f32 %v578_v60, 0.0  ;;  %v399_v1 = vpop.f32.mrf.mxu2 }
  0xd6   :  { %v639_v2 = vpack.c.bf16 %v614_v61, %v614_v61  ;;  %v473_v3 = vadd.f32 %v1149_v62, %v399_v1  ;;  %v371_v5 = vpop.f32.mrf.mxu0  ;;  %v1199_v6 = vpop.f32.mrf.mxu3  ;;  %v55_v61 = vld [vmem:[#allocation2 + $0x50] sm:$0xff] }
  0xd7   :  { %v628_v7 = vpack.c.bf16 %v603_v63, %v603_v63  ;;  %v445_v8 = vadd.f32 %v444_v33, %v371_v5  ;;  %v449_v9 = vpop.f32.mrf.mxu1 }
  0xd8   :  { %665 = vst.msk [vmem:[%s1318_s3 + $0x40] sm:$0xf] %vm648_vm1, %v639_v2  ;;  %v509_v10 = vadd.f32 %v473_v3, %v63_v0  ;;  %v57_v3 = vld [vmem:[#allocation2 + $0x60] sm:$0xff] }
  0xd9   :  { %654 = vst.msk [vmem:[%s1318_s3 + $0x14] sm:$0xf] %vm648_vm1, %v628_v7  ;;  %v561_v11 = vld [vmem:[#allocation2 + $0x88] sm:$0xff]  ;;  %v498_v62 = vadd.f32 %v445_v8, %v52_v4 }
  0xda   :  { %v590_v13 = vadd.f32 %v1135_v39, %v561_v11  ;;  %v550_v14 = vld [vmem:[#allocation2 + $0x30] sm:$0xff]  ;;  %534 = vst.msk [vmem:[#allocation2 + $0x90] sm:$0xff] %vm19_vm0, %v509_v10 }
  0xdb   :  { %v579_v15 = vadd.f32 %v1135_v39, %v550_v14  ;;  %523 = vst.msk [vmem:[#allocation2 + $0x38] sm:$0xff] %vm19_vm0, %v498_v62  ;;  %v67_v14 = vld [vmem:[#allocation2 + $0xb0] sm:$0xff] }
  0xdc   :  { %v615_v16 = vmax.f32 %v590_v13, 0.0 }
  0xdd   :  { %v604_v17 = vmax.f32 %v579_v15, 0.0  ;;  %v401_v19 = vpop.f32.mrf.mxu2 }
  0xde   :  { %v640_v20 = vpack.c.bf16 %v615_v16, %v615_v16  ;;  %v475_v21 = vadd.f32 %v1158_v12, %v401_v19  ;;  %v374_v23 = vpop.f32.mrf.mxu0  ;;  %v1214_v24 = vpop.f32.mrf.mxu3 }
  0xdf   :  { %v629_v25 = vpack.c.bf16 %v604_v17, %v604_v17  ;;  %v448_v26 = vadd.f32 %v447_v55, %v374_v23  ;;  %v452_v27 = vpop.f32.mrf.mxu1 }
  0xe0   :  { %666 = vst.msk [vmem:[%s1318_s3 + $0x44] sm:$0xf] %vm648_vm1, %v640_v20  ;;  %v510_v28 = vadd.f32 %v475_v21, %v64_v18  ;;  %v56_v18 = vld [vmem:[#allocation2 + $0x58] sm:$0xff] }
  0xe1   :  { %655 = vst.msk [vmem:[%s1318_s3 + $0x18] sm:$0xf] %vm648_vm1, %v629_v25  ;;  %v562_v29 = vld [vmem:[#allocation2 + $0x90] sm:$0xff]  ;;  %v499_v12 = vadd.f32 %v448_v26, %v53_v22  ;;  %v58_v22 = vld [vmem:[#allocation2 + $0x68] sm:$0xff] }
  0xe2   :  { %v591_v31 = vadd.f32 %v1135_v39, %v562_v29  ;;  %v551_v32 = vld [vmem:[#allocation2 + $0x38] sm:$0xff]  ;;  %535 = vst.msk [vmem:[#allocation2 + $0x98] sm:$0xff] %vm19_vm0, %v510_v28 }
  0xe3   :  { %v580_v33 = vadd.f32 %v1135_v39, %v551_v32  ;;  %524 = vst.msk [vmem:[#allocation2 + $0x40] sm:$0xff] %vm19_vm0, %v499_v12 }
  0xe4   :  { %v616_v34 = vmax.f32 %v591_v31, 0.0 }
  0xe5   :  { %v605_v36 = vmax.f32 %v580_v33, 0.0  ;;  %v404_v38 = vpop.f32.mrf.mxu2 }
  0xe6   :  { %v641_v40 = vpack.c.bf16 %v616_v34, %v616_v34  ;;  %v478_v41 = vadd.f32 %v1169_v30, %v404_v38  ;;  %v376_v43 = vpop.f32.mrf.mxu0  ;;  %v1229_v44 = vpop.f32.mrf.mxu3 }
  0xe7   :  { %v630_v45 = vpack.c.bf16 %v605_v36, %v605_v36  ;;  %v450_v47 = vadd.f32 %v449_v9, %v376_v43  ;;  %v454_v48 = vpop.f32.mrf.mxu1  ;;  %v68_v36 = vld [vmem:[#allocation2 + $0xb8] sm:$0xff] }
  0xe8   :  { %667 = vst.msk [vmem:[%s1318_s3 + $0x48] sm:$0xf] %vm648_vm1, %v641_v40  ;;  %v511_v50 = vadd.f32 %v478_v41, %v65_v37 }
  0xe9   :  { %656 = vst.msk [vmem:[%s1318_s3 + $0x1c] sm:$0xf] %vm648_vm1, %v630_v45  ;;  %v563_v51 = vld [vmem:[#allocation2 + $0x98] sm:$0xff]  ;;  %v500_v30 = vadd.f32 %v450_v47, %v54_v42 }
  0xea   :  { %v592_v53 = vadd.f32 %v1135_v39, %v563_v51  ;;  %v552_v54 = vld [vmem:[#allocation2 + $0x40] sm:$0xff]  ;;  %536 = vst.msk [vmem:[#allocation2 + $0xa0] sm:$0xff] %vm19_vm0, %v511_v50 }
  0xeb   :  { %v581_v55 = vadd.f32 %v1135_v39, %v552_v54  ;;  %525 = vst.msk [vmem:[#allocation2 + $0x48] sm:$0xff] %vm19_vm0, %v500_v30 }
  0xec   :  { %v617_v56 = vmax.f32 %v592_v53, 0.0 }
  0xed   :  { %v606_v57 = vmax.f32 %v581_v55, 0.0  ;;  %v406_v58 = vpop.f32.mrf.mxu2  ;;  %v69_v55 = vld [vmem:[#allocation2 + $0xc0] sm:$0xff] }
  0xee   :  { %v642_v59 = vpack.c.bf16 %v617_v56, %v617_v56  ;;  %v480_v60 = vadd.f32 %v1184_v52, %v406_v58  ;;  %v379_v63 = vpop.f32.mrf.mxu0  ;;  %v489_v0 = vpop.f32.mrf.mxu3 }
  0xef   :  { %v631_v1 = vpack.c.bf16 %v606_v57, %v606_v57  ;;  %v453_v2 = vadd.f32 %v452_v27, %v379_v63  ;;  %v457_v4 = vpop.f32.mrf.mxu1 }
  0xf0   :  { %668 = vst.msk [vmem:[%s1318_s3 + $0x4c] sm:$0xf] %vm648_vm1, %v642_v59  ;;  %v512_v5 = vadd.f32 %v480_v60, %v66_v49  ;;  %v458_v7 = vadd.f32 %v457_v4, %v1128_v35 }
  0xf1   :  { %657 = vst.msk [vmem:[%s1318_s3 + $0x20] sm:$0xf] %vm648_vm1, %v631_v1  ;;  %v564_v52 = vld [vmem:[#allocation2 + $0xa0] sm:$0xff]  ;;  %v501_v8 = vadd.f32 %v453_v2, %v55_v61 }
  0xf2   :  { %v593_v9 = vadd.f32 %v1135_v39, %v564_v52  ;;  %v553_v10 = vld [vmem:[#allocation2 + $0x48] sm:$0xff]  ;;  %537 = vst.msk [vmem:[#allocation2 + $0xa8] sm:$0xff] %vm19_vm0, %v512_v5  ;;  %v503_v11 = vadd.f32 %v458_v7, %v57_v3 }
  0xf3   :  { %v582_v62 = vadd.f32 %v1135_v39, %v553_v10  ;;  %526 = vst.msk [vmem:[#allocation2 + $0x50] sm:$0xff] %vm19_vm0, %v501_v8 }
  0xf4   :  { %v618_v13 = vmax.f32 %v593_v9, 0.0  ;;  %528 = vst.msk [vmem:[#allocation2 + $0x60] sm:$0xff] %vm19_vm0, %v503_v11 }
  0xf5   :  { %v607_v35 = vmax.f32 %v582_v62, 0.0  ;;  %v409_v15 = vpop.f32.mrf.mxu2 }
  0xf6   :  { %v643_v16 = vpack.c.bf16 %v618_v13, %v618_v13  ;;  %v483_v17 = vadd.f32 %v1199_v6, %v409_v15  ;;  %v381_v19 = vpop.f32.mrf.mxu0 }
  0xf7   :  { %v632_v20 = vpack.c.bf16 %v607_v35, %v607_v35  ;;  %v455_v21 = vadd.f32 %v454_v48, %v381_v19  ;;  %v459_v23 = vpop.f32.mrf.mxu1 }
  0xf8   :  { %669 = vst.msk [vmem:[%s1318_s3 + $0x50] sm:$0xf] %vm648_vm1, %v643_v16  ;;  %v513_v25 = vadd.f32 %v483_v17, %v67_v14  ;;  %v460_v26 = vadd.f32 %v459_v23, %v1139_v46 }
  0xf9   :  { %658 = vst.msk [vmem:[%s1318_s3 + $0x24] sm:$0xf] %vm648_vm1, %v632_v20  ;;  %v565_v6 = vld [vmem:[#allocation2 + $0xa8] sm:$0xff]  ;;  %v502_v27 = vadd.f32 %v455_v21, %v56_v18 }
  0xfa   :  { %v594_v28 = vadd.f32 %v1135_v39, %v565_v6  ;;  %v554_v29 = vld [vmem:[#allocation2 + $0x50] sm:$0xff]  ;;  %538 = vst.msk [vmem:[#allocation2 + $0xb0] sm:$0xff] %vm19_vm0, %v513_v25  ;;  %v504_v12 = vadd.f32 %v460_v26, %v58_v22 }
  0xfb   :  { %v583_v31 = vadd.f32 %v1135_v39, %v554_v29  ;;  %v556_v32 = vld [vmem:[#allocation2 + $0x60] sm:$0xff]  ;;  %527 = vst.msk [vmem:[#allocation2 + $0x58] sm:$0xff] %vm19_vm0, %v502_v27 }
  0xfc   :  { %v619_v33 = vmax.f32 %v594_v28, 0.0  ;;  %v585_v46 = vadd.f32 %v1135_v39, %v556_v32  ;;  %529 = vst.msk [vmem:[#allocation2 + $0x68] sm:$0xff] %vm19_vm0, %v504_v12 }
  0xfd   :  { %v608_v34 = vmax.f32 %v583_v31, 0.0  ;;  %v411_v37 = vpop.f32.mrf.mxu2 }
  0xfe   :  { %v644_v38 = vpack.c.bf16 %v619_v33, %v619_v33  ;;  %v610_v40 = vmax.f32 %v585_v46, 0.0  ;;  %v485_v41 = vadd.f32 %v1214_v24, %v411_v37 }
  0xff   :  { %v633_v42 = vpack.c.bf16 %v608_v34, %v608_v34 }
 0x100   :  { %670 = vst.msk [vmem:[%s1318_s3 + $0x54] sm:$0xf] %vm648_vm1, %v644_v38  ;;  %v635_v43 = vpack.c.bf16 %v610_v40, %v610_v40  ;;  %v514_v45 = vadd.f32 %v485_v41, %v68_v36 }
 0x101   :  { %659 = vst.msk [vmem:[%s1318_s3 + $0x28] sm:$0xf] %vm648_vm1, %v633_v42  ;;  %v566_v47 = vld [vmem:[#allocation2 + $0xb0] sm:$0xff] }
 0x102   :  { %661 = vst.msk [vmem:[%s1318_s3 + $0x30] sm:$0xf] %vm648_vm1, %v635_v43  ;;  %v595_v24 = vadd.f32 %v1135_v39, %v566_v47  ;;  %v555_v48 = vld [vmem:[#allocation2 + $0x58] sm:$0xff] }
 0x103   :  { %v584_v50 = vadd.f32 %v1135_v39, %v555_v48  ;;  %v557_v51 = vld [vmem:[#allocation2 + $0x68] sm:$0xff]  ;;  %539 = vst.msk [vmem:[#allocation2 + $0xb8] sm:$0xff] %vm19_vm0, %v514_v45 }
 0x104   :  { %v620_v30 = vmax.f32 %v595_v24, 0.0  ;;  %v586_v53 = vadd.f32 %v1135_v39, %v557_v51 }
 0x105   :  { %v609_v54 = vmax.f32 %v584_v50, 0.0  ;;  %v414_v56 = vpop.f32.mrf.mxu2 }
 0x106   :  { %v645_v57 = vpack.c.bf16 %v620_v30, %v620_v30  ;;  %v611_v49 = vmax.f32 %v586_v53, 0.0  ;;  %v488_v58 = vadd.f32 %v1229_v44, %v414_v56 }
 0x107   :  { %v634_v59 = vpack.c.bf16 %v609_v54, %v609_v54 }
 0x108   :  { %671 = vst.msk [vmem:[%s1318_s3 + $0x58] sm:$0xf] %vm648_vm1, %v645_v57  ;;  %v636_v60 = vpack.c.bf16 %v611_v49, %v611_v49  ;;  %v515_v61 = vadd.f32 %v488_v58, %v69_v55 }
 0x109   :  { %660 = vst.msk [vmem:[%s1318_s3 + $0x2c] sm:$0xf] %vm648_vm1, %v634_v59 }
 0x10a   :  { %662 = vst.msk [vmem:[%s1318_s3 + $0x34] sm:$0xf] %vm648_vm1, %v636_v60  ;;  %v567_v63 = vld [vmem:[#allocation2 + $0xb8] sm:$0xff] }
 0x10b   :  { %v596_v44 = vadd.f32 %v1135_v39, %v567_v63  ;;  %540 = vst.msk [vmem:[#allocation2 + $0xc0] sm:$0xff] %vm19_vm0, %v515_v61 }
 0x10d   :  { %v621_v0 = vmax.f32 %v596_v44, 0.0  ;;  %v416_v1 = vpop.f32.mrf.mxu2 }
 0x10f   :  { %v646_v2 = vpack.c.bf16 %v621_v0, %v621_v0 }
 0x111   :  { %672 = vst.msk [vmem:[%s1318_s3 + $0x5c] sm:$0xf] %vm648_vm1, %v646_v2 }
 0x112   :  { %v568_v3 = vld [vmem:[#allocation2 + $0xc0] sm:$0xff] }
 0x113   :  { %v597_v4 = vadd.f32 %v1135_v39, %v568_v3 }
 0x115   :  { %v622_v5 = vmax.f32 %v597_v4, 0.0 }
 0x117   :  { %v647_v7 = vpack.c.bf16 %v622_v5, %v622_v5 }
 0x119   :  { %673 = vst.msk [vmem:[%s1318_s3 + $0x60] sm:$0xf] %vm648_vm1, %v647_v7 }

// kernel: rnd_forward.5
= control target key start
LH: loop header
LB: loop body
LE: loop exit
PB: predicated region body
PF: predicated region fallthrough
CT: control target
= control target key end

     0   :  { %s1158_s12 = smov 0   ;;  %s1160_s13 = smov 0   ;;  %s1286_s0 = inlined_call_operand.vmem [shape: bf16[32,1024], index: 0, kind: input, shape index: {}]   ;;  %s1287_s1 = inlined_call_operand.vmem [shape: bf16[1024,128], index: 1, kind: input, shape index: {}]   ;;  %s1288_s2 = inlined_call_operand.vmem [shape: f32[1,128], index: 2, kind: input, shape index: {}]   ;;  %s1289_s3 = inlined_call_operand.vmem [shape: bf16[32,128], index: 3, kind: output, shape index: {}]  }
   0x1   :  { %s1162_s14 = smov 0   ;;  %s1164_s15 = smov 0  }
   0x2   :  { %s1166_s16 = smov 0  }
   0x3 LB: > { %s25_s17 = sadd.s32 1, %s1131_s15  ;;  %p48_p1 = scmp.ne.s32.totalorder %s1123_s13, %s1119_s12  ;;  %s1135_s16 = sphi %s1166_s16, %s13_s16   ;;  %s1131_s15 = sphi %s1164_s15, %s1293_s15   ;;  %s1127_s14 = sphi %s1162_s14, %s1292_s14   ;;  %s1123_s13 = sphi %s1160_s13, %s1291_s13   ;;  %s1119_s12 = sphi %s1158_s12, %s1290_s12  }
   0x4   : > { %p26_p0 = scmp.ge.s32.totalorder %s25_s17, 2  ;;  %p49_p2 = scmp.eq.s32.totalorder %s1135_s16, 0 }
   0x5   : > { %s41_s19 = sadd.s32 1, %s1123_s13  ;;  %p829_p5 = scmp.ge.s32.totalorder %s1135_s16, 2 }
   0x6   : > { %s1295_s17 = smov (%p26_p0, %s25_s17), 0  ;;  %p50_p3 = por %p49_p2, %p48_p1 }
   0x7   : > { %s37_s18 = ssub.s32 %s1131_s15, %s1295_s17  ;;  %162 = sbr.rel (%p829_p5) target bundleno = 24 (0x18), region = 20 }
   0x8   : > { %p39_p4 = scmp.eq.s32.totalorder %s37_s18, 0 }
   0xa   : > { %s1193_s20 = scalar_select %p39_p4, %s1123_s13, %s41_s19  }
   0xc   : > { %165 = sbr.rel (!%p50_p3) target bundleno = 24 (0x18), region = 24  ;;  %s167_s21 = sand.u32 (%p50_p3), 1, %s1123_s13  }
   0xd   : > { %s1003_s22 = sshll.u32 (%p50_p3), %s1131_s15, 4  ;;  %s830_s23 = sshll.u32 (%p50_p3), %s167_s21, 6 }
   0xe   : > { %s175_s26 = scalar_lea.vmem (%p50_p3), %s1286_s0, %s1003_s22  ;;  %s169_s27 = scalar_lea.vmem (%p50_p3), [#allocation3], %s830_s23 }
   0xf   : > { %v188_v0 = vld [vmem:[%s175_s26] sm:$0xff] (%p50_p3)  ;;  %v190_v1 = vld [vmem:[%s175_s26 + $0x8] sm:$0xff] (%p50_p3) }
  0x10   : > { %v192_v2 = vld [vmem:[%s175_s26 + $0x20] sm:$0xff] (%p50_p3)  ;;  %189 = vst [vmem:[%s169_s27] sm:$0xff] (%p50_p3), %v188_v0  ;;  %v194_v3 = vld [vmem:[%s175_s26 + $0x28] sm:$0xff] (%p50_p3) }
  0x11   : > { %191 = vst [vmem:[%s169_s27 + $0x8] sm:$0xff] %v190_v1  ;;  %v196_v4 = vld [vmem:[%s175_s26 + $0x40] sm:$0xff]  ;;  %v198_v5 = vld [vmem:[%s175_s26 + $0x48] sm:$0xff] }
  0x12   : > { %193 = vst [vmem:[%s169_s27 + $0x10] sm:$0xff] %v192_v2  ;;  %v200_v6 = vld [vmem:[%s175_s26 + $0x60] sm:$0xff]  ;;  %v202_v7 = vld [vmem:[%s175_s26 + $0x68] sm:$0xff] }
  0x13   : > { %195 = vst [vmem:[%s169_s27 + $0x18] sm:$0xff] %v194_v3 }
  0x14   : > { %197 = vst [vmem:[%s169_s27 + $0x20] sm:$0xff] %v196_v4 }
  0x15   : > { %199 = vst [vmem:[%s169_s27 + $0x28] sm:$0xff] %v198_v5 }
  0x16   : > { %201 = vst [vmem:[%s169_s27 + $0x30] sm:$0xff] %v200_v6 }
  0x17   : > { %203 = vst [vmem:[%s169_s27 + $0x38] sm:$0xff] %v202_v7 }
  0x18 PF: > { %p833_p6 = scmp.ge.s32.totalorder %s1135_s16, 1  ;;  %p220_p7 = scmp.lt.s32.totalorder %s1135_s16, 3 }
  0x1a   : > { %p221_p8 = pnand %p833_p6, %p220_p7 }
  0x1b   : > { %s227_s28 = sand.u32 (!%p221_p8), 1, %s1119_s12   ;;  %s835_s29 = sshll.u32 (!%p221_p8), %s1127_s14, 6 }
  0x1c   : > { %224 = sbr.rel (%p221_p8) target bundleno = 254 (0xfe), region = 51  ;;  %s834_s30 = sshll.u32 (!%p221_p8), %s227_s28, 6 }
  0x1d   : > { %p267_p9 = scmp.lt.s32.totalorder (!%p221_p8), %s835_s29, 127  ;;  %s1210_s8 = scalar_lea.vmem (!%p221_p8), [#allocation3], %s834_s30 }
  0x1e   : > { %p837_p10 = scmp.ne.s32.totalorder (!%p221_p8), %s1127_s14, 0 }
  0x21   : > { %s1297_s29 = smov (!%p267_p9, %s835_s29), 127  ;;  %290 = sbr.rel (%p837_p10) target bundleno = 43 (0x2b), region = 59 }
  0x22   : > { %s836_s4 = sshll.u32 %s1297_s29, 2 }
  0x23   : > { %s1208_s7 = scalar_lea.vmem %s1287_s1, %s836_s4 }
  0x26   : > { %v1137_v8 = vmov 0.0  }
  0x27   : > { %291 = vst [vmem:[#allocation2 + $0x10] sm:$0xff] %v1137_v8 }
  0x28   : > { %292 = vst [vmem:[#allocation2] sm:$0xff] %v1137_v8 }
  0x29   : > { %293 = vst [vmem:[#allocation2 + $0x18] sm:$0xff] %v1137_v8 }
  0x2a   : > { %294 = vst [vmem:[#allocation2 + $0x8] sm:$0xff] %v1137_v8 }
  0x2b PF: > { %v1019_v9 = vld [vmem:[%s1208_s7 + $0x38] sm:$0xff]  ;;  %v1018_v13 = vld [vmem:[%s1208_s7 + $0x30] sm:$0xff]  ;;  %v1017_v17 = vld [vmem:[%s1208_s7 + $0x28] sm:$0xff]  ;;  %p998_p11 = scmp.ne.s32.totalorder %s1127_s14, 1 }
  0x2c   : > { %v1027_v10 = vld [vmem:[%s1208_s7 + $0x78] sm:$0xff]  ;;  %603 = vmatpush.bf16.msra.mxu0 %v1019_v9  ;;  %v1026_v14 = vld [vmem:[%s1208_s7 + $0x70] sm:$0xff]  ;;  %v1025_v18 = vld [vmem:[%s1208_s7 + $0x68] sm:$0xff] }
  0x2d   : > { %v1035_v11 = vld [vmem:[%s1208_s7 + $0xb8] sm:$0xff]  ;;  %622 = vmatpush.bf16.msra.mxu1 %v1027_v10  ;;  %v1034_v15 = vld [vmem:[%s1208_s7 + $0xb0] sm:$0xff]  ;;  %v1033_v19 = vld [vmem:[%s1208_s7 + $0xa8] sm:$0xff] }
  0x2e   : > { %v1043_v12 = vld [vmem:[%s1208_s7 + $0xf8] sm:$0xff]  ;;  %641 = vmatpush.bf16.msra.mxu2 %v1035_v11  ;;  %v1042_v16 = vld [vmem:[%s1208_s7 + $0xf0] sm:$0xff]  ;;  %v1041_v20 = vld [vmem:[%s1208_s7 + $0xe8] sm:$0xff] }
  0x2f   : > { %660 = vmatpush.bf16.msra.mxu3 %v1043_v12  ;;  %v1016_v21 = vld [vmem:[%s1208_s7 + $0x20] sm:$0xff]  ;;  %v1015_v25 = vld [vmem:[%s1208_s7 + $0x18] sm:$0xff]  ;;  %v1014_v29 = vld [vmem:[%s1208_s7 + $0x10] sm:$0xff] }
  0x30   : > { %604 = vmatpush.bf16.msra.mxu0 %v1018_v13  ;;  %v1024_v22 = vld [vmem:[%s1208_s7 + $0x60] sm:$0xff]  ;;  %v1023_v26 = vld [vmem:[%s1208_s7 + $0x58] sm:$0xff]  ;;  %v1022_v30 = vld [vmem:[%s1208_s7 + $0x50] sm:$0xff] }
  0x31   : > { %623 = vmatpush.bf16.msra.mxu1 %v1026_v14  ;;  %v1032_v23 = vld [vmem:[%s1208_s7 + $0xa0] sm:$0xff]  ;;  %v1031_v27 = vld [vmem:[%s1208_s7 + $0x98] sm:$0xff]  ;;  %v1030_v31 = vld [vmem:[%s1208_s7 + $0x90] sm:$0xff] }
  0x32   : > { %642 = vmatpush.bf16.msra.mxu2 %v1034_v15  ;;  %v1040_v24 = vld [vmem:[%s1208_s7 + $0xe0] sm:$0xff]  ;;  %v1039_v28 = vld [vmem:[%s1208_s7 + $0xd8] sm:$0xff]  ;;  %v1038_v32 = vld [vmem:[%s1208_s7 + $0xd0] sm:$0xff] }
  0x33   : > { %661 = vmatpush.bf16.msra.mxu3 %v1042_v16  ;;  %v1013_v33 = vld [vmem:[%s1208_s7 + $0x8] sm:$0xff]  ;;  %v1012_v37 = vld [vmem:[%s1208_s7] sm:$0xff]  ;;  %v1006_v42 = vld [vmem:[%s1210_s8 + $0xc] sm:$0xf0] }
  0x34   : > { %605 = vmatpush.bf16.msra.mxu0 %v1017_v17  ;;  %v1021_v34 = vld [vmem:[%s1208_s7 + $0x48] sm:$0xff]  ;;  %v1020_v38 = vld [vmem:[%s1208_s7 + $0x40] sm:$0xff]  ;;  %v842_v44 = vld [vmem:[%s1210_s8 + $0x10] sm:$0xf0] }
  0x35   : > { %624 = vmatpush.bf16.msra.mxu1 %v1025_v18  ;;  %v1029_v35 = vld [vmem:[%s1208_s7 + $0x88] sm:$0xff]  ;;  %v1028_v39 = vld [vmem:[%s1208_s7 + $0x80] sm:$0xff]  ;;  %v1007_v46 = vld [vmem:[%s1210_s8 + $0x14] sm:$0xf0] }
  0x36   : > { %643 = vmatpush.bf16.msra.mxu2 %v1033_v19  ;;  %v1037_v36 = vld [vmem:[%s1208_s7 + $0xc8] sm:$0xff]  ;;  %v1036_v40 = vld [vmem:[%s1208_s7 + $0xc0] sm:$0xff]  ;;  %v850_v48 = vld [vmem:[%s1210_s8 + $0x18] sm:$0xf0] }
  0x37   : > { %662 = vmatpush.bf16.msra.mxu3 %v1041_v20  ;;  %v840_v41 = vld [vmem:[%s1210_s8] sm:$0xf]  ;;  %v1004_v43 = vld [vmem:[%s1210_s8 + $0x4] sm:$0xf]  ;;  %v848_v45 = vld [vmem:[%s1210_s8 + $0x8] sm:$0xf] }
  0x38   : > { %606 = vmatpush.bf16.msra.mxu0 %v1016_v21  ;;  %v1005_v47 = vld [vmem:[%s1210_s8 + $0xc] sm:$0xf]  ;;  %v841_v49 = vor.u32 %v1006_v42, %v840_v41  ;;  %v845_v50 = vor.u32 %v1004_v43, %v842_v44  ;;  %v849_v51 = vor.u32 %v1007_v46, %v848_v45  ;;  %v856_v53 = vld [vmem:[%s1210_s8 + $0x20] sm:$0xf]  ;;  %v1010_v54 = vld [vmem:[%s1210_s8 + $0x2c] sm:$0xf0] }
  0x39   : > { %625 = vmatpush.bf16.msra.mxu1 %v1024_v22  ;;  %v853_v52 = vor.u32 %v1005_v47, %v850_v48  ;;  %v1008_v55 = vld [vmem:[%s1210_s8 + $0x24] sm:$0xf]  ;;  %v858_v56 = vld [vmem:[%s1210_s8 + $0x30] sm:$0xf0]  ;;  %v864_v57 = vld [vmem:[%s1210_s8 + $0x28] sm:$0xf]  ;;  %v857_v61 = vor.u32 %v1010_v54, %v856_v53 }
  0x3a   : > { %644 = vmatpush.bf16.msra.mxu2 %v1032_v23  ;;  %v1011_v58 = vld [vmem:[%s1210_s8 + $0x34] sm:$0xf0]  ;;  %v1009_v59 = vld [vmem:[%s1210_s8 + $0x2c] sm:$0xf]  ;;  %v866_v60 = vld [vmem:[%s1210_s8 + $0x38] sm:$0xf0]  ;;  %v861_v62 = vor.u32 %v1008_v55, %v858_v56 }
  0x3b   : > { %663 = vmatpush.bf16.msra.mxu3 %v1040_v24  ;;  %v865_v63 = vor.u32 %v1011_v58, %v864_v57  ;;  %v869_v0 = vor.u32 %v1009_v59, %v866_v60  ;;  %v295_v9 = vld [vmem:[#allocation2 + $0x10] sm:$0xff]  ;;  %v296_v16 = vld [vmem:[#allocation2] sm:$0xff] }
  0x3c   : > { %607 = vmatpush.bf16.msra.mxu0 %v1015_v25  ;;  %v297_v25 = vld [vmem:[#allocation2 + $0x18] sm:$0xff] }
  0x3d   : > { %626 = vmatpush.bf16.msra.mxu1 %v1023_v26 }
  0x3e   : > { %645 = vmatpush.bf16.msra.mxu2 %v1031_v27 }
  0x3f   : > { %664 = vmatpush.bf16.msra.mxu3 %v1039_v28 }
  0x40   : > { %608 = vmatpush.bf16.msra.mxu0 %v1014_v29 }
  0x41   : > { %627 = vmatpush.bf16.msra.mxu1 %v1022_v30 }
  0x42   : > { %646 = vmatpush.bf16.msra.mxu2 %v1030_v31 }
  0x43   : > { %665 = vmatpush.bf16.msra.mxu3 %v1038_v32 }
  0x44   : > { %609 = vmatpush.bf16.msra.mxu0 %v1013_v33  ;;  %v298_v33 = vld [vmem:[#allocation2 + $0x8] sm:$0xff] }
  0x45   : > { %628 = vmatpush.bf16.msra.mxu1 %v1021_v34 }
  0x46   : > { %647 = vmatpush.bf16.msra.mxu2 %v1029_v35 }
  0x47   : > { %666 = vmatpush.bf16.msra.mxu3 %v1037_v36 }
  0x48   : > { %610 = vmatpush.bf16.msra.mxu0 %v1012_v37 }
  0x49   : > { %629 = vmatpush.bf16.msra.mxu1 %v1020_v38 }
  0x4a   : > { %648 = vmatpush.bf16.msra.mxu2 %v1028_v39 }
  0x4b   : > { %667 = vmatpush.bf16.msra.mxu3 %v1036_v40  ;;  %611 = vmatmul.bf16.vlgmr.msra.gmra.mxu0 %v841_v49 }
  0x4c   : > { %630 = vmatmul.bf16.vlgmr.msra.gmra.mxu1 %v845_v50 }
  0x4d   : > { %649 = vmatmul.bf16.vlgmr.msra.gmra.mxu2 %v849_v51 }
  0x4e   : > { %668 = vmatmul.bf16.vlgmr.msra.gmra.mxu3 %v853_v52 }
  0x5b   : > { %616 = vmatmul.bf16.gmra.mxu0 %v857_v61 }
  0x5c   : > { %635 = vmatmul.bf16.gmra.mxu1 %v861_v62 }
  0x5d   : > { %654 = vmatmul.bf16.gmra.mxu2 %v865_v63 }
  0x5e   : > { %673 = vmatmul.bf16.gmra.mxu3 %v869_v0 }
  0xc8   : > { %v612_v1 = vpop.f32.mrf.mxu0 }
  0xc9   : > { %v631_v2 = vpop.f32.mrf.mxu1 }
  0xca   : > { %v632_v3 = vadd.f32 %v631_v2, %v612_v1 }
  0xd0   : > { %v650_v4 = vpop.f32.mrf.mxu2  ;;  %v614_v7 = vpop.f32.mrf.mxu0 }
  0xd1   : > { %v669_v5 = vpop.f32.mrf.mxu3  ;;  %v651_v6 = vadd.f32 %v650_v4, %v632_v3  ;;  %v633_v8 = vpop.f32.mrf.mxu1 }
  0xd2   : > { %v634_v12 = vadd.f32 %v633_v8, %v614_v7 }
  0xd3   : > { %v670_v10 = vadd.f32 %v669_v5, %v651_v6 }
  0xd5   : > { %v679_v11 = vadd.f32 %v670_v10, %v295_v9 }
  0xd7   : > { %683 = vst [vmem:[#allocation2 + $0x10] sm:$0xff] %v679_v11 }
  0xd8   : > { %v652_v13 = vpop.f32.mrf.mxu2  ;;  %v617_v17 = vpop.f32.mrf.mxu0 }
  0xd9   : > { %v671_v14 = vpop.f32.mrf.mxu3  ;;  %v653_v15 = vadd.f32 %v652_v13, %v634_v12  ;;  %v636_v18 = vpop.f32.mrf.mxu1 }
  0xda   : > { %v637_v21 = vadd.f32 %v636_v18, %v617_v17 }
  0xdb   : > { %v672_v19 = vadd.f32 %v671_v14, %v653_v15 }
  0xdd   : > { %v680_v20 = vadd.f32 %v672_v19, %v296_v16 }
  0xdf   : > { %684 = vst [vmem:[#allocation2] sm:$0xff] %v680_v20 }
  0xe0   : > { %v655_v22 = vpop.f32.mrf.mxu2  ;;  %v619_v27 = vpop.f32.mrf.mxu0 }
  0xe1   : > { %v674_v23 = vpop.f32.mrf.mxu3  ;;  %v656_v24 = vadd.f32 %v655_v22, %v637_v21  ;;  %v638_v28 = vpop.f32.mrf.mxu1 }
  0xe2   : > { %v639_v30 = vadd.f32 %v638_v28, %v619_v27 }
  0xe3   : > { %v675_v26 = vadd.f32 %v674_v23, %v656_v24 }
  0xe5   : > { %v681_v29 = vadd.f32 %v675_v26, %v297_v25 }
  0xe7   : > { %685 = vst [vmem:[#allocation2 + $0x18] sm:$0xff] %v681_v29 }
  0xe8   : > { %v657_v31 = vpop.f32.mrf.mxu2 }
  0xe9   : > { %v658_v32 = vadd.f32 %v657_v31, %v639_v30  ;;  %v676_v34 = vpop.f32.mrf.mxu3 }
  0xeb   : > { %v677_v35 = vadd.f32 %v676_v34, %v658_v32  ;;  %690 = sbr.rel (%p998_p11) target bundleno = 254 (0xfe), region = 63 }
  0xed   : > { %v682_v36 = vadd.f32 %v677_v35, %v298_v33 }
  0xef   : > { %686 = vst [vmem:[#allocation2 + $0x8] sm:$0xff] %v682_v36 }
  0xf0   : > { %v691_v37 = vld [vmem:[#allocation2 + $0x10] sm:$0xff]  ;;  %v692_v38 = vld [vmem:[#allocation2] sm:$0xff]  ;;  %v693_v40 = vld [vmem:[#allocation2 + $0x18] sm:$0xff] }
  0xf1   : > { %v1096_v39 = vld [vmem:[%s1288_s2] ss:$0 sm:$0xff] }
  0xf2   : > { %v699_v42 = vadd.f32 %v1096_v39, %v691_v37  ;;  %v700_v43 = vadd.f32 %v1096_v39, %v692_v38  ;;  %v701_v44 = vadd.f32 %v1096_v39, %v693_v40 }
  0xf4   : > { %v703_v46 = vmax.f32 %v699_v42, 0.0  ;;  %v704_v47 = vmax.f32 %v700_v43, 0.0  ;;  %v705_v48 = vmax.f32 %v701_v44, 0.0 }
  0xf6   : > { %v694_v41 = vld [vmem:[#allocation2 + $0x8] sm:$0xff]  ;;  %v1047_v50 = vpack.c.bf16 %v704_v47, %v703_v46 }
  0xf7   : > { %v702_v45 = vadd.f32 %v1096_v39, %v694_v41 }
  0xf8   : > { %1048 = vst [vmem:[%s1289_s3] sm:$0xff] %v1047_v50  }
  0xf9   : > { %v706_v49 = vmax.f32 %v702_v45, 0.0 }
  0xfb   : > { %v1052_v51 = vpack.c.bf16 %v706_v49, %v705_v48 }
  0xfd   : > { %1054 = vst [vmem:[%s1289_s3 + $0x8] sm:$0xff] %v1052_v51  }
  0xfe PF: > { %s13_s16 = sadd.s32 1, %s1135_s16   ;;  %s1290_s12 = smov %s1123_s13 }
  0xff   : > { %p10_p12 = scmp.ge.s32.totalorder %s13_s16, 4   ;;  %s1291_s13 = smov %s1193_s20 }
 0x100   : > { %s1292_s14 = smov %s1131_s15  ;;  %s1293_s15 = smov %s1295_s17 }
 0x101   :  { %12 = sbr.rel (!%p10_p12) target bundleno = 3 (0x3), region = 104 }

// kernel: rnd_forward.6
= control target key start
LH: loop header
LB: loop body
LE: loop exit
PB: predicated region body
PF: predicated region fallthrough
CT: control target
= control target key end

     0   :  { %s832_s12 = smov 0   ;;  %s834_s13 = smov 0   ;;  %s907_s0 = inlined_call_operand.vmem [shape: bf16[8,1152], index: 0, kind: input, shape index: {}]   ;;  %s908_s1 = inlined_call_operand.vmem [shape: bf16[1152,128], index: 1, kind: input, shape index: {}]   ;;  %s909_s2 = inlined_call_operand.vmem [shape: f32[1,128], index: 2, kind: input, shape index: {}]   ;;  %s910_s3 = inlined_call_operand.vmem [shape: bf16[8,128], index: 3, kind: output, shape index: {}]  }
   0x1   :  { %s836_s14 = smov 0  }
   0x2 LB: > { %s25_s15 = sadd.s32 1, %s805_s13  ;;  %p633_p0 = scmp.ge.s32.totalorder %s809_s14, 1  ;;  %s809_s14 = sphi %s836_s14, %s13_s14   ;;  %s805_s13 = sphi %s834_s13, %s912_s13   ;;  %s801_s12 = sphi %s832_s12, %s911_s12  }
   0x3   : > { %p26_p1 = scmp.ge.s32.totalorder %s25_s15, 3  ;;  %p189_p2 = scmp.lt.s32.totalorder %s809_s14, 4 }
   0x5   : > { %s914_s15 = smov (%p26_p1, %s25_s15), 0  ;;  %p190_p3 = pnand %p633_p0, %p189_p2 }
   0x6   : > { %s230_s16 = smul.u32 (!%p190_p3), 3, %s801_s12  ;;  %p636_p6 = scmp.ne.s32.totalorder (!%p190_p3), %s801_s12, 0 }
   0x7   : > { %193 = sbr.rel (%p190_p3) target bundleno = 207 (0xcf), region = 32 }
   0x8   : > { %s240_s17 = smul.u32 (!%p190_p3), 48, %s801_s12  ;;  %p233_p4 = scmp.lt.s32.totalorder (!%p190_p3), %s230_s16, 8 }
   0xa   : > { %p241_p5 = scmp.lt.s32.totalorder (!%p190_p3), %s240_s17, 143 }
   0xc   : > { %s916_s16 = smov (!%p233_p4, %s230_s16), 8  ;;  %s918_s17 = smov (!%p241_p5, %s240_s17), 143 }
   0xd   : > { %s634_s18 = sshll.u32 %s916_s16, 2  ;;  %s635_s22 = sshll.u32 %s918_s17, 2 }
   0xe   : > { %s857_s21 = scalar_lea.vmem %s907_s0, %s634_s18  ;;  %s862_s25 = scalar_lea.vmem %s908_s1, %s635_s22 }
   0xf   : > { %262 = sbr.rel (%p636_p6) target bundleno = 22 (0x16), region = 36 }
  0x14   : > { %v811_v0 = vmov 0.0  }
  0x15   : > { %263 = vst [vmem:[#allocation2] sm:$0xff] %v811_v0 }
  0x16 PF: > { %v744_v1 = vld [vmem:[%s862_s25 + $0x38] sm:$0xff]  ;;  %v743_v4 = vld [vmem:[%s862_s25 + $0x30] sm:$0xff]  ;;  %v742_v7 = vld [vmem:[%s862_s25 + $0x28] sm:$0xff]  ;;  %p733_p7 = scmp.ne.s32.totalorder %s801_s12, 2 }
  0x17   : > { %v752_v2 = vld [vmem:[%s862_s25 + $0x78] sm:$0xff]  ;;  %470 = vmatpush.bf16.msra.mxu0 %v744_v1  ;;  %v751_v5 = vld [vmem:[%s862_s25 + $0x70] sm:$0xff]  ;;  %v750_v8 = vld [vmem:[%s862_s25 + $0x68] sm:$0xff] }
  0x18   : > { %v760_v3 = vld [vmem:[%s862_s25 + $0xb8] sm:$0xff]  ;;  %483 = vmatpush.bf16.msra.mxu1 %v752_v2  ;;  %v759_v6 = vld [vmem:[%s862_s25 + $0xb0] sm:$0xff]  ;;  %v758_v9 = vld [vmem:[%s862_s25 + $0xa8] sm:$0xff] }
  0x19   : > { %496 = vmatpush.bf16.msra.mxu2 %v760_v3  ;;  %v741_v10 = vld [vmem:[%s862_s25 + $0x20] sm:$0xff]  ;;  %v740_v13 = vld [vmem:[%s862_s25 + $0x18] sm:$0xff]  ;;  %v739_v16 = vld [vmem:[%s862_s25 + $0x10] sm:$0xff] }
  0x1a   : > { %v749_v11 = vld [vmem:[%s862_s25 + $0x60] sm:$0xff]  ;;  %v748_v14 = vld [vmem:[%s862_s25 + $0x58] sm:$0xff]  ;;  %v747_v17 = vld [vmem:[%s862_s25 + $0x50] sm:$0xff] }
  0x1b   : > { %471 = vmatpush.bf16.msra.mxu0 %v743_v4  ;;  %v757_v12 = vld [vmem:[%s862_s25 + $0xa0] sm:$0xff]  ;;  %v756_v15 = vld [vmem:[%s862_s25 + $0x98] sm:$0xff]  ;;  %v755_v18 = vld [vmem:[%s862_s25 + $0x90] sm:$0xff] }
  0x1c   : > { %484 = vmatpush.bf16.msra.mxu1 %v751_v5  ;;  %v738_v19 = vld [vmem:[%s862_s25 + $0x8] sm:$0xff]  ;;  %v265_v21 = vld [vmem:[%s857_s21] sm:$0xff] }
  0x1d   : > { %497 = vmatpush.bf16.msra.mxu2 %v759_v6  ;;  %v746_v20 = vld [vmem:[%s862_s25 + $0x48] sm:$0xff]  ;;  %v317_v24 = vunpack.c.l.b16 %v265_v21  ;;  %v318_v25 = vunpack.c.h.b16 %v265_v21  ;;  %v737_v26 = vld [vmem:[%s862_s25] sm:$0xff] }
  0x1e   : > { %v754_v22 = vld [vmem:[%s862_s25 + $0x88] sm:$0xff]  ;;  %v745_v27 = vld [vmem:[%s862_s25 + $0x40] sm:$0xff] }
  0x1f   : > { %472 = vmatpush.bf16.msra.mxu0 %v742_v7  ;;  %v266_v23 = vld [vmem:[%s857_s21 + $0x8] sm:$0xf]  ;;  %v753_v29 = vld [vmem:[%s862_s25 + $0x80] sm:$0xff]  ;;  %v320_v30 = vpack.c.b16 %v317_v24, %v317_v24  ;;  %v321_v31 = vpack.c.b16 %v318_v25, %v318_v25 }
  0x20   : > { %485 = vmatpush.bf16.msra.mxu1 %v750_v8  ;;  %v319_v28 = vunpack.c.l.b16 %v266_v23  ;;  %v264_v36 = vld [vmem:[#allocation2] sm:$0xff] }
  0x21   : > { %498 = vmatpush.bf16.msra.mxu2 %v758_v9 }
  0x22   : > { %v322_v32 = vpack.c.b16 %v319_v28, %v319_v28 }
  0x23   : > { %473 = vmatpush.bf16.msra.mxu0 %v741_v10 }
  0x24   : > { %486 = vmatpush.bf16.msra.mxu1 %v749_v11 }
  0x25   : > { %499 = vmatpush.bf16.msra.mxu2 %v757_v12 }
  0x27   : > { %474 = vmatpush.bf16.msra.mxu0 %v740_v13 }
  0x28   : > { %487 = vmatpush.bf16.msra.mxu1 %v748_v14 }
  0x29   : > { %500 = vmatpush.bf16.msra.mxu2 %v756_v15 }
  0x2b   : > { %475 = vmatpush.bf16.msra.mxu0 %v739_v16 }
  0x2c   : > { %488 = vmatpush.bf16.msra.mxu1 %v747_v17 }
  0x2d   : > { %501 = vmatpush.bf16.msra.mxu2 %v755_v18 }
  0x2f   : > { %476 = vmatpush.bf16.msra.mxu0 %v738_v19 }
  0x30   : > { %489 = vmatpush.bf16.msra.mxu1 %v746_v20 }
  0x31   : > { %502 = vmatpush.bf16.msra.mxu2 %v754_v22 }
  0x33   : > { %477 = vmatpush.bf16.msra.mxu0 %v737_v26 }
  0x34   : > { %490 = vmatpush.bf16.msra.mxu1 %v745_v27 }
  0x35   : > { %503 = vmatpush.bf16.msra.mxu2 %v753_v29 }
  0x36   : > { %478 = vmatmul.bf16.vlgmr.msra.gmra.mxu0 %v320_v30 }
  0x37   : > { %491 = vmatmul.bf16.vlgmr.msra.gmra.mxu1 %v321_v31 }
  0x38   : > { %504 = vmatmul.bf16.vlgmr.msra.gmra.mxu2 %v322_v32 }
  0xb3   : > { %v479_v33 = vpop.f32.mrf.mxu0 }
  0xb4   : > { %v492_v34 = vpop.f32.mrf.mxu1 }
  0xb5   : > { %v493_v35 = vadd.f32 %v492_v34, %v479_v33 }
  0xbb   : > { %v505_v37 = vpop.f32.mrf.mxu2  ;;  %v481_v39 = vpop.f32.mrf.mxu0 }
  0xbc   : > { %v506_v38 = vadd.f32 %v505_v37, %v493_v35  ;;  %v494_v40 = vpop.f32.mrf.mxu1 }
  0xbe   : > { %v509_v41 = vadd.f32 %v506_v38, %v264_v36 }
  0xbf   : > { %514 = sbr.rel (%p733_p7) target bundleno = 207 (0xcf), region = 40 }
  0xc0   : > { %510 = vst [vmem:[#allocation2] sm:$0xff] %v509_v41 }
  0xc3   : > { %v507_v42 = vpop.f32.mrf.mxu2 }
  0xc4   : > { %v786_v44 = vld [vmem:[%s909_s2] ss:$0 sm:$0xff] }
  0xc7   : > { %v515_v43 = vld [vmem:[#allocation2] sm:$0xff] }
  0xc8   : > { %v520_v45 = vadd.f32 %v786_v44, %v515_v43 }
  0xca   : > { %v521_v46 = vmax.f32 %v520_v45, 0.0 }
  0xcc   : > { %v522_v47 = vpack.c.bf16 %v521_v46, %v521_v46 }
  0xce   : > { %523 = vst [vmem:[%s910_s3] sm:$0xf] %v522_v47 }
  0xcf PF: > { %s13_s14 = sadd.s32 1, %s809_s14   ;;  %s911_s12 = smov %s805_s13 }
  0xd0   : > { %p10_p8 = scmp.ge.s32.totalorder %s13_s14, 5   ;;  %s912_s13 = smov %s914_s15 }
  0xd2   :  { %12 = sbr.rel (!%p10_p8) target bundleno = 2 (0x2), region = 76 }

// kernel: rnd_forward.7
= control target key start
LH: loop header
LB: loop body
LE: loop exit
PB: predicated region body
PF: predicated region fallthrough
CT: control target
= control target key end

     0   :  { %17 = vsyncpa [#allocation3], 0  ;;  %s7586_s0 = inlined_call_operand.vmem [shape: bf16[2,256], index: 0, kind: input, shape index: {}]   ;;  %s7587_s1 = inlined_call_operand.vmem [shape: bf16[2,256], index: 1, kind: input, shape index: {}]   ;;  %s7588_s2 = inlined_call_operand.vmem [shape: bf16[256,512], index: 2, kind: input, shape index: {}]   ;;  %s7589_s3 = inlined_call_operand.vmem [shape: f32[1,512], index: 3, kind: input, shape index: {}]   ;;  %s7590_s4 = inlined_call_operand.vmem [shape: bf16[512,512], index: 4, kind: input, shape index: {}]   ;;  %s7591_s5 = inlined_call_operand.vmem [shape: f32[1,512], index: 5, kind: input, shape index: {}]   ;;  %s7592_s6 = inlined_call_operand.vmem [shape: bf16[256,512], index: 6, kind: input, shape index: {}]   ;;  %s7593_s7 = inlined_call_operand.vmem [shape: f32[1,512], index: 7, kind: input, shape index: {}]   ;;  %s7594_s8 = inlined_call_operand.vmem [shape: bf16[512,512], index: 8, kind: input, shape index: {}]   ;;  %s7595_s9 = inlined_call_operand.vmem [shape: f32[1,512], index: 9, kind: input, shape index: {}]   ;;  %s7596_s10 = inlined_call_operand.hbm [shape: f32[2,512], index: 10, kind: output, shape index: {0}]   ;;  %s7597_s11 = inlined_call_operand.hbm [shape: f32[2,512], index: 11, kind: output, shape index: {1}]  }
   0x1   :  { %v3210_v0 = vld [vmem:[%s7588_s2 + $0xe0] sm:$0xf]  ;;  %v4662_v1 = vld [vmem:[%s7588_s2 + $0xec] sm:$0xf0]  ;;  %v4660_v5 = vld [vmem:[%s7588_s2 + $0xe4] sm:$0xf] }
   0x2   :  { %v3338_v2 = vld [vmem:[%s7588_s2 + $0x1e0] sm:$0xf]  ;;  %v3211_v3 = vor.u32 %v4662_v1, %v3210_v0  ;;  %v4694_v4 = vld [vmem:[%s7588_s2 + $0x1ec] sm:$0xf0]  ;;  %v3212_v6 = vld [vmem:[%s7588_s2 + $0xf0] sm:$0xf0] }
   0x3   :  { %v3339_v7 = vor.u32 %v4694_v4, %v3338_v2  ;;  %v3215_v8 = vor.u32 %v4660_v5, %v3212_v6  ;;  %v4692_v9 = vld [vmem:[%s7588_s2 + $0x1e4] sm:$0xf]  ;;  %v3340_v10 = vld [vmem:[%s7588_s2 + $0x1f0] sm:$0xf0]  ;;  %v3194_v11 = vld [vmem:[%s7588_s2 + $0xc0] sm:$0xf] }
   0x4   :  { %440 = vmatpush.bf16.msra.mxu0 %v3211_v3  ;;  %v3343_v12 = vor.u32 %v4692_v9, %v3340_v10  ;;  %v4658_v13 = vld [vmem:[%s7588_s2 + $0xcc] sm:$0xf0]  ;;  %v3322_v14 = vld [vmem:[%s7588_s2 + $0x1c0] sm:$0xf]  ;;  %v4656_v18 = vld [vmem:[%s7588_s2 + $0xc4] sm:$0xf] }
   0x5   :  { %v4690_v15 = vld [vmem:[%s7588_s2 + $0x1cc] sm:$0xf0]  ;;  %453 = vmatpush.bf16.msra.mxu1 %v3339_v7  ;;  %466 = vmatpush.bf16.msra.mxu2 %v3215_v8  ;;  %v3195_v16 = vor.u32 %v4658_v13, %v3194_v11  ;;  %v3196_v19 = vld [vmem:[%s7588_s2 + $0xd0] sm:$0xf0]  ;;  %v4688_v20 = vld [vmem:[%s7588_s2 + $0x1c4] sm:$0xf] }
   0x6   :  { %v3323_v17 = vor.u32 %v4690_v15, %v3322_v14  ;;  %479 = vmatpush.bf16.msra.mxu3 %v3343_v12  ;;  %v3199_v21 = vor.u32 %v4656_v18, %v3196_v19  ;;  %v3324_v22 = vld [vmem:[%s7588_s2 + $0x1d0] sm:$0xf0]  ;;  %v3178_v23 = vld [vmem:[%s7588_s2 + $0xa0] sm:$0xf]  ;;  %v4654_v24 = vld [vmem:[%s7588_s2 + $0xac] sm:$0xf0] }
   0x7   :  { %v3327_v25 = vor.u32 %v4688_v20, %v3324_v22  ;;  %v3306_v26 = vld [vmem:[%s7588_s2 + $0x1a0] sm:$0xf]  ;;  %v4686_v27 = vld [vmem:[%s7588_s2 + $0x1ac] sm:$0xf0]  ;;  %v4652_v28 = vld [vmem:[%s7588_s2 + $0xa4] sm:$0xf]  ;;  %v3179_v29 = vor.u32 %v4654_v24, %v3178_v23 }
   0x8   :  { %441 = vmatpush.bf16.msra.mxu0 %v3195_v16  ;;  %v3180_v30 = vld [vmem:[%s7588_s2 + $0xb0] sm:$0xf0]  ;;  %v4684_v31 = vld [vmem:[%s7588_s2 + $0x1a4] sm:$0xf]  ;;  %v3307_v33 = vor.u32 %v4686_v27, %v3306_v26  ;;  %v3162_v35 = vld [vmem:[%s7588_s2 + $0x80] sm:$0xf] }
   0x9   :  { %v3308_v32 = vld [vmem:[%s7588_s2 + $0x1b0] sm:$0xf0]  ;;  %454 = vmatpush.bf16.msra.mxu1 %v3323_v17  ;;  %467 = vmatpush.bf16.msra.mxu2 %v3199_v21  ;;  %v3183_v34 = vor.u32 %v4652_v28, %v3180_v30  ;;  %v4650_v36 = vld [vmem:[%s7588_s2 + $0x8c] sm:$0xf0]  ;;  %v3290_v37 = vld [vmem:[%s7588_s2 + $0x180] sm:$0xf] }
   0xa   :  { %480 = vmatpush.bf16.msra.mxu3 %v3327_v25  ;;  %v3311_v38 = vor.u32 %v4684_v31, %v3308_v32  ;;  %v4682_v39 = vld [vmem:[%s7588_s2 + $0x18c] sm:$0xf0]  ;;  %v4648_v40 = vld [vmem:[%s7588_s2 + $0x84] sm:$0xf]  ;;  %v3164_v41 = vld [vmem:[%s7588_s2 + $0x90] sm:$0xf0]  ;;  %v3163_v44 = vor.u32 %v4650_v36, %v3162_v35 }
   0xb   :  { %v4680_v42 = vld [vmem:[%s7588_s2 + $0x184] sm:$0xf]  ;;  %v3292_v43 = vld [vmem:[%s7588_s2 + $0x190] sm:$0xf0]  ;;  %v3291_v45 = vor.u32 %v4682_v39, %v3290_v37  ;;  %v3167_v46 = vor.u32 %v4648_v40, %v3164_v41  ;;  %v3146_v47 = vld [vmem:[%s7588_s2 + $0x60] sm:$0xf] }
   0xc   :  { %442 = vmatpush.bf16.msra.mxu0 %v3179_v29  ;;  %v4646_v48 = vld [vmem:[%s7588_s2 + $0x6c] sm:$0xf0]  ;;  %v3274_v49 = vld [vmem:[%s7588_s2 + $0x160] sm:$0xf]  ;;  %v3295_v50 = vor.u32 %v4680_v42, %v3292_v43  ;;  %v4644_v52 = vld [vmem:[%s7588_s2 + $0x64] sm:$0xf] }
   0xd   :  { %455 = vmatpush.bf16.msra.mxu1 %v3307_v33  ;;  %468 = vmatpush.bf16.msra.mxu2 %v3183_v34  ;;  %v4678_v51 = vld [vmem:[%s7588_s2 + $0x16c] sm:$0xf0]  ;;  %v3148_v53 = vld [vmem:[%s7588_s2 + $0x70] sm:$0xf0]  ;;  %v4676_v54 = vld [vmem:[%s7588_s2 + $0x164] sm:$0xf]  ;;  %v3147_v56 = vor.u32 %v4646_v48, %v3146_v47 }
   0xe   :  { %481 = vmatpush.bf16.msra.mxu3 %v3311_v38  ;;  %v3276_v55 = vld [vmem:[%s7588_s2 + $0x170] sm:$0xf0]  ;;  %v3275_v57 = vor.u32 %v4678_v51, %v3274_v49  ;;  %v3151_v58 = vor.u32 %v4644_v52, %v3148_v53  ;;  %v3130_v59 = vld [vmem:[%s7588_s2 + $0x40] sm:$0xf]  ;;  %v4642_v60 = vld [vmem:[%s7588_s2 + $0x4c] sm:$0xf0] }
   0xf   :  { %v3258_v61 = vld [vmem:[%s7588_s2 + $0x140] sm:$0xf]  ;;  %v3279_v62 = vor.u32 %v4676_v54, %v3276_v55  ;;  %v4674_v63 = vld [vmem:[%s7588_s2 + $0x14c] sm:$0xf0]  ;;  %v4640_v0 = vld [vmem:[%s7588_s2 + $0x44] sm:$0xf]  ;;  %v3131_v4 = vor.u32 %v4642_v60, %v3130_v59 }
  0x10   :  { %443 = vmatpush.bf16.msra.mxu0 %v3163_v44  ;;  %v3132_v1 = vld [vmem:[%s7588_s2 + $0x50] sm:$0xf0]  ;;  %v4672_v2 = vld [vmem:[%s7588_s2 + $0x144] sm:$0xf]  ;;  %v3259_v5 = vor.u32 %v4674_v63, %v3258_v61  ;;  %v3114_v7 = vld [vmem:[%s7588_s2 + $0x20] sm:$0xf] }
  0x11   :  { %456 = vmatpush.bf16.msra.mxu1 %v3291_v45  ;;  %469 = vmatpush.bf16.msra.mxu2 %v3167_v46  ;;  %v3260_v3 = vld [vmem:[%s7588_s2 + $0x150] sm:$0xf0]  ;;  %v3135_v6 = vor.u32 %v4640_v0, %v3132_v1  ;;  %v4638_v8 = vld [vmem:[%s7588_s2 + $0x2c] sm:$0xf0]  ;;  %v3242_v9 = vld [vmem:[%s7588_s2 + $0x120] sm:$0xf] }
  0x12   :  { %482 = vmatpush.bf16.msra.mxu3 %v3295_v50  ;;  %v3263_v10 = vor.u32 %v4672_v2, %v3260_v3  ;;  %v4670_v11 = vld [vmem:[%s7588_s2 + $0x12c] sm:$0xf0]  ;;  %v4636_v12 = vld [vmem:[%s7588_s2 + $0x24] sm:$0xf]  ;;  %v3116_v13 = vld [vmem:[%s7588_s2 + $0x30] sm:$0xf0]  ;;  %v3115_v17 = vor.u32 %v4638_v8, %v3114_v7 }
  0x13   :  { %v4668_v14 = vld [vmem:[%s7588_s2 + $0x124] sm:$0xf]  ;;  %v3244_v15 = vld [vmem:[%s7588_s2 + $0x130] sm:$0xf0]  ;;  %v3098_v16 = vld [vmem:[%s7588_s2] sm:$0xf]  ;;  %v3243_v21 = vor.u32 %v4670_v11, %v3242_v9  ;;  %v3119_v22 = vor.u32 %v4636_v12, %v3116_v13 }
  0x14   :  { %444 = vmatpush.bf16.msra.mxu0 %v3147_v56  ;;  %v4634_v18 = vld [vmem:[%s7588_s2 + $0xc] sm:$0xf0]  ;;  %v3226_v19 = vld [vmem:[%s7588_s2 + $0x100] sm:$0xf]  ;;  %v4632_v23 = vld [vmem:[%s7588_s2 + $0x4] sm:$0xf]  ;;  %v3247_v26 = vor.u32 %v4668_v14, %v3244_v15 }
  0x15   :  { %457 = vmatpush.bf16.msra.mxu1 %v3275_v57  ;;  %470 = vmatpush.bf16.msra.mxu2 %v3151_v58  ;;  %v4666_v20 = vld [vmem:[%s7588_s2 + $0x10c] sm:$0xf0]  ;;  %v3100_v24 = vld [vmem:[%s7588_s2 + $0x10] sm:$0xf0]  ;;  %v39_v25 = vld [vmem:[%s7586_s0] sm:$0x3]  ;;  %v3099_v32 = vor.u32 %v4634_v18, %v3098_v16 }
  0x16   :  { %483 = vmatpush.bf16.msra.mxu3 %v3279_v62  ;;  %v4664_v27 = vld [vmem:[%s7588_s2 + $0x104] sm:$0xf]  ;;  %v3228_v28 = vld [vmem:[%s7588_s2 + $0x110] sm:$0xf0]  ;;  %115 = vst [vmem:[#allocation1] ss:$9 sm:$0xff] %v39_v25  ;;  %v3227_v36 = vor.u32 %v4666_v20, %v3226_v19  ;;  %v3103_v37 = vor.u32 %v4632_v23, %v3100_v24 }
  0x17   :  { %v3218_v29 = vld [vmem:[%s7588_s2 + $0xe8] sm:$0xf]  ;;  %v4663_v30 = vld [vmem:[%s7588_s2 + $0xf4] sm:$0xf0]  ;;  %v4661_v34 = vld [vmem:[%s7588_s2 + $0xec] sm:$0xf]  ;;  %v3231_v40 = vor.u32 %v4664_v27, %v3228_v28 }
  0x18   :  { %445 = vmatpush.bf16.msra.mxu0 %v3131_v4  ;;  %v3346_v31 = vld [vmem:[%s7588_s2 + $0x1e8] sm:$0xf]  ;;  %v4695_v33 = vld [vmem:[%s7588_s2 + $0x1f4] sm:$0xf0]  ;;  %v3220_v35 = vld [vmem:[%s7588_s2 + $0xf8] sm:$0xf0]  ;;  %v3219_v41 = vor.u32 %v4663_v30, %v3218_v29 }
  0x19   :  { %458 = vmatpush.bf16.msra.mxu1 %v3259_v5  ;;  %471 = vmatpush.bf16.msra.mxu2 %v3135_v6  ;;  %v4693_v38 = vld [vmem:[%s7588_s2 + $0x1ec] sm:$0xf]  ;;  %v3348_v39 = vld [vmem:[%s7588_s2 + $0x1f8] sm:$0xf0]  ;;  %v1553_v42 = vld [vmem:[%s7587_s1] sm:$0x3]  ;;  %v3347_v44 = vor.u32 %v4695_v33, %v3346_v31  ;;  %v3223_v45 = vor.u32 %v4661_v34, %v3220_v35 }
  0x1a   :  { %484 = vmatpush.bf16.msra.mxu3 %v3263_v10  ;;  %v3202_v43 = vld [vmem:[%s7588_s2 + $0xc8] sm:$0xf]  ;;  %v4659_v46 = vld [vmem:[%s7588_s2 + $0xd4] sm:$0xf0]  ;;  %v3351_v49 = vor.u32 %v4693_v38, %v3348_v39  ;;  %v4657_v50 = vld [vmem:[%s7588_s2 + $0xcc] sm:$0xf] }
  0x1b   :  { %v3330_v47 = vld [vmem:[%s7588_s2 + $0x1c8] sm:$0xf]  ;;  %v4691_v48 = vld [vmem:[%s7588_s2 + $0x1d4] sm:$0xf0]  ;;  %v3204_v51 = vld [vmem:[%s7588_s2 + $0xd8] sm:$0xf0]  ;;  %v3203_v56 = vor.u32 %v4659_v46, %v3202_v43 }
  0x1c   :  { %446 = vmatpush.bf16.msra.mxu0 %v3115_v17  ;;  %v4689_v52 = vld [vmem:[%s7588_s2 + $0x1cc] sm:$0xf]  ;;  %v3332_v55 = vld [vmem:[%s7588_s2 + $0x1d8] sm:$0xf0]  ;;  %v3331_v57 = vor.u32 %v4691_v48, %v3330_v47  ;;  %v3207_v58 = vor.u32 %v4657_v50, %v3204_v51  ;;  %v3186_v59 = vld [vmem:[%s7588_s2 + $0xa8] sm:$0xf] }
  0x1d   :  { %459 = vmatpush.bf16.msra.mxu1 %v3243_v21  ;;  %472 = vmatpush.bf16.msra.mxu2 %v3119_v22  ;;  %v5375_v53 = vld [vmem:[#allocation1] sm:$0xff]  ;;  %v5377_v54 = vld [vmem:[#allocation1 + $0x9] sm:$0xff]  ;;  %v4655_v60 = vld [vmem:[%s7588_s2 + $0xb4] sm:$0xf0]  ;;  %v3335_v62 = vor.u32 %v4689_v52, %v3332_v55 }
  0x1e   :  { %485 = vmatpush.bf16.msra.mxu3 %v3247_v26  ;;  %1629 = vst [vmem:[#allocation1] ss:$9 sm:$0xff] %v1553_v42  ;;  %v3314_v61 = vld [vmem:[%s7588_s2 + $0x1a8] sm:$0xf]  ;;  %v4687_v63 = vld [vmem:[%s7588_s2 + $0x1b4] sm:$0xf0]  ;;  %v3187_v4 = vor.u32 %v4655_v60, %v3186_v59 }
  0x1f   :  { %v4653_v0 = vld [vmem:[%s7588_s2 + $0xac] sm:$0xf]  ;;  %v3188_v1 = vld [vmem:[%s7588_s2 + $0xb8] sm:$0xf0]  ;;  %v3315_v5 = vor.u32 %v4687_v63, %v3314_v61  ;;  %v3170_v7 = vld [vmem:[%s7588_s2 + $0x88] sm:$0xf] }
  0x20   :  { %447 = vmatpush.bf16.msra.mxu0 %v3099_v32  ;;  %v4685_v2 = vld [vmem:[%s7588_s2 + $0x1ac] sm:$0xf]  ;;  %v3316_v3 = vld [vmem:[%s7588_s2 + $0x1b8] sm:$0xf0]  ;;  %v3191_v6 = vor.u32 %v4653_v0, %v3188_v1  ;;  %v4651_v8 = vld [vmem:[%s7588_s2 + $0x94] sm:$0xf0] }
  0x21   :  { %460 = vmatpush.bf16.msra.mxu1 %v3227_v36  ;;  %473 = vmatpush.bf16.msra.mxu2 %v3103_v37  ;;  %v3298_v9 = vld [vmem:[%s7588_s2 + $0x188] sm:$0xf]  ;;  %v3319_v10 = vor.u32 %v4685_v2, %v3316_v3  ;;  %v4683_v11 = vld [vmem:[%s7588_s2 + $0x194] sm:$0xf0]  ;;  %v4649_v12 = vld [vmem:[%s7588_s2 + $0x8c] sm:$0xf]  ;;  %v3171_v16 = vor.u32 %v4651_v8, %v3170_v7 }
  0x22   :  { %486 = vmatpush.bf16.msra.mxu3 %v3231_v40  ;;  %v3172_v13 = vld [vmem:[%s7588_s2 + $0x98] sm:$0xf0]  ;;  %v4681_v14 = vld [vmem:[%s7588_s2 + $0x18c] sm:$0xf]  ;;  %v3299_v17 = vor.u32 %v4683_v11, %v3298_v9  ;;  %v3154_v19 = vld [vmem:[%s7588_s2 + $0x68] sm:$0xf] }
  0x23   :  { %448 = vmatmul.bf16.vlgmr.msra.gmra.mxu0 %v5375_v53  ;;  %v3300_v15 = vld [vmem:[%s7588_s2 + $0x198] sm:$0xf0]  ;;  %v3175_v18 = vor.u32 %v4649_v12, %v3172_v13  ;;  %v4647_v20 = vld [vmem:[%s7588_s2 + $0x74] sm:$0xf0]  ;;  %v3282_v21 = vld [vmem:[%s7588_s2 + $0x168] sm:$0xf] }
  0x24   :  { %492 = vmatpush.bf16.msrb.mxu0 %v3219_v41  ;;  %474 = vmatmul.bf16.vlgmr.msra.gmra.mxu2 %v5375_v53  ;;  %v3303_v22 = vor.u32 %v4681_v14, %v3300_v15  ;;  %v4679_v23 = vld [vmem:[%s7588_s2 + $0x174] sm:$0xf0]  ;;  %v4645_v24 = vld [vmem:[%s7588_s2 + $0x6c] sm:$0xf]  ;;  %v3156_v25 = vld [vmem:[%s7588_s2 + $0x78] sm:$0xf0]  ;;  %v3155_v28 = vor.u32 %v4647_v20, %v3154_v19 }
  0x25   :  { %505 = vmatpush.bf16.msrb.mxu1 %v3347_v44  ;;  %518 = vmatpush.bf16.msrb.mxu2 %v3223_v45  ;;  %v4677_v26 = vld [vmem:[%s7588_s2 + $0x16c] sm:$0xf]  ;;  %v3284_v27 = vld [vmem:[%s7588_s2 + $0x178] sm:$0xf0]  ;;  %v3283_v29 = vor.u32 %v4679_v23, %v3282_v21  ;;  %v3159_v30 = vor.u32 %v4645_v24, %v3156_v25  ;;  %v3138_v31 = vld [vmem:[%s7588_s2 + $0x48] sm:$0xf] }
  0x26   :  { %531 = vmatpush.bf16.msrb.mxu3 %v3351_v49  ;;  %461 = vmatmul.bf16.vlgmr.msra.gmra.mxu1 %v5377_v54  ;;  %v4643_v32 = vld [vmem:[%s7588_s2 + $0x54] sm:$0xf0]  ;;  %v3266_v33 = vld [vmem:[%s7588_s2 + $0x148] sm:$0xf]  ;;  %v3287_v34 = vor.u32 %v4677_v26, %v3284_v27  ;;  %v4641_v36 = vld [vmem:[%s7588_s2 + $0x4c] sm:$0xf] }
  0x27   :  { %487 = vmatmul.bf16.vlgmr.msra.gmra.mxu3 %v5377_v54  ;;  %v4675_v35 = vld [vmem:[%s7588_s2 + $0x154] sm:$0xf0]  ;;  %v3140_v37 = vld [vmem:[%s7588_s2 + $0x58] sm:$0xf0]  ;;  %v4673_v38 = vld [vmem:[%s7588_s2 + $0x14c] sm:$0xf]  ;;  %v3139_v40 = vor.u32 %v4643_v32, %v3138_v31 }
  0x28   :  { %493 = vmatpush.bf16.msrb.mxu0 %v3203_v56  ;;  %v3268_v39 = vld [vmem:[%s7588_s2 + $0x158] sm:$0xf0]  ;;  %v3267_v41 = vor.u32 %v4675_v35, %v3266_v33  ;;  %v3143_v42 = vor.u32 %v4641_v36, %v3140_v37  ;;  %v3122_v43 = vld [vmem:[%s7588_s2 + $0x28] sm:$0xf]  ;;  %v4639_v44 = vld [vmem:[%s7588_s2 + $0x34] sm:$0xf0] }
  0x29   :  { %506 = vmatpush.bf16.msrb.mxu1 %v3331_v57  ;;  %519 = vmatpush.bf16.msrb.mxu2 %v3207_v58  ;;  %v3250_v45 = vld [vmem:[%s7588_s2 + $0x128] sm:$0xf]  ;;  %v3271_v46 = vor.u32 %v4673_v38, %v3268_v39  ;;  %v4671_v47 = vld [vmem:[%s7588_s2 + $0x134] sm:$0xf0]  ;;  %v4637_v48 = vld [vmem:[%s7588_s2 + $0x2c] sm:$0xf] }
  0x2a   :  { %532 = vmatpush.bf16.msrb.mxu3 %v3335_v62  ;;  %v3124_v49 = vld [vmem:[%s7588_s2 + $0x38] sm:$0xf0]  ;;  %v4669_v50 = vld [vmem:[%s7588_s2 + $0x12c] sm:$0xf] }
  0x2b   :  { %v3252_v51 = vld [vmem:[%s7588_s2 + $0x138] sm:$0xf0] }
  0x2c   :  { %494 = vmatpush.bf16.msrb.mxu0 %v3187_v4 }
  0x2d   :  { %507 = vmatpush.bf16.msrb.mxu1 %v3315_v5  ;;  %520 = vmatpush.bf16.msrb.mxu2 %v3191_v6 }
  0x2e   :  { %533 = vmatpush.bf16.msrb.mxu3 %v3319_v10 }
  0x30   :  { %495 = vmatpush.bf16.msrb.mxu0 %v3171_v16 }
  0x31   :  { %508 = vmatpush.bf16.msrb.mxu1 %v3299_v17  ;;  %521 = vmatpush.bf16.msrb.mxu2 %v3175_v18 }
  0x32   :  { %534 = vmatpush.bf16.msrb.mxu3 %v3303_v22 }
  0x34   :  { %496 = vmatpush.bf16.msrb.mxu0 %v3155_v28 }
  0x35   :  { %509 = vmatpush.bf16.msrb.mxu1 %v3283_v29  ;;  %522 = vmatpush.bf16.msrb.mxu2 %v3159_v30 }
  0x36   :  { %535 = vmatpush.bf16.msrb.mxu3 %v3287_v34 }
  0x37   :  { %18 = vsyncpa [#allocation5], 0  ;;  %v3123_v52 = vor.u32 %v4639_v44, %v3122_v43  ;;  %v3106_v55 = vld [vmem:[%s7588_s2 + $0x8] sm:$0xf]  ;;  %v3251_v56 = vor.u32 %v4671_v47, %v3250_v45  ;;  %v3127_v57 = vor.u32 %v4637_v48, %v3124_v49  ;;  %v4635_v58 = vld [vmem:[%s7588_s2 + $0x14] sm:$0xf0]  ;;  %v3255_v61 = vor.u32 %v4669_v50, %v3252_v51 }
  0x38   :  { %497 = vmatpush.bf16.msrb.mxu0 %v3139_v40  ;;  %v3234_v59 = vld [vmem:[%s7588_s2 + $0x108] sm:$0xf]  ;;  %v4667_v60 = vld [vmem:[%s7588_s2 + $0x114] sm:$0xf0]  ;;  %v4633_v62 = vld [vmem:[%s7588_s2 + $0xc] sm:$0xf]  ;;  %v3107_v4 = vor.u32 %v4635_v58, %v3106_v55 }
  0x39   :  { %510 = vmatpush.bf16.msrb.mxu1 %v3267_v41  ;;  %523 = vmatpush.bf16.msrb.mxu2 %v3143_v42  ;;  %v3108_v63 = vld [vmem:[%s7588_s2 + $0x18] sm:$0xf0]  ;;  %v4665_v0 = vld [vmem:[%s7588_s2 + $0x10c] sm:$0xf]  ;;  %v3466_v2 = vld [vmem:[%s7590_s4 + $0xe0] sm:$0xf]  ;;  %v3235_v7 = vor.u32 %v4667_v60, %v3234_v59 }
  0x3a   :  { %536 = vmatpush.bf16.msrb.mxu3 %v3271_v46  ;;  %v3236_v1 = vld [vmem:[%s7588_s2 + $0x118] sm:$0xf0]  ;;  %v4726_v3 = vld [vmem:[%s7590_s4 + $0xec] sm:$0xf0]  ;;  %v3594_v5 = vld [vmem:[%s7590_s4 + $0x1e0] sm:$0xf]  ;;  %v3111_v8 = vor.u32 %v4633_v62, %v3108_v63 }
  0x3b   :  { %v4758_v6 = vld [vmem:[%s7590_s4 + $0x1ec] sm:$0xf0]  ;;  %v3239_v9 = vor.u32 %v4665_v0, %v3236_v1  ;;  %v3467_v10 = vor.u32 %v4726_v3, %v3466_v2  ;;  %v3722_v11 = vld [vmem:[%s7590_s4 + $0x2e0] sm:$0xf]  ;;  %vm1545_vm0 = vcmask 1041408   ;;  %vm1547_vm1 = vcmask 1045508  }
  0x3c   :  { %498 = vmatpush.bf16.msrb.mxu0 %v3123_v52  ;;  %v4790_v12 = vld [vmem:[%s7590_s4 + $0x2ec] sm:$0xf0]  ;;  %v3450_v13 = vld [vmem:[%s7590_s4 + $0xc0] sm:$0xf]  ;;  %v3595_v15 = vor.u32 %v4758_v6, %v3594_v5  ;;  %vm1549_vm2 = vcmask 1043456   ;;  %s5070_s16 = smov [#allocation2]  }
  0x3d   :  { %511 = vmatpush.bf16.msrb.mxu1 %v3251_v56  ;;  %524 = vmatpush.bf16.msrb.mxu2 %v3127_v57  ;;  %v4722_v14 = vld [vmem:[%s7590_s4 + $0xcc] sm:$0xf0]  ;;  %v3578_v16 = vld [vmem:[%s7590_s4 + $0x1c0] sm:$0xf]  ;;  %v3723_v18 = vor.u32 %v4790_v12, %v3722_v11  ;;  %v4724_v12 = vld [vmem:[%s7590_s4 + $0xe4] sm:$0xf] }
  0x3e   :  { %537 = vmatpush.bf16.msrb.mxu3 %v3255_v61  ;;  %v4754_v17 = vld [vmem:[%s7590_s4 + $0x1cc] sm:$0xf0]  ;;  %v3451_v19 = vor.u32 %v4722_v14, %v3450_v13  ;;  %v3706_v20 = vld [vmem:[%s7590_s4 + $0x2c0] sm:$0xf]  ;;  %v3468_v14 = vld [vmem:[%s7590_s4 + $0xf0] sm:$0xf0] }
  0x3f   :  { %v4786_v21 = vld [vmem:[%s7590_s4 + $0x2cc] sm:$0xf0]  ;;  %v3434_v22 = vld [vmem:[%s7590_s4 + $0xa0] sm:$0xf]  ;;  %v3579_v24 = vor.u32 %v4754_v17, %v3578_v16  ;;  %v4756_v17 = vld [vmem:[%s7590_s4 + $0x1e4] sm:$0xf] }
  0x40   :  { %499 = vmatpush.bf16.msrb.mxu0 %v3107_v4  ;;  %v4718_v23 = vld [vmem:[%s7590_s4 + $0xac] sm:$0xf0]  ;;  %v3850_v25 = vld [vmem:[%s7590_s4 + $0x3e0] sm:$0xf]  ;;  %v3707_v29 = vor.u32 %v4786_v21, %v3706_v20  ;;  %v3471_v20 = vor.u32 %v4724_v12, %v3468_v14  ;;  %s3069_s17 = sshll.u32 %s5070_s16, 4  ;;  %s3082_s21 = sshll.u32 %s7597_s11, 4  ;;  %s3070_s17 = int_to_ptr.vmem [resolvable:$true] %s3069_s17  ;;  %s3083_s21 = int_to_ptr.hbm [resolvable:$true] %s3082_s21 }
  0x41   :  { %512 = vmatpush.bf16.msrb.mxu1 %v3235_v7  ;;  %525 = vmatpush.bf16.msrb.mxu2 %v3111_v8  ;;  %v3562_v26 = vld [vmem:[%s7590_s4 + $0x1a0] sm:$0xf]  ;;  %v4750_v27 = vld [vmem:[%s7590_s4 + $0x1ac] sm:$0xf0]  ;;  %v3435_v31 = vor.u32 %v4718_v23, %v3434_v22  ;;  %v4720_v22 = vld [vmem:[%s7590_s4 + $0xc4] sm:$0xf] }
  0x42   :  { %538 = vmatpush.bf16.msrb.mxu3 %v3239_v9  ;;  %v4822_v28 = vld [vmem:[%s7590_s4 + $0x3ec] sm:$0xf0]  ;;  %v3690_v32 = vld [vmem:[%s7590_s4 + $0x2a0] sm:$0xf]  ;;  %v3563_v34 = vor.u32 %v4750_v27, %v3562_v26  ;;  %v3452_v23 = vld [vmem:[%s7590_s4 + $0xd0] sm:$0xf0] }
  0x43   :  { %500 = vmatmul.bf16.vlgmr.msrb.gmra.mxu0 %v5375_v53  ;;  %v3851_v30 = vor.u32 %v4822_v28, %v3850_v25  ;;  %v4782_v33 = vld [vmem:[%s7590_s4 + $0x2ac] sm:$0xf0]  ;;  %v3834_v35 = vld [vmem:[%s7590_s4 + $0x3c0] sm:$0xf]  ;;  %v4752_v25 = vld [vmem:[%s7590_s4 + $0x1c4] sm:$0xf]  ;;  %v3455_v27 = vor.u32 %v4720_v22, %v3452_v23 }
  0x44   :  { %1330 = vmatpush.bf16.msra.mxu0 %v3467_v10  ;;  %513 = vmatmul.bf16.vlgmr.msrb.gmra.mxu1 %v5377_v54  ;;  %v4818_v36 = vld [vmem:[%s7590_s4 + $0x3cc] sm:$0xf0]  ;;  %v3546_v37 = vld [vmem:[%s7590_s4 + $0x180] sm:$0xf]  ;;  %v3691_v40 = vor.u32 %v4782_v33, %v3690_v32  ;;  %v3580_v26 = vld [vmem:[%s7590_s4 + $0x1d0] sm:$0xf0] }
  0x45   :  { %1343 = vmatpush.bf16.msra.mxu1 %v3595_v15  ;;  %526 = vmatmul.bf16.vlgmr.msrb.gmra.mxu2 %v5375_v53  ;;  %v3418_v53 = vld [vmem:[%s7590_s4 + $0x80] sm:$0xf]  ;;  %v4746_v38 = vld [vmem:[%s7590_s4 + $0x18c] sm:$0xf0]  ;;  %v3835_v39 = vor.u32 %v4818_v36, %v3834_v35  ;;  %v4716_v28 = vld [vmem:[%s7590_s4 + $0xa4] sm:$0xf] }
  0x46   :  { %539 = vmatmul.bf16.vlgmr.msrb.gmra.mxu3 %v5377_v54  ;;  %1356 = vmatpush.bf16.msra.mxu2 %v3723_v18  ;;  %v4714_v54 = vld [vmem:[%s7590_s4 + $0x8c] sm:$0xf0]  ;;  %v3402_v42 = vld [vmem:[%s7590_s4 + $0x60] sm:$0xf]  ;;  %v3547_v46 = vor.u32 %v4746_v38, %v3546_v37  ;;  %v3596_v18 = vld [vmem:[%s7590_s4 + $0x1f0] sm:$0xf0] }
  0x47   :  { %1369 = vmatpush.bf16.msra.mxu3 %v3851_v30  ;;  %v3419_v41 = vor.u32 %v4714_v54, %v3418_v53  ;;  %v3674_v43 = vld [vmem:[%s7590_s4 + $0x280] sm:$0xf]  ;;  %v4778_v44 = vld [vmem:[%s7590_s4 + $0x28c] sm:$0xf0]  ;;  %v3583_v30 = vor.u32 %v4752_v25, %v3580_v26  ;;  %v3564_v53 = vld [vmem:[%s7590_s4 + $0x1b0] sm:$0xf0] }
  0x48   :  { %1331 = vmatpush.bf16.msra.mxu0 %v3451_v19  ;;  %v4710_v45 = vld [vmem:[%s7590_s4 + $0x6c] sm:$0xf0]  ;;  %v3818_v47 = vld [vmem:[%s7590_s4 + $0x3a0] sm:$0xf]  ;;  %v3675_v52 = vor.u32 %v4778_v44, %v3674_v43  ;;  %v4712_v33 = vld [vmem:[%s7590_s4 + $0x84] sm:$0xf] }
  0x49   :  { %1344 = vmatpush.bf16.msra.mxu1 %v3579_v24  ;;  %v4814_v48 = vld [vmem:[%s7590_s4 + $0x3ac] sm:$0xf0]  ;;  %v3530_v49 = vld [vmem:[%s7590_s4 + $0x160] sm:$0xf]  ;;  %v3403_v55 = vor.u32 %v4710_v45, %v3402_v42  ;;  %v3599_v24 = vor.u32 %v4756_v17, %v3596_v18  ;;  %v3420_v54 = vld [vmem:[%s7590_s4 + $0x90] sm:$0xf0] }
  0x4a   :  { %1357 = vmatpush.bf16.msra.mxu2 %v3707_v29  ;;  %v4742_v50 = vld [vmem:[%s7590_s4 + $0x16c] sm:$0xf0]  ;;  %v3819_v51 = vor.u32 %v4814_v48, %v3818_v47  ;;  %v3386_v56 = vld [vmem:[%s7590_s4 + $0x40] sm:$0xf]  ;;  %v3436_v29 = vld [vmem:[%s7590_s4 + $0xb0] sm:$0xf0]  ;;  %v3423_v37 = vor.u32 %v4712_v33, %v3420_v54 }
  0x4b   :  { %1370 = vmatpush.bf16.msra.mxu3 %v3835_v39  ;;  %v3658_v57 = vld [vmem:[%s7590_s4 + $0x260] sm:$0xf]  ;;  %v4774_v58 = vld [vmem:[%s7590_s4 + $0x26c] sm:$0xf0]  ;;  %v3531_v60 = vor.u32 %v4742_v50, %v3530_v49  ;;  %v3439_v32 = vor.u32 %v4716_v28, %v3436_v29  ;;  %v4744_v35 = vld [vmem:[%s7590_s4 + $0x184] sm:$0xf] }
  0x4c   :  { %1332 = vmatpush.bf16.msra.mxu0 %v3435_v31  ;;  %v4706_v59 = vld [vmem:[%s7590_s4 + $0x4c] sm:$0xf0]  ;;  %v3802_v61 = vld [vmem:[%s7590_s4 + $0x380] sm:$0xf]  ;;  %v3659_v2 = vor.u32 %v4774_v58, %v3658_v57  ;;  %v4748_v31 = vld [vmem:[%s7590_s4 + $0x1a4] sm:$0xf] }
  0x4d   :  { %1345 = vmatpush.bf16.msra.mxu1 %v3563_v34  ;;  %v4810_v62 = vld [vmem:[%s7590_s4 + $0x38c] sm:$0xf0]  ;;  %v3514_v63 = vld [vmem:[%s7590_s4 + $0x140] sm:$0xf]  ;;  %v3387_v3 = vor.u32 %v4706_v59, %v3386_v56  ;;  %v3567_v34 = vor.u32 %v4748_v31, %v3564_v53  ;;  %v3548_v36 = vld [vmem:[%s7590_s4 + $0x190] sm:$0xf0] }
  0x4e   :  { %1358 = vmatpush.bf16.msra.mxu2 %v3691_v40  ;;  %v4738_v0 = vld [vmem:[%s7590_s4 + $0x14c] sm:$0xf0]  ;;  %v3803_v1 = vor.u32 %v4810_v62, %v3802_v61  ;;  %v3370_v4 = vld [vmem:[%s7590_s4 + $0x20] sm:$0xf]  ;;  %v4708_v38 = vld [vmem:[%s7590_s4 + $0x64] sm:$0xf]  ;;  %v3551_v40 = vor.u32 %v4744_v35, %v3548_v36 }
  0x4f   :  { %1371 = vmatpush.bf16.msra.mxu3 %v3819_v51  ;;  %v4702_v5 = vld [vmem:[%s7590_s4 + $0x2c] sm:$0xf0]  ;;  %v3515_v6 = vor.u32 %v4738_v0, %v3514_v63  ;;  %v3498_v7 = vld [vmem:[%s7590_s4 + $0x120] sm:$0xf]  ;;  %v3404_v39 = vld [vmem:[%s7590_s4 + $0x70] sm:$0xf0] }
  0x50   :  { %1333 = vmatpush.bf16.msra.mxu0 %v3419_v41  ;;  %v4734_v8 = vld [vmem:[%s7590_s4 + $0x12c] sm:$0xf0]  ;;  %v3371_v9 = vor.u32 %v4702_v5, %v3370_v4  ;;  %v3354_v10 = vld [vmem:[%s7590_s4] sm:$0xf]  ;;  %v3407_v41 = vor.u32 %v4708_v38, %v3404_v39  ;;  %v4704_v44 = vld [vmem:[%s7590_s4 + $0x44] sm:$0xf] }
  0x51   :  { %1346 = vmatpush.bf16.msra.mxu1 %v3547_v46  ;;  %v4698_v11 = vld [vmem:[%s7590_s4 + $0xc] sm:$0xf0]  ;;  %v3499_v13 = vor.u32 %v4734_v8, %v3498_v7  ;;  %v3482_v15 = vld [vmem:[%s7590_s4 + $0x100] sm:$0xf]  ;;  %v3388_v46 = vld [vmem:[%s7590_s4 + $0x50] sm:$0xf0] }
  0x52   :  { %1359 = vmatpush.bf16.msra.mxu2 %v3675_v52  ;;  %v4730_v16 = vld [vmem:[%s7590_s4 + $0x10c] sm:$0xf0]  ;;  %v3355_v19 = vor.u32 %v4698_v11, %v3354_v10  ;;  %v3642_v42 = vld [vmem:[%s7590_s4 + $0x240] sm:$0xf]  ;;  %v3391_v47 = vor.u32 %v4704_v44, %v3388_v46  ;;  %v4740_v50 = vld [vmem:[%s7590_s4 + $0x164] sm:$0xf] }
  0x53   :  { %1372 = vmatpush.bf16.msra.mxu3 %v3803_v1  ;;  %v3483_v21 = vor.u32 %v4730_v16, %v3482_v15  ;;  %v4770_v43 = vld [vmem:[%s7590_s4 + $0x24c] sm:$0xf0]  ;;  %v3786_v48 = vld [vmem:[%s7590_s4 + $0x360] sm:$0xf]  ;;  %v3532_v52 = vld [vmem:[%s7590_s4 + $0x170] sm:$0xf0] }
  0x54   :  { %1334 = vmatpush.bf16.msra.mxu0 %v3403_v55  ;;  %v3643_v45 = vor.u32 %v4770_v43, %v3642_v42  ;;  %v4806_v49 = vld [vmem:[%s7590_s4 + $0x36c] sm:$0xf0]  ;;  %v3535_v55 = vor.u32 %v4740_v50, %v3532_v52  ;;  %v3626_v56 = vld [vmem:[%s7590_s4 + $0x220] sm:$0xf]  ;;  %v4700_v58 = vld [vmem:[%s7590_s4 + $0x24] sm:$0xf] }
  0x55   :  { %1347 = vmatpush.bf16.msra.mxu1 %v3531_v60  ;;  %v3787_v51 = vor.u32 %v4806_v49, %v3786_v48  ;;  %v4766_v57 = vld [vmem:[%s7590_s4 + $0x22c] sm:$0xf0]  ;;  %v3372_v60 = vld [vmem:[%s7590_s4 + $0x30] sm:$0xf0]  ;;  %v3770_v62 = vld [vmem:[%s7590_s4 + $0x340] sm:$0xf] }
  0x56   :  { %1360 = vmatpush.bf16.msra.mxu2 %v3659_v2  ;;  %v3627_v59 = vor.u32 %v4766_v57, %v3626_v56  ;;  %v3375_v61 = vor.u32 %v4700_v58, %v3372_v60  ;;  %v4802_v63 = vld [vmem:[%s7590_s4 + $0x34c] sm:$0xf0]  ;;  %v4736_v0 = vld [vmem:[%s7590_s4 + $0x144] sm:$0xf]  ;;  %v3516_v2 = vld [vmem:[%s7590_s4 + $0x150] sm:$0xf0] }
  0x57   :  { %1373 = vmatpush.bf16.msra.mxu3 %v3787_v51  ;;  %v3771_v1 = vor.u32 %v4802_v63, %v3770_v62  ;;  %v3610_v4 = vld [vmem:[%s7590_s4 + $0x200] sm:$0xf]  ;;  %v4762_v5 = vld [vmem:[%s7590_s4 + $0x20c] sm:$0xf0]  ;;  %v4696_v7 = vld [vmem:[%s7590_s4 + $0x4] sm:$0xf] }
  0x58   :  { %1335 = vmatpush.bf16.msra.mxu0 %v3387_v3  ;;  %v3519_v3 = vor.u32 %v4736_v0, %v3516_v2  ;;  %v3356_v8 = vld [vmem:[%s7590_s4 + $0x10] sm:$0xf0]  ;;  %v4798_v14 = vld [vmem:[%s7590_s4 + $0x32c] sm:$0xf0]  ;;  %v4732_v15 = vld [vmem:[%s7590_s4 + $0x124] sm:$0xf] }
  0x59   :  { %1348 = vmatpush.bf16.msra.mxu1 %v3515_v6  ;;  %v3611_v6 = vor.u32 %v4762_v5, %v3610_v4  ;;  %v3359_v10 = vor.u32 %v4696_v7, %v3356_v8  ;;  %v3724_v11 = vld [vmem:[%s7590_s4 + $0x2f0] sm:$0xf0]  ;;  %v3738_v22 = vld [vmem:[%s7590_s4 + $0x300] sm:$0xf]  ;;  %v4794_v23 = vld [vmem:[%s7590_s4 + $0x30c] sm:$0xf0] }
  0x5a   :  { %1361 = vmatpush.bf16.msra.mxu2 %v3643_v45  ;;  %v3500_v17 = vld [vmem:[%s7590_s4 + $0x130] sm:$0xf0]  ;;  %v4728_v25 = vld [vmem:[%s7590_s4 + $0x104] sm:$0xf]  ;;  %v5873_v44 = vld [vmem:[%s7589_s3] sm:$0xf] }
  0x5b   :  { %1374 = vmatpush.bf16.msra.mxu3 %v3771_v1  ;;  %v3503_v18 = vor.u32 %v4732_v15, %v3500_v17  ;;  %v3484_v26 = vld [vmem:[%s7590_s4 + $0x110] sm:$0xf0]  ;;  %v4780_v31 = vld [vmem:[%s7590_s4 + $0x2a4] sm:$0xf]  ;;  %v106_v50 = vperm.slane %v5873_v44, 0  ;;  %v107_v5 = vperm.slane %v5873_v44, 1 }
  0x5c   :  { %1336 = vmatpush.bf16.msra.mxu0 %v3371_v9  ;;  %v4788_v9 = vld [vmem:[%s7590_s4 + $0x2e4] sm:$0xf]  ;;  %v3487_v28 = vor.u32 %v4728_v25, %v3484_v26  ;;  %v3852_v29 = vld [vmem:[%s7590_s4 + $0x3f0] sm:$0xf0]  ;;  %v3474_v2 = vld [vmem:[%s7590_s4 + $0xe8] sm:$0xf] }
  0x5d   :  { %1349 = vmatpush.bf16.msra.mxu1 %v3499_v13  ;;  %v3727_v12 = vor.u32 %v4788_v9, %v3724_v11  ;;  %v3754_v13 = vld [vmem:[%s7590_s4 + $0x320] sm:$0xf]  ;;  %v3692_v53 = vld [vmem:[%s7590_s4 + $0x2b0] sm:$0xf0]  ;;  %v4816_v33 = vld [vmem:[%s7590_s4 + $0x3c4] sm:$0xf] }
  0x5e   :  { %1362 = vmatpush.bf16.msra.mxu2 %v3627_v59  ;;  %v3755_v16 = vor.u32 %v4798_v14, %v3754_v13  ;;  %v3836_v54 = vld [vmem:[%s7590_s4 + $0x3d0] sm:$0xf0]  ;;  %v4776_v35 = vld [vmem:[%s7590_s4 + $0x284] sm:$0xf]  ;;  %v3458_v11 = vld [vmem:[%s7590_s4 + $0xc8] sm:$0xf] }
  0x5f   :  { %v3676_v36 = vld [vmem:[%s7590_s4 + $0x290] sm:$0xf0]  ;;  %v4812_v38 = vld [vmem:[%s7590_s4 + $0x3a4] sm:$0xf]  ;;  %v4723_v14 = vld [vmem:[%s7590_s4 + $0xd4] sm:$0xf0] }
  0x60   :  { %1337 = vmatpush.bf16.msra.mxu0 %v3355_v19  ;;  %v4784_v19 = vld [vmem:[%s7590_s4 + $0x2c4] sm:$0xf]  ;;  %1375 = vmatpush.bf16.msra.mxu3 %v3755_v16  ;;  %v3820_v39 = vld [vmem:[%s7590_s4 + $0x3b0] sm:$0xf0]  ;;  %v4759_v25 = vld [vmem:[%s7590_s4 + $0x1f4] sm:$0xf0] }
  0x61   :  { %1350 = vmatpush.bf16.msra.mxu1 %v3483_v21  ;;  %v3660_v42 = vld [vmem:[%s7590_s4 + $0x270] sm:$0xf0]  ;;  %v4808_v45 = vld [vmem:[%s7590_s4 + $0x384] sm:$0xf] }
  0x62   :  { %1363 = vmatpush.bf16.msra.mxu2 %v3611_v6  ;;  %v3804_v46 = vld [vmem:[%s7590_s4 + $0x390] sm:$0xf0]  ;;  %v4768_v48 = vld [vmem:[%s7590_s4 + $0x244] sm:$0xf] }
  0x63   :  { %v3644_v49 = vld [vmem:[%s7590_s4 + $0x250] sm:$0xf0]  ;;  %v4804_v52 = vld [vmem:[%s7590_s4 + $0x364] sm:$0xf] }
  0x64   :  { %1382 = vmatpush.bf16.msrb.mxu0 %v3471_v20  ;;  %v3708_v20 = vld [vmem:[%s7590_s4 + $0x2d0] sm:$0xf0]  ;;  %v3647_v51 = vor.u32 %v4768_v48, %v3644_v49  ;;  %v4764_v58 = vld [vmem:[%s7590_s4 + $0x224] sm:$0xf]  ;;  %v3554_v48 = vld [vmem:[%s7590_s4 + $0x188] sm:$0xf] }
  0x65   :  { %1395 = vmatpush.bf16.msrb.mxu1 %v3599_v24  ;;  %v3711_v21 = vor.u32 %v4784_v19, %v3708_v20  ;;  %v3739_v24 = vor.u32 %v4794_v23, %v3738_v22  ;;  %v3628_v59 = vld [vmem:[%s7590_s4 + $0x230] sm:$0xf0]  ;;  %v4800_v63 = vld [vmem:[%s7590_s4 + $0x344] sm:$0xf]  ;;  %v4747_v49 = vld [vmem:[%s7590_s4 + $0x194] sm:$0xf0] }
  0x66   :  { %1408 = vmatpush.bf16.msrb.mxu2 %v3727_v12  ;;  %v3631_v62 = vor.u32 %v4764_v58, %v3628_v59  ;;  %v3772_v0 = vld [vmem:[%s7590_s4 + $0x350] sm:$0xf0]  ;;  %v4760_v6 = vld [vmem:[%s7590_s4 + $0x204] sm:$0xf]  ;;  %v4743_v58 = vld [vmem:[%s7590_s4 + $0x174] sm:$0xf0] }
  0x67   :  { %1376 = vmatpush.bf16.msra.mxu3 %v3739_v24  ;;  %v3775_v4 = vor.u32 %v4800_v63, %v3772_v0  ;;  %v3612_v7 = vld [vmem:[%s7590_s4 + $0x210] sm:$0xf0]  ;;  %v4796_v15 = vld [vmem:[%s7590_s4 + $0x324] sm:$0xf]  ;;  %v3459_v24 = vor.u32 %v4723_v14, %v3458_v11  ;;  %v3378_v59 = vld [vmem:[%s7590_s4 + $0x28] sm:$0xf] }
  0x68   :  { %1383 = vmatpush.bf16.msrb.mxu0 %v3455_v27  ;;  %v4820_v27 = vld [vmem:[%s7590_s4 + $0x3e4] sm:$0xf]  ;;  %v3615_v9 = vor.u32 %v4760_v6, %v3612_v7  ;;  %v3756_v16 = vld [vmem:[%s7590_s4 + $0x330] sm:$0xf0]  ;;  %v3730_v6 = vld [vmem:[%s7590_s4 + $0x2e8] sm:$0xf] }
  0x69   :  { %1396 = vmatpush.bf16.msrb.mxu1 %v3583_v30  ;;  %v3855_v30 = vor.u32 %v4820_v27, %v3852_v29  ;;  %v3759_v20 = vor.u32 %v4796_v15, %v3756_v16  ;;  %v4792_v26 = vld [vmem:[%s7590_s4 + $0x304] sm:$0xf]  ;;  %v3740_v27 = vld [vmem:[%s7590_s4 + $0x310] sm:$0xf0]  ;;  %v4719_v29 = vld [vmem:[%s7590_s4 + $0xb4] sm:$0xf0] }
  0x6a   :  { %1409 = vmatpush.bf16.msrb.mxu2 %v3711_v21  ;;  %v3602_v21 = vld [vmem:[%s7590_s4 + $0x1e8] sm:$0xf]  ;;  %v109_v11 = vperm.slane %v5873_v44, 3 }
  0x6b   :  { %1421 = vmatpush.bf16.msrb.mxu3 %v3855_v30  ;;  %v3743_v30 = vor.u32 %v4792_v26, %v3740_v27  ;;  %v3506_v16 = vld [vmem:[%s7590_s4 + $0x128] sm:$0xf] }
  0x6c   :  { %1384 = vmatpush.bf16.msrb.mxu0 %v3439_v32  ;;  %v3695_v32 = vor.u32 %v4780_v31, %v3692_v53  ;;  %v3603_v53 = vor.u32 %v4759_v25, %v3602_v21 }
  0x6d   :  { %1397 = vmatpush.bf16.msrb.mxu1 %v3567_v34  ;;  %v3839_v34 = vor.u32 %v4816_v33, %v3836_v54  ;;  %v3586_v54 = vld [vmem:[%s7590_s4 + $0x1c8] sm:$0xf] }
  0x6e   :  { %1410 = vmatpush.bf16.msrb.mxu2 %v3695_v32 }
  0x6f   :  { %1422 = vmatpush.bf16.msrb.mxu3 %v3839_v34  ;;  %v4755_v34 = vld [vmem:[%s7590_s4 + $0x1d4] sm:$0xf0] }
  0x70   :  { %1385 = vmatpush.bf16.msrb.mxu0 %v3423_v37  ;;  %v3679_v37 = vor.u32 %v4776_v35, %v3676_v36  ;;  %v3426_v36 = vld [vmem:[%s7590_s4 + $0x88] sm:$0xf] }
  0x71   :  { %1398 = vmatpush.bf16.msrb.mxu1 %v3551_v40  ;;  %v3823_v40 = vor.u32 %v4812_v38, %v3820_v39  ;;  %v3587_v39 = vor.u32 %v4755_v34, %v3586_v54 }
  0x72   :  { %1411 = vmatpush.bf16.msrb.mxu2 %v3679_v37  ;;  %v4715_v37 = vld [vmem:[%s7590_s4 + $0x94] sm:$0xf0] }
  0x73   :  { %1423 = vmatpush.bf16.msrb.mxu3 %v3823_v40  ;;  %v3427_v40 = vor.u32 %v4715_v37, %v3426_v36  ;;  %v4757_v36 = vld [vmem:[%s7590_s4 + $0x1ec] sm:$0xf]  ;;  %v3604_v37 = vld [vmem:[%s7590_s4 + $0x1f8] sm:$0xf0] }
  0x74   :  { %1386 = vmatpush.bf16.msrb.mxu0 %v3407_v41  ;;  %v4772_v41 = vld [vmem:[%s7590_s4 + $0x264] sm:$0xf] }
  0x75   :  { %1399 = vmatpush.bf16.msrb.mxu1 %v3535_v55  ;;  %v3663_v43 = vor.u32 %v4772_v41, %v3660_v42  ;;  %v3788_v55 = vld [vmem:[%s7590_s4 + $0x370] sm:$0xf0]  ;;  %v3570_v41 = vld [vmem:[%s7590_s4 + $0x1a8] sm:$0xf]  ;;  %v4751_v42 = vld [vmem:[%s7590_s4 + $0x1b4] sm:$0xf0] }
  0x76   :  { %v3791_v56 = vor.u32 %v4804_v52, %v3788_v55  ;;  %v3555_v52 = vor.u32 %v4747_v49, %v3554_v48  ;;  %v108_v55 = vperm.slane %v5873_v44, 2  ;;  %v4819_v48 = vld [vmem:[%s7590_s4 + $0x3d4] sm:$0xf0] }
  0x77   :  { %1412 = vmatpush.bf16.msrb.mxu2 %v3663_v43  ;;  %v3410_v43 = vld [vmem:[%s7590_s4 + $0x68] sm:$0xf] }
  0x78   :  { %1387 = vmatpush.bf16.msrb.mxu0 %v3391_v47  ;;  %v3807_v47 = vor.u32 %v4808_v45, %v3804_v46  ;;  %v4711_v45 = vld [vmem:[%s7590_s4 + $0x74] sm:$0xf0]  ;;  %v3571_v46 = vor.u32 %v4751_v42, %v3570_v41  ;;  %v3444_v41 = vld [vmem:[%s7590_s4 + $0xb8] sm:$0xf0] }
  0x79   :  { %1400 = vmatpush.bf16.msrb.mxu1 %v3519_v3  ;;  %v4727_v3 = vld [vmem:[%s7590_s4 + $0xf4] sm:$0xf0] }
  0x7a   :  { %1424 = vmatpush.bf16.msrb.mxu3 %v3807_v47  ;;  %v3411_v47 = vor.u32 %v4711_v45, %v3410_v43 }
  0x7b   :  { %1413 = vmatpush.bf16.msrb.mxu2 %v3647_v51  ;;  %v4707_v51 = vld [vmem:[%s7590_s4 + $0x54] sm:$0xf0] }
  0x7c   :  { %1388 = vmatpush.bf16.msrb.mxu0 %v3375_v61 }
  0x7d   :  { %1401 = vmatpush.bf16.msrb.mxu1 %v3503_v18 }
  0x7e   :  { %1425 = vmatpush.bf16.msrb.mxu3 %v3791_v56 }
  0x7f   :  { %1414 = vmatpush.bf16.msrb.mxu2 %v3631_v62 }
  0x80   :  { %1389 = vmatpush.bf16.msrb.mxu0 %v3359_v10  ;;  %v3475_v10 = vor.u32 %v4727_v3, %v3474_v2  ;;  %v3522_v2 = vld [vmem:[%s7590_s4 + $0x148] sm:$0xf]  ;;  %v4739_v3 = vld [vmem:[%s7590_s4 + $0x154] sm:$0xf0] }
  0x81   :  { %1402 = vmatpush.bf16.msrb.mxu1 %v3487_v28  ;;  %v3442_v28 = vld [vmem:[%s7590_s4 + $0xa8] sm:$0xf] }
  0x82   :  { %1426 = vmatpush.bf16.msrb.mxu3 %v3775_v4  ;;  %v3443_v33 = vor.u32 %v4719_v29, %v3442_v28  ;;  %v3362_v4 = vld [vmem:[%s7590_s4 + $0x8] sm:$0xf] }
  0x83   :  { %1415 = vmatpush.bf16.msrb.mxu2 %v3615_v9  ;;  %v4725_v9 = vld [vmem:[%s7590_s4 + $0xec] sm:$0xf]  ;;  %v3490_v29 = vld [vmem:[%s7590_s4 + $0x108] sm:$0xf] }
  0x86   :  { %1427 = vmatpush.bf16.msrb.mxu3 %v3759_v20  ;;  %v3714_v20 = vld [vmem:[%s7590_s4 + $0x2c8] sm:$0xf] }
  0x8a   :  { %1428 = vmatpush.bf16.msrb.mxu3 %v3743_v30 }
  0xa0   :  { %v449_v57 = vpop.f32.mrf.mxu0 }
  0xa1   :  { %v450_v60 = vadd.f32 %v449_v57, %v106_v50  ;;  %v3394_v50 = vld [vmem:[%s7590_s4 + $0x48] sm:$0xf] }
  0xa2   :  { %v3395_v56 = vor.u32 %v4707_v51, %v3394_v50  ;;  %v3538_v57 = vld [vmem:[%s7590_s4 + $0x168] sm:$0xf] }
  0xa3   :  { %v462_v61 = vpop.f32.mrf.mxu1  ;;  %v3539_v62 = vor.u32 %v4743_v58, %v3538_v57  ;;  %v4779_v58 = vld [vmem:[%s7590_s4 + $0x294] sm:$0xf0] }
  0xa4   :  { %v463_v1 = vadd.f32 %v462_v61, %v450_v60  ;;  %v4703_v60 = vld [vmem:[%s7590_s4 + $0x34] sm:$0xf0] }
  0xa6   :  { %v544_v8 = vmax.f32 %v463_v1, 0.0  ;;  %v3379_v1 = vor.u32 %v4703_v60, %v3378_v59  ;;  %v4713_v59 = vld [vmem:[%s7590_s4 + $0x8c] sm:$0xf]  ;;  %v3428_v60 = vld [vmem:[%s7590_s4 + $0x98] sm:$0xf0] }
  0xa7   :  { %v475_v13 = vpop.f32.mrf.mxu2 }
  0xa8   :  { %v5922_v12 = vpack.c.bf16 %v544_v8, %v544_v8  ;;  %v476_v17 = vadd.f32 %v475_v13, %v107_v5  ;;  %v451_v19 = vpop.f32.mrf.mxu0  ;;  %v4699_v5 = vld [vmem:[%s7590_s4 + $0x14] sm:$0xf0]  ;;  %v3523_v13 = vor.u32 %v4739_v3, %v3522_v2  ;;  %v3431_v2 = vor.u32 %v4713_v59, %v3428_v60  ;;  %v4733_v59 = vld [vmem:[%s7590_s4 + $0x12c] sm:$0xf]  ;;  %v3508_v60 = vld [vmem:[%s7590_s4 + $0x138] sm:$0xf0] }
  0xa9   :  { %v4791_v8 = vld [vmem:[%s7590_s4 + $0x2f4] sm:$0xf0]  ;;  %v3363_v15 = vor.u32 %v4699_v5, %v3362_v4  ;;  %v4749_v4 = vld [vmem:[%s7590_s4 + $0x1ac] sm:$0xf]  ;;  %v3572_v5 = vld [vmem:[%s7590_s4 + $0x1b8] sm:$0xf0] }
  0xaa   :  { %v488_v18 = vpop.f32.mrf.mxu3  ;;  %1338 = vmatmul.bf16.vlgmr.msra.gmra.mxu0 %v5922_v12  ;;  %v4815_v3 = vld [vmem:[%s7590_s4 + $0x3b4] sm:$0xf0] }
  0xab   :  { %v464_v22 = vpop.f32.mrf.mxu1  ;;  %v489_v23 = vadd.f32 %v488_v18, %v476_v17  ;;  %1434 = vmatpush.bf16.msra.mxu0 %v3475_v10  ;;  %v3476_v10 = vld [vmem:[%s7590_s4 + $0xf8] sm:$0xf0]  ;;  %v4735_v17 = vld [vmem:[%s7590_s4 + $0x134] sm:$0xf0]  ;;  %v3731_v18 = vor.u32 %v4791_v8, %v3730_v6  ;;  %v4709_v6 = vld [vmem:[%s7590_s4 + $0x6c] sm:$0xf] }
  0xac   :  { %v3479_v19 = vor.u32 %v4725_v9, %v3476_v10  ;;  %v4787_v22 = vld [vmem:[%s7590_s4 + $0x2d4] sm:$0xf0]  ;;  %v3507_v28 = vor.u32 %v4735_v17, %v3506_v16  ;;  %v3666_v8 = vld [vmem:[%s7590_s4 + $0x268] sm:$0xf]  ;;  %v4745_v16 = vld [vmem:[%s7590_s4 + $0x18c] sm:$0xf] }
  0xad   :  { %v545_v31 = vmax.f32 %v489_v23, 0.0  ;;  %v4721_v23 = vld [vmem:[%s7590_s4 + $0xcc] sm:$0xf]  ;;  %v3715_v34 = vor.u32 %v4787_v22, %v3714_v20  ;;  %v4775_v9 = vld [vmem:[%s7590_s4 + $0x274] sm:$0xf0] }
  0xae   :  { %v3556_v17 = vld [vmem:[%s7590_s4 + $0x198] sm:$0xf0]  ;;  %v4771_v22 = vld [vmem:[%s7590_s4 + $0x254] sm:$0xf0] }
  0xaf   :  { %v5952_v32 = vpack.c.bf16 %v545_v31, %v545_v31  ;;  %1435 = vmatpush.bf16.msra.mxu0 %v3459_v24  ;;  %v477_v35 = vpop.f32.mrf.mxu2  ;;  %v3460_v24 = vld [vmem:[%s7590_s4 + $0xd8] sm:$0xf0]  ;;  %v4731_v31 = vld [vmem:[%s7590_s4 + $0x114] sm:$0xf0] }
  0xb0   :  { %v3463_v35 = vor.u32 %v4721_v23, %v3460_v24  ;;  %v3491_v43 = vor.u32 %v4731_v31, %v3490_v29  ;;  %v3396_v20 = vld [vmem:[%s7590_s4 + $0x58] sm:$0xf0]  ;;  %v3559_v24 = vor.u32 %v4745_v16, %v3556_v17  ;;  %v4701_v31 = vld [vmem:[%s7590_s4 + $0x2c] sm:$0xf]  ;;  %v3946_v17 = vld [vmem:[%s7592_s6 + $0xa0] sm:$0xf] }
  0xb1   :  { %1351 = vmatmul.bf16.vlgmr.msra.gmra.mxu1 %v5952_v32  ;;  %v3540_v29 = vld [vmem:[%s7590_s4 + $0x178] sm:$0xf0] }
  0xb2   :  { %v490_v38 = vpop.f32.mrf.mxu3  ;;  %1447 = vmatpush.bf16.msra.mxu1 %v3603_v53  ;;  %v3858_v53 = vld [vmem:[%s7590_s4 + $0x3e8] sm:$0xf] }
  0xb3   :  { %1436 = vmatpush.bf16.msra.mxu0 %v3443_v33  ;;  %v4823_v33 = vld [vmem:[%s7590_s4 + $0x3f4] sm:$0xf0]  ;;  %v3698_v38 = vld [vmem:[%s7590_s4 + $0x2a8] sm:$0xf] }
  0xb4   :  { %v3859_v45 = vor.u32 %v4823_v33, %v3858_v53  ;;  %v3380_v53 = vld [vmem:[%s7590_s4 + $0x38] sm:$0xf0]  ;;  %v3634_v33 = vld [vmem:[%s7590_s4 + $0x228] sm:$0xf] }
  0xb6   :  { %1448 = vmatpush.bf16.msra.mxu1 %v3587_v39  ;;  %v4783_v39 = vld [vmem:[%s7590_s4 + $0x2b4] sm:$0xf0] }
  0xb7   :  { %1437 = vmatpush.bf16.msra.mxu0 %v3427_v40  ;;  %v4717_v40 = vld [vmem:[%s7590_s4 + $0xac] sm:$0xf]  ;;  %v3699_v50 = vor.u32 %v4783_v39, %v3698_v38  ;;  %v4803_v38 = vld [vmem:[%s7590_s4 + $0x354] sm:$0xf0] }
  0xb8   :  { %v3447_v51 = vor.u32 %v4717_v40, %v3444_v41  ;;  %v4737_v39 = vld [vmem:[%s7590_s4 + $0x14c] sm:$0xf]  ;;  %v3524_v40 = vld [vmem:[%s7590_s4 + $0x158] sm:$0xf0] }
  0xba   :  { %1449 = vmatpush.bf16.msra.mxu1 %v3571_v46  ;;  %1390 = vmatmul.bf16.vlgmr.msrb.gmra.mxu0 %v5922_v12  ;;  %v3607_v46 = vor.u32 %v4757_v36, %v3604_v37  ;;  %v3778_v36 = vld [vmem:[%s7590_s4 + $0x348] sm:$0xf]  ;;  %v3383_v37 = vor.u32 %v4701_v31, %v3380_v53  ;;  %v4842_v31 = vld [vmem:[%s7592_s6 + $0x8c] sm:$0xf0]  ;;  %v4777_v53 = vld [vmem:[%s7590_s4 + $0x28c] sm:$0xf] }
  0xbb   :  { %1438 = vmatpush.bf16.msra.mxu0 %v3411_v47  ;;  %v3842_v47 = vld [vmem:[%s7590_s4 + $0x3c8] sm:$0xf] }
  0xbe   :  { %1450 = vmatpush.bf16.msra.mxu1 %v3555_v52  ;;  %v4753_v52 = vld [vmem:[%s7590_s4 + $0x1cc] sm:$0xf] }
  0xbf   :  { %1439 = vmatpush.bf16.msra.mxu0 %v3395_v56  ;;  %v3682_v56 = vld [vmem:[%s7590_s4 + $0x288] sm:$0xf] }
  0xc0   :  { %v501_v61 = vpop.f32.mrf.mxu0 }
  0xc1   :  { %v502_v63 = vadd.f32 %v501_v61, %v108_v55  ;;  %v514_v0 = vpop.f32.mrf.mxu1  ;;  %1403 = vmatmul.bf16.vlgmr.msrb.gmra.mxu1 %v5952_v32  ;;  %v3588_v55 = vld [vmem:[%s7590_s4 + $0x1d8] sm:$0xf0] }
  0xc2   :  { %1451 = vmatpush.bf16.msra.mxu1 %v3539_v62  ;;  %v3843_v62 = vor.u32 %v4819_v48, %v3842_v47  ;;  %v3978_v47 = vld [vmem:[%s7592_s6 + $0xe0] sm:$0xf]  ;;  %v4854_v48 = vld [vmem:[%s7592_s6 + $0xec] sm:$0xf0] }
  0xc3   :  { %v515_v7 = vadd.f32 %v514_v0, %v502_v63  ;;  %1440 = vmatpush.bf16.msra.mxu0 %v3379_v1  ;;  %v3591_v63 = vor.u32 %v4753_v52, %v3588_v55  ;;  %v3826_v0 = vld [vmem:[%s7590_s4 + $0x3a8] sm:$0xf]  ;;  %v3683_v1 = vor.u32 %v4779_v58, %v3682_v56  ;;  %v4789_v52 = vld [vmem:[%s7590_s4 + $0x2ec] sm:$0xf]  ;;  %v3732_v55 = vld [vmem:[%s7590_s4 + $0x2f8] sm:$0xf0] }
  0xc4   :  { %v3827_v10 = vor.u32 %v4815_v3, %v3826_v0  ;;  %v3762_v56 = vld [vmem:[%s7590_s4 + $0x328] sm:$0xf]  ;;  %v4799_v58 = vld [vmem:[%s7590_s4 + $0x334] sm:$0xf0]  ;;  %v4785_v0 = vld [vmem:[%s7590_s4 + $0x2cc] sm:$0xf] }
  0xc5   :  { %v546_v14 = vmax.f32 %v515_v7, 0.0  ;;  %v3412_v7 = vld [vmem:[%s7590_s4 + $0x78] sm:$0xf0]  ;;  %v3763_v3 = vor.u32 %v4799_v58, %v3762_v56  ;;  %v3898_v56 = vld [vmem:[%s7592_s6 + $0x40] sm:$0xf] }
  0xc6   :  { %1452 = vmatpush.bf16.msra.mxu1 %v3523_v13  ;;  %v3810_v13 = vld [vmem:[%s7590_s4 + $0x388] sm:$0xf]  ;;  %v4769_v58 = vld [vmem:[%s7590_s4 + $0x24c] sm:$0xf] }
  0xc7   :  { %v6040_v21 = vpack.c.bf16 %v546_v14, %v546_v14  ;;  %1441 = vmatpush.bf16.msra.mxu0 %v3363_v15  ;;  %v3415_v14 = vor.u32 %v4709_v6, %v3412_v7  ;;  %v4811_v15 = vld [vmem:[%s7590_s4 + $0x394] sm:$0xf0]  ;;  %v3746_v6 = vld [vmem:[%s7590_s4 + $0x308] sm:$0xf] }
  0xc8   :  { %v527_v44 = vpop.f32.mrf.mxu2  ;;  %v503_v27 = vpop.f32.mrf.mxu0  ;;  %v3811_v23 = vor.u32 %v4811_v15, %v3810_v13  ;;  %v4795_v7 = vld [vmem:[%s7590_s4 + $0x314] sm:$0xf0]  ;;  %v4106_v13 = vld [vmem:[%s7592_s6 + $0x1e0] sm:$0xf] }
  0xc9   :  { %v528_v25 = vadd.f32 %v527_v44, %v109_v11  ;;  %v540_v26 = vpop.f32.mrf.mxu3  ;;  %v516_v30 = vpop.f32.mrf.mxu1  ;;  %1364 = vmatmul.bf16.vlgmr.msra.gmra.mxu2 %v6040_v21  ;;  %v3575_v11 = vor.u32 %v4749_v4, %v3572_v5  ;;  %v3650_v44 = vld [vmem:[%s7590_s4 + $0x248] sm:$0xf]  ;;  %v4807_v27 = vld [vmem:[%s7590_s4 + $0x374] sm:$0xf0]  ;;  %v3511_v4 = vor.u32 %v4733_v59, %v3508_v60  ;;  %v3716_v5 = vld [vmem:[%s7590_s4 + $0x2d8] sm:$0xf0] }
  0xca   :  { %1460 = vmatpush.bf16.msra.mxu2 %v3731_v18  ;;  %1453 = vmatpush.bf16.msra.mxu1 %v3507_v28  ;;  %v3667_v18 = vor.u32 %v4775_v9, %v3666_v8  ;;  %v4741_v28 = vld [vmem:[%s7590_s4 + $0x16c] sm:$0xf]  ;;  %v3651_v30 = vor.u32 %v4771_v22, %v3650_v44  ;;  %v3492_v9 = vld [vmem:[%s7590_s4 + $0x118] sm:$0xf0]  ;;  %v3719_v16 = vor.u32 %v4785_v0, %v3716_v5  ;;  %v4042_v0 = vld [vmem:[%s7592_s6 + $0x160] sm:$0xf] }
  0xcb   :  { %v541_v54 = vadd.f32 %v540_v26, %v528_v25  ;;  %1486 = vmatpush.bf16.msrb.mxu0 %v3479_v19  ;;  %v4705_v19 = vld [vmem:[%s7590_s4 + $0x4c] sm:$0xf]  ;;  %v3794_v25 = vld [vmem:[%s7590_s4 + $0x368] sm:$0xf]  ;;  %v3700_v22 = vld [vmem:[%s7590_s4 + $0x2b8] sm:$0xf0] }
  0xcc   :  { %1442 = vmatmul.bf16.vlgmr.msra.gmra.mxu0 %v5922_v12  ;;  %v3399_v26 = vor.u32 %v4705_v19, %v3396_v20  ;;  %v4729_v8 = vld [vmem:[%s7590_s4 + $0x10c] sm:$0xf]  ;;  %v3747_v19 = vor.u32 %v4795_v7, %v3746_v6  ;;  %v3652_v59 = vld [vmem:[%s7590_s4 + $0x258] sm:$0xf0]  ;;  %v4830_v5 = vld [vmem:[%s7592_s6 + $0x2c] sm:$0xf0] }
  0xcd   :  { %v547_v42 = vmax.f32 %v541_v54, 0.0  ;;  %v4767_v54 = vld [vmem:[%s7590_s4 + $0x234] sm:$0xf0]  ;;  %v3495_v20 = vor.u32 %v4729_v8, %v3492_v9  ;;  %v4781_v44 = vld [vmem:[%s7590_s4 + $0x2ac] sm:$0xf] }
  0xce   :  { %1461 = vmatpush.bf16.msra.mxu2 %v3715_v34  ;;  %1454 = vmatpush.bf16.msra.mxu1 %v3491_v43  ;;  %v3795_v34 = vor.u32 %v4807_v27, %v3794_v25  ;;  %v3635_v41 = vor.u32 %v4767_v54, %v3634_v33  ;;  %v4697_v43 = vld [vmem:[%s7590_s4 + $0xc] sm:$0xf]  ;;  %v4090_v27 = vld [vmem:[%s7592_s6 + $0x1c0] sm:$0xf]  ;;  %v3684_v33 = vld [vmem:[%s7590_s4 + $0x298] sm:$0xf0] }
  0xcf   :  { %v6089_v49 = vpack.c.bf16 %v547_v42, %v547_v42  ;;  %1487 = vmatpush.bf16.msrb.mxu0 %v3463_v35  ;;  %v3543_v35 = vor.u32 %v4741_v28, %v3540_v29  ;;  %v3618_v42 = vld [vmem:[%s7590_s4 + $0x208] sm:$0xf]  ;;  %v4817_v25 = vld [vmem:[%s7590_s4 + $0x3cc] sm:$0xf]  ;;  %v3703_v29 = vor.u32 %v4781_v44, %v3700_v22  ;;  %v3636_v7 = vld [vmem:[%s7590_s4 + $0x238] sm:$0xf0] }
  0xd0   :  { %v529_v57 = vpop.f32.mrf.mxu2  ;;  %v4765_v6 = vld [vmem:[%s7590_s4 + $0x22c] sm:$0xf]  ;;  %v3986_v44 = vld [vmem:[%s7592_s6 + $0xe8] sm:$0xf]  ;;  %v4855_v22 = vld [vmem:[%s7592_s6 + $0xf4] sm:$0xf0] }
  0xd1   :  { %v542_v61 = vpop.f32.mrf.mxu3  ;;  %1377 = vmatmul.bf16.vlgmr.msra.gmra.mxu3 %v6089_v49  ;;  %1455 = vmatmul.bf16.vlgmr.msra.gmra.mxu1 %v5952_v32 }
  0xd2   :  { %1473 = vmatpush.bf16.msra.mxu3 %v3859_v45  ;;  %1499 = vmatpush.bf16.msrb.mxu1 %v3607_v46  ;;  %v3364_v45 = vld [vmem:[%s7590_s4 + $0x18] sm:$0xf0]  ;;  %v4763_v46 = vld [vmem:[%s7590_s4 + $0x214] sm:$0xf0] }
  0xd3   :  { %1462 = vmatpush.bf16.msra.mxu2 %v3699_v50  ;;  %1488 = vmatpush.bf16.msrb.mxu0 %v3447_v51  ;;  %v3779_v50 = vor.u32 %v4803_v38, %v3778_v36  ;;  %v3527_v51 = vor.u32 %v4737_v39, %v3524_v40  ;;  %v3367_v57 = vor.u32 %v4697_v43, %v3364_v45  ;;  %v3828_v36 = vld [vmem:[%s7590_s4 + $0x3b8] sm:$0xf0]  ;;  %v4878_v38 = vld [vmem:[%s7592_s6 + $0x1ac] sm:$0xf0]  ;;  %v4773_v43 = vld [vmem:[%s7590_s4 + $0x26c] sm:$0xf] }
  0xd4   :  { %v3619_v61 = vor.u32 %v4763_v46, %v3618_v42  ;;  %v3687_v40 = vor.u32 %v4777_v53, %v3684_v33  ;;  %v4838_v42 = vld [vmem:[%s7592_s6 + $0x6c] sm:$0xf0]  ;;  %v4848_v53 = vld [vmem:[%s7592_s6 + $0xc4] sm:$0xf]  ;;  %v3987_v33 = vor.u32 %v4855_v22, %v3986_v44  ;;  %v4060_v22 = vld [vmem:[%s7592_s6 + $0x190] sm:$0xf0] }
  0xd5   :  { %v4872_v44 = vld [vmem:[%s7592_s6 + $0x184] sm:$0xf] }
  0xd6   :  { %1474 = vmatpush.bf16.msra.mxu3 %v3843_v62  ;;  %1500 = vmatpush.bf16.msrb.mxu1 %v3591_v63  ;;  %v3979_v62 = vor.u32 %v4854_v48, %v3978_v47  ;;  %v3735_v63 = vor.u32 %v4789_v52, %v3732_v55  ;;  %v4809_v47 = vld [vmem:[%s7590_s4 + $0x38c] sm:$0xf]  ;;  %v3812_v48 = vld [vmem:[%s7590_s4 + $0x398] sm:$0xf0] }
  0xd7   :  { %1463 = vmatpush.bf16.msra.mxu2 %v3683_v1  ;;  %1489 = vmatpush.bf16.msrb.mxu0 %v3431_v2  ;;  %v3962_v1 = vld [vmem:[%s7592_s6 + $0xc0] sm:$0xf]  ;;  %v4850_v2 = vld [vmem:[%s7592_s6 + $0xcc] sm:$0xf0]  ;;  %v3815_v60 = vor.u32 %v4809_v47, %v3812_v48  ;;  %v4887_v47 = vld [vmem:[%s7592_s6 + $0x1f4] sm:$0xf0] }
  0xd8   :  { %v3963_v15 = vor.u32 %v4850_v2, %v3962_v1  ;;  %v4870_v1 = vld [vmem:[%s7592_s6 + $0x16c] sm:$0xf0] }
  0xd9   :  { %1416 = vmatmul.bf16.vlgmr.msrb.gmra.mxu2 %v6040_v21  ;;  %v4043_v9 = vor.u32 %v4870_v1, %v4042_v0  ;;  %v3938_v1 = vld [vmem:[%s7592_s6 + $0x88] sm:$0xf] }
  0xda   :  { %1475 = vmatpush.bf16.msra.mxu3 %v3827_v10  ;;  %1501 = vmatpush.bf16.msrb.mxu1 %v3575_v11  ;;  %v4821_v10 = vld [vmem:[%s7590_s4 + $0x3ec] sm:$0xf]  ;;  %v3860_v11 = vld [vmem:[%s7590_s4 + $0x3f8] sm:$0xf0] }
  0xdb   :  { %1490 = vmatpush.bf16.msrb.mxu0 %v3415_v14  ;;  %1464 = vmatpush.bf16.msra.mxu2 %v3667_v18  ;;  %v4886_v14 = vld [vmem:[%s7592_s6 + $0x1ec] sm:$0xf0] }
  0xdc   :  { %v4846_v18 = vld [vmem:[%s7592_s6 + $0xac] sm:$0xf0] }
  0xdd   :  { %v3947_v28 = vor.u32 %v4846_v18, %v3946_v17  ;;  %v4761_v17 = vld [vmem:[%s7590_s4 + $0x20c] sm:$0xf]  ;;  %v3866_v18 = vld [vmem:[%s7592_s6] sm:$0xf] }
  0xde   :  { %1476 = vmatpush.bf16.msra.mxu3 %v3811_v23  ;;  %1502 = vmatpush.bf16.msrb.mxu1 %v3559_v24  ;;  %v3863_v23 = vor.u32 %v4821_v10, %v3860_v11  ;;  %v4107_v24 = vor.u32 %v4886_v14, %v4106_v13  ;;  %v4801_v10 = vld [vmem:[%s7590_s4 + $0x34c] sm:$0xf]  ;;  %v3780_v11 = vld [vmem:[%s7590_s4 + $0x358] sm:$0xf0]  ;;  %v4026_v13 = vld [vmem:[%s7592_s6 + $0x140] sm:$0xf] }
  0xdf   :  { %1491 = vmatpush.bf16.msrb.mxu0 %v3399_v26  ;;  %1465 = vmatpush.bf16.msra.mxu2 %v3651_v30  ;;  %v3844_v26 = vld [vmem:[%s7590_s4 + $0x3d8] sm:$0xf0]  ;;  %v3930_v30 = vld [vmem:[%s7592_s6 + $0x80] sm:$0xf]  ;;  %v4866_v14 = vld [vmem:[%s7592_s6 + $0x14c] sm:$0xf0] }
  0xe0   :  { %v3847_v54 = vor.u32 %v4817_v25, %v3844_v26  ;;  %v3931_v39 = vor.u32 %v4842_v31, %v3930_v30  ;;  %v4852_v25 = vld [vmem:[%s7592_s6 + $0xe4] sm:$0xf]  ;;  %v3980_v26 = vld [vmem:[%s7592_s6 + $0xf0] sm:$0xf0] }
  0xe1   :  { %1429 = vmatmul.bf16.vlgmr.msrb.gmra.mxu3 %v6089_v49 }
  0xe2   :  { %1477 = vmatpush.bf16.msra.mxu3 %v3795_v34  ;;  %1503 = vmatpush.bf16.msrb.mxu1 %v3543_v35  ;;  %v4813_v35 = vld [vmem:[%s7590_s4 + $0x3ac] sm:$0xf] }
  0xe3   :  { %1492 = vmatpush.bf16.msrb.mxu0 %v3383_v37  ;;  %1466 = vmatpush.bf16.msra.mxu2 %v3635_v41  ;;  %v4074_v37 = vld [vmem:[%s7592_s6 + $0x1a0] sm:$0xf]  ;;  %v3831_v45 = vor.u32 %v4813_v35, %v3828_v36  ;;  %v3970_v35 = vld [vmem:[%s7592_s6 + $0xc8] sm:$0xf]  ;;  %v4851_v36 = vld [vmem:[%s7592_s6 + $0xd4] sm:$0xf0] }
  0xe4   :  { %v3914_v41 = vld [vmem:[%s7592_s6 + $0x60] sm:$0xf]  ;;  %v4075_v46 = vor.u32 %v4878_v38, %v4074_v37  ;;  %v3971_v48 = vor.u32 %v4851_v36, %v3970_v35  ;;  %v3890_v36 = vld [vmem:[%s7592_s6 + $0x28] sm:$0xf] }
  0xe5   :  { %v3915_v52 = vor.u32 %v4838_v42, %v3914_v41  ;;  %v3994_v41 = vld [vmem:[%s7592_s6 + $0x100] sm:$0xf]  ;;  %v4858_v42 = vld [vmem:[%s7592_s6 + $0x10c] sm:$0xf0] }
  0xe6   :  { %1478 = vmatpush.bf16.msra.mxu3 %v3779_v50  ;;  %1504 = vmatpush.bf16.msrb.mxu1 %v3527_v51  ;;  %v4058_v50 = vld [vmem:[%s7592_s6 + $0x180] sm:$0xf]  ;;  %v4874_v51 = vld [vmem:[%s7592_s6 + $0x18c] sm:$0xf0] }
  0xe7   :  { %1493 = vmatpush.bf16.msrb.mxu0 %v3367_v57  ;;  %1467 = vmatpush.bf16.msra.mxu2 %v3619_v61  ;;  %v4834_v57 = vld [vmem:[%s7592_s6 + $0x4c] sm:$0xf0]  ;;  %v4059_v61 = vor.u32 %v4874_v51, %v4058_v50  ;;  %v3954_v51 = vld [vmem:[%s7592_s6 + $0xa8] sm:$0xf] }
  0xe8   :  { %v3899_v2 = vor.u32 %v4834_v57, %v3898_v56  ;;  %v3995_v56 = vor.u32 %v4858_v42, %v3994_v41  ;;  %v4828_v41 = vld [vmem:[%s7592_s6 + $0x24] sm:$0xf]  ;;  %v3884_v42 = vld [vmem:[%s7592_s6 + $0x30] sm:$0xf0] }
  0xea   :  { %1479 = vmatpush.bf16.msra.mxu3 %v3763_v3  ;;  %1505 = vmatpush.bf16.msrb.mxu1 %v3511_v4  ;;  %v3655_v3 = vor.u32 %v4769_v58, %v3652_v59  ;;  %v3882_v4 = vld [vmem:[%s7592_s6 + $0x20] sm:$0xf]  ;;  %v4844_v59 = vld [vmem:[%s7592_s6 + $0xa4] sm:$0xf] }
  0xeb   :  { %1954 = vmatpush.bf16.msra.mxu0 %v3979_v62  ;;  %1512 = vmatpush.bf16.msrb.mxu2 %v3735_v63  ;;  %v4805_v62 = vld [vmem:[%s7590_s4 + $0x36c] sm:$0xf]  ;;  %v3796_v63 = vld [vmem:[%s7590_s4 + $0x378] sm:$0xf0] }
  0xec   :  { %1494 = vmatmul.bf16.vlgmr.msrb.gmra.mxu0 %v5922_v12  ;;  %1468 = vmatmul.bf16.vlgmr.msra.gmra.mxu2 %v6040_v21  ;;  %v4882_v12 = vld [vmem:[%s7592_s6 + $0x1cc] sm:$0xf0]  ;;  %v3799_v8 = vor.u32 %v4805_v62, %v3796_v63  ;;  %v4098_v62 = vld [vmem:[%s7592_s6 + $0x1c8] sm:$0xf]  ;;  %v4883_v63 = vld [vmem:[%s7592_s6 + $0x1d4] sm:$0xf0] }
  0xed   :  { %v4091_v34 = vor.u32 %v4882_v12, %v4090_v27  ;;  %v4797_v27 = vld [vmem:[%s7590_s4 + $0x32c] sm:$0xf]  ;;  %v3764_v12 = vld [vmem:[%s7590_s4 + $0x338] sm:$0xf0] }
  0xee   :  { %1480 = vmatpush.bf16.msra.mxu3 %v3747_v19  ;;  %1506 = vmatpush.bf16.msrb.mxu1 %v3495_v20  ;;  %v4826_v19 = vld [vmem:[%s7592_s6 + $0xc] sm:$0xf0]  ;;  %v3620_v20 = vld [vmem:[%s7590_s4 + $0x218] sm:$0xf0]  ;;  %v3767_v37 = vor.u32 %v4797_v27, %v3764_v12  ;;  %v4835_v27 = vld [vmem:[%s7592_s6 + $0x54] sm:$0xf0] }
  0xef   :  { %1955 = vmatpush.bf16.msra.mxu0 %v3963_v15  ;;  %1513 = vmatpush.bf16.msrb.mxu2 %v3719_v16  ;;  %v3883_v15 = vor.u32 %v4830_v5, %v3882_v4  ;;  %v3639_v16 = vor.u32 %v4765_v6, %v3636_v7  ;;  %v3867_v30 = vor.u32 %v4826_v19, %v3866_v18  ;;  %v4840_v7 = vld [vmem:[%s7592_s6 + $0x84] sm:$0xf] }
  0xf0   :  { %v3623_v31 = vor.u32 %v4761_v17, %v3620_v20  ;;  %v4099_v6 = vor.u32 %v4883_v63, %v4098_v62  ;;  %v3916_v20 = vld [vmem:[%s7592_s6 + $0x70] sm:$0xf0]  ;;  %v4018_v63 = vld [vmem:[%s7592_s6 + $0x128] sm:$0xf] }
  0xf1   :  { %1507 = vmatmul.bf16.vlgmr.msrb.gmra.mxu1 %v5952_v32  ;;  %1481 = vmatmul.bf16.vlgmr.msra.gmra.mxu3 %v6089_v49  ;;  %v3668_v32 = vld [vmem:[%s7590_s4 + $0x278] sm:$0xf0] }
  0xf2   :  { %1525 = vmatpush.bf16.msrb.mxu3 %v3863_v23  ;;  %1967 = vmatpush.bf16.msra.mxu1 %v4107_v24  ;;  %v3671_v55 = vor.u32 %v4773_v43, %v3668_v32  ;;  %v3783_v23 = vor.u32 %v4801_v10, %v3780_v11  ;;  %v4027_v24 = vor.u32 %v4866_v14, %v4026_v13  ;;  %v4884_v43 = vld [vmem:[%s7592_s6 + $0x1e4] sm:$0xf]  ;;  %v4108_v32 = vld [vmem:[%s7592_s6 + $0x1f0] sm:$0xf0]  ;;  %v4082_v11 = vld [vmem:[%s7592_s6 + $0x1a8] sm:$0xf] }
  0xf3   :  { %1956 = vmatpush.bf16.msra.mxu0 %v3947_v28  ;;  %1514 = vmatpush.bf16.msrb.mxu2 %v3703_v29  ;;  %v4010_v28 = vld [vmem:[%s7592_s6 + $0x120] sm:$0xf]  ;;  %v4862_v29 = vld [vmem:[%s7592_s6 + $0x12c] sm:$0xf0]  ;;  %v4111_v57 = vor.u32 %v4884_v43, %v4108_v32  ;;  %v4076_v10 = vld [vmem:[%s7592_s6 + $0x1b0] sm:$0xf0] }
  0xf4   :  { %v4011_v38 = vor.u32 %v4862_v29, %v4010_v28  ;;  %v4879_v13 = vld [vmem:[%s7592_s6 + $0x1b4] sm:$0xf0]  ;;  %v4063_v28 = vor.u32 %v4872_v44, %v4060_v22  ;;  %v4864_v43 = vld [vmem:[%s7592_s6 + $0x144] sm:$0xf]  ;;  %v4028_v32 = vld [vmem:[%s7592_s6 + $0x150] sm:$0xf0] }
  0xf5   :  { %v4083_v19 = vor.u32 %v4879_v13, %v4082_v11  ;;  %v4859_v11 = vld [vmem:[%s7592_s6 + $0x114] sm:$0xf0]  ;;  %v4885_v13 = vld [vmem:[%s7592_s6 + $0x1ec] sm:$0xf]  ;;  %v4100_v44 = vld [vmem:[%s7592_s6 + $0x1d8] sm:$0xf0] }
  0xf6   :  { %1526 = vmatpush.bf16.msrb.mxu3 %v3847_v54  ;;  %1968 = vmatpush.bf16.msra.mxu1 %v4091_v34  ;;  %v3983_v54 = vor.u32 %v4852_v25, %v3980_v26  ;;  %v3964_v34 = vld [vmem:[%s7592_s6 + $0xd0] sm:$0xf0]  ;;  %v3906_v26 = vld [vmem:[%s7592_s6 + $0x48] sm:$0xf]  ;;  %v6664_v22 = vld [vmem:[%s7591_s5] sm:$0xf] }
  0xf7   :  { %1957 = vmatpush.bf16.msra.mxu0 %v3931_v39  ;;  %1515 = vmatpush.bf16.msrb.mxu2 %v3687_v40  ;;  %v4793_v39 = vld [vmem:[%s7590_s4 + $0x30c] sm:$0xf]  ;;  %v3748_v40 = vld [vmem:[%s7590_s4 + $0x318] sm:$0xf0]  ;;  %v3967_v50 = vor.u32 %v4848_v53, %v3964_v34  ;;  %v4868_v53 = vld [vmem:[%s7592_s6 + $0x164] sm:$0xf]  ;;  %v3907_v35 = vor.u32 %v4835_v27, %v3906_v26 }
  0xf8   :  { %v4871_v34 = vld [vmem:[%s7592_s6 + $0x174] sm:$0xf0]  ;;  %v3940_v26 = vld [vmem:[%s7592_s6 + $0x98] sm:$0xf0]  ;;  %v682_v27 = vperm.slane %v6664_v22, 0  ;;  %s3071_s5 = sshll.u32 %s7596_s10, 4  ;;  %s3072_s5 = int_to_ptr.hbm [resolvable:$true] %s3071_s5 }
  0xfa   :  { %1527 = vmatpush.bf16.msrb.mxu3 %v3831_v45  ;;  %1969 = vmatpush.bf16.msra.mxu1 %v4075_v46  ;;  %v6459_v45 = vld [vmem:[#allocation1] sm:$0xff]  ;;  %v4114_v46 = vld [vmem:[%s7592_s6 + $0x1e8] sm:$0xf] }
  0xfb   :  { %1958 = vmatpush.bf16.msra.mxu0 %v3915_v52  ;;  %1516 = vmatpush.bf16.msrb.mxu2 %v3671_v55  ;;  %v4847_v52 = vld [vmem:[%s7592_s6 + $0xb4] sm:$0xf0]  ;;  %v3751_v55 = vor.u32 %v4793_v39, %v3748_v40  ;;  %v4115_v58 = vor.u32 %v4887_v47, %v4114_v46  ;;  %v4034_v46 = vld [vmem:[%s7592_s6 + $0x148] sm:$0xf] }
  0xfc   :  { %v3955_v0 = vor.u32 %v4847_v52, %v3954_v51  ;;  %v4867_v47 = vld [vmem:[%s7592_s6 + $0x154] sm:$0xf0]  ;;  %v3887_v52 = vor.u32 %v4828_v41, %v3884_v42 }
  0xfd   :  { %v4827_v51 = vld [vmem:[%s7592_s6 + $0x14] sm:$0xf0] }
  0xfe   :  { %1528 = vmatpush.bf16.msrb.mxu3 %v3815_v60  ;;  %1970 = vmatpush.bf16.msra.mxu1 %v4059_v61  ;;  %v3948_v60 = vld [vmem:[%s7592_s6 + $0xb0] sm:$0xf0]  ;;  %v4880_v61 = vld [vmem:[%s7592_s6 + $0x1c4] sm:$0xf] }
  0xff   :  { %1959 = vmatpush.bf16.msra.mxu0 %v3899_v2  ;;  %1517 = vmatpush.bf16.msrb.mxu2 %v3655_v3  ;;  %v4843_v2 = vld [vmem:[%s7592_s6 + $0x94] sm:$0xf0]  ;;  %v6499_v3 = vld [vmem:[#allocation1 + $0x9] sm:$0xff]  ;;  %v3951_v4 = vor.u32 %v4844_v59, %v3948_v60  ;;  %v3988_v60 = vld [vmem:[%s7592_s6 + $0xf8] sm:$0xf0] }
 0x100   :  { %v3939_v14 = vor.u32 %v4843_v2, %v3938_v1  ;;  %v4853_v59 = vld [vmem:[%s7592_s6 + $0xec] sm:$0xf] }
 0x101   :  { %v3991_v2 = vor.u32 %v4853_v59, %v3988_v60  ;;  %v4825_v59 = vld [vmem:[%s7592_s6 + $0xc] sm:$0xf] }
 0x102   :  { %1529 = vmatpush.bf16.msrb.mxu3 %v3799_v8  ;;  %1971 = vmatpush.bf16.msra.mxu1 %v4043_v9  ;;  %v3932_v8 = vld [vmem:[%s7592_s6 + $0x90] sm:$0xf0]  ;;  %v4876_v9 = vld [vmem:[%s7592_s6 + $0x1a4] sm:$0xf] }
 0x103   :  { %1960 = vmatpush.bf16.msra.mxu0 %v3883_v15  ;;  %1518 = vmatpush.bf16.msrb.mxu2 %v3639_v16  ;;  %v3922_v15 = vld [vmem:[%s7592_s6 + $0x68] sm:$0xf]  ;;  %v4839_v16 = vld [vmem:[%s7592_s6 + $0x74] sm:$0xf0]  ;;  %v3935_v17 = vor.u32 %v4840_v7, %v3932_v8  ;;  %v4079_v18 = vor.u32 %v4876_v9, %v4076_v10  ;;  %v4856_v8 = vld [vmem:[%s7592_s6 + $0x104] sm:$0xf] }
 0x104   :  { %v3923_v25 = vor.u32 %v4839_v16, %v3922_v15  ;;  %v3996_v9 = vld [vmem:[%s7592_s6 + $0x110] sm:$0xf0]  ;;  %v4002_v10 = vld [vmem:[%s7592_s6 + $0x108] sm:$0xf] }
 0x105   :  { %v3999_v16 = vor.u32 %v4856_v8, %v3996_v9  ;;  %v4857_v8 = vld [vmem:[%s7592_s6 + $0x10c] sm:$0xf]  ;;  %v4004_v9 = vld [vmem:[%s7592_s6 + $0x118] sm:$0xf0] }
 0x106   :  { %1530 = vmatpush.bf16.msrb.mxu3 %v3783_v23  ;;  %1972 = vmatpush.bf16.msra.mxu1 %v4027_v24  ;;  %v4066_v23 = vld [vmem:[%s7592_s6 + $0x188] sm:$0xf]  ;;  %v4875_v24 = vld [vmem:[%s7592_s6 + $0x194] sm:$0xf0] }
 0x107   :  { %1961 = vmatpush.bf16.msra.mxu0 %v3867_v30  ;;  %1519 = vmatpush.bf16.msrb.mxu2 %v3623_v31  ;;  %v4067_v29 = vor.u32 %v4875_v24, %v4066_v23  ;;  %v4832_v30 = vld [vmem:[%s7592_s6 + $0x44] sm:$0xf]  ;;  %v3900_v31 = vld [vmem:[%s7592_s6 + $0x50] sm:$0xf0] }
 0x10a   :  { %1531 = vmatpush.bf16.msrb.mxu3 %v3767_v37  ;;  %1973 = vmatpush.bf16.msra.mxu1 %v4011_v38  ;;  %v4831_v37 = vld [vmem:[%s7592_s6 + $0x34] sm:$0xf0]  ;;  %v3903_v38 = vor.u32 %v4832_v30, %v3900_v31 }
 0x10b   :  { %2006 = vmatpush.bf16.msrb.mxu0 %v3987_v33  ;;  %1980 = vmatpush.bf16.msra.mxu2 %v3983_v54  ;;  %v4044_v33 = vld [vmem:[%s7592_s6 + $0x170] sm:$0xf0]  ;;  %v4050_v54 = vld [vmem:[%s7592_s6 + $0x168] sm:$0xf] }
 0x10c   :  { %1520 = vmatmul.bf16.vlgmr.msrb.gmra.mxu2 %v6040_v21  ;;  %1962 = vmatmul.bf16.vlgmr.msra.gmra.mxu0 %v6459_v45  ;;  %v4092_v21 = vld [vmem:[%s7592_s6 + $0x1d0] sm:$0xf0]  ;;  %v4047_v39 = vor.u32 %v4868_v53, %v4044_v33  ;;  %v4051_v40 = vor.u32 %v4871_v34, %v4050_v54  ;;  %v4837_v53 = vld [vmem:[%s7592_s6 + $0x6c] sm:$0xf]  ;;  %v3924_v33 = vld [vmem:[%s7592_s6 + $0x78] sm:$0xf0] }
 0x10d   :  { %v4095_v5 = vor.u32 %v4880_v61, %v4092_v21  ;;  %v4860_v61 = vld [vmem:[%s7592_s6 + $0x124] sm:$0xf]  ;;  %v4012_v21 = vld [vmem:[%s7592_s6 + $0x130] sm:$0xf0]  ;;  %v4873_v34 = vld [vmem:[%s7592_s6 + $0x18c] sm:$0xf] }
 0x10e   :  { %1532 = vmatpush.bf16.msrb.mxu3 %v3751_v55  ;;  %1974 = vmatpush.bf16.msra.mxu1 %v3995_v56  ;;  %v4031_v55 = vor.u32 %v4864_v43, %v4028_v32  ;;  %v4035_v56 = vor.u32 %v4867_v47, %v4034_v46  ;;  %v4869_v43 = vld [vmem:[%s7592_s6 + $0x16c] sm:$0xf]  ;;  %v4052_v32 = vld [vmem:[%s7592_s6 + $0x178] sm:$0xf0] }
 0x10f   :  { %2007 = vmatpush.bf16.msrb.mxu0 %v3971_v48  ;;  %1981 = vmatpush.bf16.msra.mxu2 %v3967_v50  ;;  %v3891_v48 = vor.u32 %v4831_v37, %v3890_v36  ;;  %v3874_v50 = vld [vmem:[%s7592_s6 + $0x8] sm:$0xf]  ;;  %v3927_v36 = vor.u32 %v4837_v53, %v3924_v33  ;;  %v4829_v47 = vld [vmem:[%s7592_s6 + $0x2c] sm:$0xf]  ;;  %v4122_v53 = vld [vmem:[%s7594_s8] sm:$0xf] }
 0x110   :  { %v3875_v62 = vor.u32 %v4827_v51, %v3874_v50  ;;  %v3892_v50 = vld [vmem:[%s7592_s6 + $0x38] sm:$0xf0]  ;;  %v4234_v51 = vld [vmem:[%s7594_s8 + $0xe0] sm:$0xf]  ;;  %v4890_v33 = vld [vmem:[%s7594_s8 + $0xc] sm:$0xf0] }
 0x111   :  { %1533 = vmatmul.bf16.vlgmr.msrb.gmra.mxu3 %v6089_v49  ;;  %1975 = vmatmul.bf16.vlgmr.msra.gmra.mxu1 %v6499_v3  ;;  %v4836_v49 = vld [vmem:[%s7592_s6 + $0x64] sm:$0xf] }
 0x112   :  { %1993 = vmatpush.bf16.msra.mxu3 %v4111_v57  ;;  %2019 = vmatpush.bf16.msrb.mxu1 %v4115_v58  ;;  %v3919_v12 = vor.u32 %v4836_v49, %v3916_v20  ;;  %v4824_v57 = vld [vmem:[%s7592_s6 + $0x4] sm:$0xf]  ;;  %v3868_v58 = vld [vmem:[%s7592_s6 + $0x10] sm:$0xf0]  ;;  %v3956_v49 = vld [vmem:[%s7592_s6 + $0xb8] sm:$0xf0] }
 0x113   :  { %2008 = vmatpush.bf16.msrb.mxu0 %v3955_v0  ;;  %1982 = vmatpush.bf16.msra.mxu2 %v3951_v4  ;;  %v4863_v0 = vld [vmem:[%s7592_s6 + $0x134] sm:$0xf0]  ;;  %v3871_v1 = vor.u32 %v4824_v57, %v3868_v58  ;;  %v4015_v4 = vor.u32 %v4860_v61, %v4012_v21  ;;  %v4881_v20 = vld [vmem:[%s7592_s6 + $0x1cc] sm:$0xf]  ;;  %v3895_v58 = vor.u32 %v4829_v47, %v3892_v50  ;;  %v3876_v21 = vld [vmem:[%s7592_s6 + $0x18] sm:$0xf0] }
 0x114   :  { %v4019_v7 = vor.u32 %v4863_v0, %v4018_v63  ;;  %v4103_v24 = vor.u32 %v4881_v20, %v4100_v44  ;;  %v4914_v63 = vld [vmem:[%s7594_s8 + $0xcc] sm:$0xf0]  ;;  %v4170_v44 = vld [vmem:[%s7594_s8 + $0x60] sm:$0xf] }
 0x115   :  { %v4978_v47 = vld [vmem:[%s7594_s8 + $0x2cc] sm:$0xf0] }
 0x116   :  { %1994 = vmatpush.bf16.msra.mxu3 %v4095_v5  ;;  %2020 = vmatpush.bf16.msrb.mxu1 %v4099_v6  ;;  %v4849_v5 = vld [vmem:[%s7592_s6 + $0xcc] sm:$0xf]  ;;  %v3972_v6 = vld [vmem:[%s7592_s6 + $0xd8] sm:$0xf0] }
 0x117   :  { %2009 = vmatpush.bf16.msrb.mxu0 %v3939_v14  ;;  %1983 = vmatpush.bf16.msra.mxu2 %v3935_v17  ;;  %v4116_v14 = vld [vmem:[%s7592_s6 + $0x1f8] sm:$0xf0]  ;;  %v3975_v15 = vor.u32 %v4849_v5, %v3972_v6  ;;  %v4003_v17 = vor.u32 %v4859_v11, %v4002_v10  ;;  %v683_v5 = vperm.slane %v6664_v22, 1  ;;  %v3879_v6 = vor.u32 %v4825_v59, %v3876_v21  ;;  %v4202_v10 = vld [vmem:[%s7594_s8 + $0xa0] sm:$0xf] }
 0x118   :  { %v4910_v11 = vld [vmem:[%s7594_s8 + $0xac] sm:$0xf0]  ;;  %v4458_v59 = vld [vmem:[%s7594_s8 + $0x2a0] sm:$0xf] }
 0x11a   :  { %1995 = vmatpush.bf16.msra.mxu3 %v4079_v18  ;;  %2021 = vmatpush.bf16.msrb.mxu1 %v4083_v19  ;;  %v4119_v18 = vor.u32 %v4885_v13, %v4116_v14  ;;  %v4845_v19 = vld [vmem:[%s7592_s6 + $0xac] sm:$0xf]  ;;  %v4203_v13 = vor.u32 %v4910_v11, %v4202_v10  ;;  %v4186_v14 = vld [vmem:[%s7594_s8 + $0x80] sm:$0xf] }
 0x11b   :  { %2010 = vmatpush.bf16.msrb.mxu0 %v3923_v25  ;;  %1984 = vmatpush.bf16.msra.mxu2 %v3919_v12  ;;  %v3959_v23 = vor.u32 %v4845_v19, %v3956_v49  ;;  %v4841_v25 = vld [vmem:[%s7592_s6 + $0x8c] sm:$0xf] }
 0x11c   :  { %v3943_v30 = vor.u32 %v4841_v25, %v3940_v26  ;;  %v4154_v26 = vld [vmem:[%s7594_s8 + $0x40] sm:$0xf] }
 0x11e   :  { %1996 = vmatpush.bf16.msra.mxu3 %v4063_v28  ;;  %2022 = vmatpush.bf16.msrb.mxu1 %v4067_v29  ;;  %v4877_v28 = vld [vmem:[%s7592_s6 + $0x1ac] sm:$0xf]  ;;  %v4084_v29 = vld [vmem:[%s7592_s6 + $0x1b8] sm:$0xf0] }
 0x11f   :  { %2011 = vmatpush.bf16.msrb.mxu0 %v3907_v35  ;;  %1985 = vmatpush.bf16.msra.mxu2 %v3903_v38  ;;  %v4087_v31 = vor.u32 %v4877_v28, %v4084_v29  ;;  %v4068_v35 = vld [vmem:[%s7592_s6 + $0x198] sm:$0xf0] }
 0x120   :  { %v4071_v38 = vor.u32 %v4873_v34, %v4068_v35  ;;  %v4123_v34 = vor.u32 %v4890_v33, %v4122_v53  ;;  %v4156_v53 = vld [vmem:[%s7594_s8 + $0x50] sm:$0xf0] }
 0x122   :  { %1997 = vmatpush.bf16.msra.mxu3 %v4047_v39  ;;  %2023 = vmatpush.bf16.msrb.mxu1 %v4051_v40  ;;  %v4833_v39 = vld [vmem:[%s7592_s6 + $0x4c] sm:$0xf]  ;;  %v3908_v40 = vld [vmem:[%s7592_s6 + $0x58] sm:$0xf0] }
 0x123   :  { %2012 = vmatpush.bf16.msrb.mxu0 %v3891_v48  ;;  %1986 = vmatpush.bf16.msra.mxu2 %v3887_v52  ;;  %v3911_v46 = vor.u32 %v4833_v39, %v3908_v40  ;;  %v4055_v48 = vor.u32 %v4869_v43, %v4052_v32  ;;  %v4918_v52 = vld [vmem:[%s7594_s8 + $0xec] sm:$0xf0] }
 0x124   :  { %v4235_v57 = vor.u32 %v4918_v52, %v4234_v51  ;;  %v4220_v51 = vld [vmem:[%s7594_s8 + $0xd0] sm:$0xf0]  ;;  %v4362_v52 = vld [vmem:[%s7594_s8 + $0x1e0] sm:$0xf] }
 0x126   :  { %1998 = vmatpush.bf16.msra.mxu3 %v4031_v55  ;;  %2024 = vmatpush.bf16.msrb.mxu1 %v4035_v56  ;;  %v4865_v55 = vld [vmem:[%s7592_s6 + $0x14c] sm:$0xf]  ;;  %v4036_v56 = vld [vmem:[%s7592_s6 + $0x158] sm:$0xf0] }
 0x127   :  { %2013 = vmatpush.bf16.msrb.mxu0 %v3875_v62  ;;  %1987 = vmatpush.bf16.msra.mxu2 %v3871_v1  ;;  %v1339_v12 = vpop.f32.mrf.mxu0  ;;  %v4039_v61 = vor.u32 %v4865_v55, %v4036_v56  ;;  %v4218_v62 = vld [vmem:[%s7594_s8 + $0xc0] sm:$0xf]  ;;  %v4861_v1 = vld [vmem:[%s7592_s6 + $0x12c] sm:$0xf]  ;;  %v4950_v55 = vld [vmem:[%s7594_s8 + $0x1ec] sm:$0xf0] }
 0x128   :  { %v1340_v54 = vadd.f32 %v1339_v12, %v682_v27 }
 0x12a   :  { %1999 = vmatpush.bf16.msra.mxu3 %v4015_v4  ;;  %2025 = vmatpush.bf16.msrb.mxu1 %v4019_v7  ;;  %v4219_v4 = vor.u32 %v4914_v63, %v4218_v62  ;;  %v4204_v63 = vld [vmem:[%s7594_s8 + $0xb0] sm:$0xf0] }
 0x12b   :  { %2032 = vmatpush.bf16.msrb.mxu2 %v3991_v2  ;;  %2014 = vmatmul.bf16.vlgmr.msrb.gmra.mxu0 %v6459_v45  ;;  %v4020_v2 = vld [vmem:[%s7592_s6 + $0x138] sm:$0xf0] }
 0x12c   :  { %1988 = vmatmul.bf16.vlgmr.msra.gmra.mxu2 %v6459_v45  ;;  %2844 = vmatpush.bf16.msra.mxu0 %v4235_v57  ;;  %v4023_v7 = vor.u32 %v4861_v1, %v4020_v2  ;;  %v4346_v1 = vld [vmem:[%s7594_s8 + $0x1c0] sm:$0xf]  ;;  %v4946_v2 = vld [vmem:[%s7594_s8 + $0x1cc] sm:$0xf0] }
 0x12e   :  { %2000 = vmatpush.bf16.msra.mxu3 %v3999_v16  ;;  %2026 = vmatpush.bf16.msrb.mxu1 %v4003_v17  ;;  %v1352_v37 = vpop.f32.mrf.mxu1 }
 0x12f   :  { %2033 = vmatpush.bf16.msrb.mxu2 %v3975_v15  ;;  %v6699_v41 = vadd.f32 %v1352_v37, %v1340_v54  ;;  %v1341_v42 = vpop.f32.mrf.mxu0  ;;  %v4906_v15 = vld [vmem:[%s7594_s8 + $0x8c] sm:$0xf0] }
 0x130   :  { %2845 = vmatpush.bf16.msra.mxu0 %v4219_v4  ;;  %v4187_v19 = vor.u32 %v4906_v15, %v4186_v14  ;;  %v4982_v37 = vld [vmem:[%s7594_s8 + $0x2ec] sm:$0xf0]  ;;  %v4442_v4 = vld [vmem:[%s7594_s8 + $0x280] sm:$0xf] }
 0x131   :  { %2001 = vmatmul.bf16.vlgmr.msra.gmra.mxu3 %v6499_v3  ;;  %2027 = vmatmul.bf16.vlgmr.msrb.gmra.mxu1 %v6499_v3  ;;  %v4942_v14 = vld [vmem:[%s7594_s8 + $0x1ac] sm:$0xf0]  ;;  %v4426_v15 = vld [vmem:[%s7594_s8 + $0x260] sm:$0xf] }
 0x132   :  { %2045 = vmatpush.bf16.msrb.mxu3 %v4119_v18  ;;  %v4007_v18 = vor.u32 %v4857_v8, %v4004_v9  ;;  %v4904_v8 = vld [vmem:[%s7594_s8 + $0x84] sm:$0xf]  ;;  %v4188_v9 = vld [vmem:[%s7594_s8 + $0x90] sm:$0xf0] }
 0x133   :  { %2034 = vmatpush.bf16.msrb.mxu2 %v3959_v23  ;;  %v4902_v23 = vld [vmem:[%s7594_s8 + $0x6c] sm:$0xf0]  ;;  %v4191_v11 = vor.u32 %v4904_v8, %v4188_v9  ;;  %v4250_v8 = vld [vmem:[%s7594_s8 + $0x100] sm:$0xf] }
 0x134   :  { %2846 = vmatpush.bf16.msra.mxu0 %v4203_v13  ;;  %v4330_v13 = vld [vmem:[%s7594_s8 + $0x1a0] sm:$0xf]  ;;  %v4922_v9 = vld [vmem:[%s7594_s8 + $0x10c] sm:$0xf0] }
 0x136   :  { %2046 = vmatpush.bf16.msrb.mxu3 %v4103_v24  ;;  %v1354_v60 = vpop.f32.mrf.mxu1  ;;  %v4171_v24 = vor.u32 %v4902_v23, %v4170_v44  ;;  %v4938_v44 = vld [vmem:[%s7594_s8 + $0x18c] sm:$0xf0] }
 0x137   :  { %2035 = vmatpush.bf16.msrb.mxu2 %v3943_v30  ;;  %v1391_v0 = vpop.f32.mrf.mxu0  ;;  %v4894_v30 = vld [vmem:[%s7594_s8 + $0x2c] sm:$0xf0] }
 0x138   :  { %v1392_v16 = vadd.f32 %v1391_v0, %v683_v5  ;;  %2847 = vmatpush.bf16.msra.mxu0 %v4187_v19  ;;  %v4974_v60 = vld [vmem:[%s7594_s8 + $0x2ac] sm:$0xf0]  ;;  %v4172_v19 = vld [vmem:[%s7594_s8 + $0x70] sm:$0xf0] }
 0x139   :  { %v4459_v62 = vor.u32 %v4974_v60, %v4458_v59  ;;  %v4124_v60 = vld [vmem:[%s7594_s8 + $0x10] sm:$0xf0] }
 0x13a   :  { %2047 = vmatpush.bf16.msrb.mxu3 %v4087_v31 }
 0x13b   :  { %2036 = vmatpush.bf16.msrb.mxu2 %v3927_v36  ;;  %v4490_v36 = vld [vmem:[%s7594_s8 + $0x2e0] sm:$0xf] }
 0x13c   :  { %2848 = vmatpush.bf16.msra.mxu0 %v4171_v24  ;;  %v4491_v40 = vor.u32 %v4982_v37, %v4490_v36  ;;  %v4934_v36 = vld [vmem:[%s7594_s8 + $0x16c] sm:$0xf0] }
 0x13e   :  { %2048 = vmatpush.bf16.msrb.mxu3 %v4071_v38  ;;  %v1404_v17 = vpop.f32.mrf.mxu1  ;;  %v4916_v38 = vld [vmem:[%s7594_s8 + $0xe4] sm:$0xf] }
 0x13f   :  { %2037 = vmatpush.bf16.msrb.mxu2 %v3911_v46  ;;  %v6762_v49 = vadd.f32 %v1404_v17, %v1392_v16  ;;  %v1393_v20 = vpop.f32.mrf.mxu0  ;;  %v4474_v46 = vld [vmem:[%s7594_s8 + $0x2c0] sm:$0xf]  ;;  %v4331_v16 = vor.u32 %v4942_v14, %v4330_v13  ;;  %v4966_v17 = vld [vmem:[%s7594_s8 + $0x26c] sm:$0xf0]  ;;  %v4251_v13 = vor.u32 %v4922_v9, %v4250_v8  ;;  %v4396_v8 = vld [vmem:[%s7594_s8 + $0x230] sm:$0xf0] }
 0x140   :  { %v4475_v50 = vor.u32 %v4978_v47, %v4474_v46  ;;  %v4314_v20 = vld [vmem:[%s7594_s8 + $0x180] sm:$0xf]  ;;  %v4427_v23 = vor.u32 %v4966_v17, %v4426_v15  ;;  %v5014_v15 = vld [vmem:[%s7594_s8 + $0x3ec] sm:$0xf0] }
 0x141   :  { %v4282_v47 = vld [vmem:[%s7594_s8 + $0x140] sm:$0xf] }
 0x142   :  { %2049 = vmatpush.bf16.msrb.mxu3 %v4055_v48  ;;  %v4912_v48 = vld [vmem:[%s7594_s8 + $0xc4] sm:$0xf]  ;;  %v4618_v14 = vld [vmem:[%s7594_s8 + $0x3e0] sm:$0xf] }
 0x143   :  { %2038 = vmatpush.bf16.msrb.mxu2 %v3895_v58  ;;  %v4223_v57 = vor.u32 %v4912_v48, %v4220_v51  ;;  %v4363_v58 = vor.u32 %v4950_v55, %v4362_v52  ;;  %v4930_v48 = vld [vmem:[%s7594_s8 + $0x14c] sm:$0xf0]  ;;  %v4378_v55 = vld [vmem:[%s7594_s8 + $0x200] sm:$0xf]  ;;  %v4619_v17 = vor.u32 %v5014_v15, %v4618_v14  ;;  %v4242_v15 = vld [vmem:[%s7594_s8 + $0xe8] sm:$0xf] }
 0x144   :  { %v4283_v52 = vor.u32 %v4930_v48, %v4282_v47  ;;  %v4316_v48 = vld [vmem:[%s7594_s8 + $0x190] sm:$0xf0] }
 0x145   :  { %2857 = vmatpush.bf16.msra.mxu1 %v4363_v58 }
 0x146   :  { %2050 = vmatpush.bf16.msrb.mxu3 %v4039_v61  ;;  %v1406_v25 = vpop.f32.mrf.mxu1  ;;  %v4908_v61 = vld [vmem:[%s7594_s8 + $0xa4] sm:$0xf] }
 0x147   :  { %2039 = vmatpush.bf16.msrb.mxu2 %v3879_v6  ;;  %v4207_v0 = vor.u32 %v4908_v61, %v4204_v63  ;;  %v4347_v6 = vor.u32 %v4946_v2, %v4346_v1  ;;  %v4980_v61 = vld [vmem:[%s7594_s8 + $0x2e4] sm:$0xf]  ;;  %v4926_v1 = vld [vmem:[%s7594_s8 + $0x12c] sm:$0xf0] }
 0x149   :  { %v6778_v27 = vpop.f32.mrf.mxu0  ;;  %2858 = vmatpush.bf16.msra.mxu1 %v4347_v6 }
 0x14a   :  { %2051 = vmatpush.bf16.msrb.mxu3 %v4023_v7  ;;  %2040 = vmatmul.bf16.vlgmr.msrb.gmra.mxu2 %v6459_v45  ;;  %v4898_v45 = vld [vmem:[%s7594_s8 + $0x4c] sm:$0xf0] }
 0x14b   :  { %v4155_v12 = vor.u32 %v4898_v45, %v4154_v26  ;;  %2870 = vmatpush.bf16.msra.mxu2 %v4491_v40  ;;  %v4970_v7 = vld [vmem:[%s7594_s8 + $0x28c] sm:$0xf0]  ;;  %v4315_v45 = vor.u32 %v4938_v44, %v4314_v20  ;;  %v4972_v20 = vld [vmem:[%s7594_s8 + $0x2a4] sm:$0xf]  ;;  %v4460_v44 = vld [vmem:[%s7594_s8 + $0x2b0] sm:$0xf0] }
 0x14c   :  { %v1365_v28 = vpop.f32.mrf.mxu2  ;;  %v4443_v10 = vor.u32 %v4970_v7, %v4442_v4  ;;  %v4958_v40 = vld [vmem:[%s7594_s8 + $0x22c] sm:$0xf0]  ;;  %v4976_v4 = vld [vmem:[%s7594_s8 + $0x2c4] sm:$0xf] }
 0x14d   :  { %2849 = vmatpush.bf16.msra.mxu0 %v4155_v12  ;;  %v1366_v29 = vadd.f32 %v1365_v28, %v6699_v41  ;;  %v4236_v41 = vld [vmem:[%s7594_s8 + $0xf0] sm:$0xf0]  ;;  %2859 = vmatpush.bf16.msra.mxu1 %v4331_v16  ;;  %v4948_v16 = vld [vmem:[%s7594_s8 + $0x1e4] sm:$0xf] }
 0x14e   :  { %2052 = vmatpush.bf16.msrb.mxu3 %v4007_v18  ;;  %v6793_v54 = vpop.f32.mrf.mxu1  ;;  %v4239_v32 = vor.u32 %v4916_v38, %v4236_v41  ;;  %v4900_v18 = vld [vmem:[%s7594_s8 + $0x64] sm:$0xf] }
 0x14f   :  { %2871 = vmatpush.bf16.msra.mxu2 %v4475_v50  ;;  %v4175_v25 = vor.u32 %v4900_v18, %v4172_v19  ;;  %v4892_v41 = vld [vmem:[%s7594_s8 + $0x24] sm:$0xf]  ;;  %v4364_v18 = vld [vmem:[%s7594_s8 + $0x1f0] sm:$0xf0] }
 0x150   :  { %v4367_v19 = vor.u32 %v4948_v16, %v4364_v18  ;;  %v4284_v16 = vld [vmem:[%s7594_s8 + $0x150] sm:$0xf0] }
 0x151   :  { %2053 = vmatmul.bf16.vlgmr.msrb.gmra.mxu3 %v6499_v3  ;;  %v4138_v3 = vld [vmem:[%s7594_s8 + $0x20] sm:$0xf]  ;;  %v1445_v35 = vpop.f32.mrf.mxu0  ;;  %2860 = vmatpush.bf16.msra.mxu1 %v4315_v45 }
 0x152   :  { %v4139_v31 = vor.u32 %v4894_v30, %v4138_v3  ;;  %v4962_v3 = vld [vmem:[%s7594_s8 + $0x24c] sm:$0xf0]  ;;  %v4298_v35 = vld [vmem:[%s7594_s8 + $0x160] sm:$0xf]  ;;  %2883 = vmatpush.bf16.msra.mxu3 %v4619_v17 }
 0x153   :  { %2872 = vmatpush.bf16.msra.mxu2 %v4459_v62  ;;  %v4299_v38 = vor.u32 %v4934_v36, %v4298_v35  ;;  %v4332_v36 = vld [vmem:[%s7594_s8 + $0x1b0] sm:$0xf0] }
 0x154   :  { %2850 = vmatpush.bf16.msra.mxu0 %v4139_v31  ;;  %v1378_v39 = vpop.f32.mrf.mxu3  ;;  %v1367_v43 = vpop.f32.mrf.mxu2 }
 0x155   :  { %v6807_v42 = vadd.f32 %v1378_v39, %v1366_v29  ;;  %v4410_v29 = vld [vmem:[%s7594_s8 + $0x240] sm:$0xf]  ;;  %2861 = vmatpush.bf16.msra.mxu1 %v4299_v38  ;;  %v4964_v38 = vld [vmem:[%s7594_s8 + $0x264] sm:$0xf] }
 0x156   :  { %v1458_v56 = vpop.f32.mrf.mxu1  ;;  %v4411_v31 = vor.u32 %v4962_v3, %v4410_v29  ;;  %v4394_v39 = vld [vmem:[%s7594_s8 + $0x220] sm:$0xf]  ;;  %v4444_v29 = vld [vmem:[%s7594_s8 + $0x290] sm:$0xf0] }
 0x157   :  { %2873 = vmatpush.bf16.msra.mxu2 %v4443_v10  ;;  %v4954_v56 = vld [vmem:[%s7594_s8 + $0x20c] sm:$0xf0] }
 0x158   :  { %2851 = vmatpush.bf16.msra.mxu0 %v4123_v34  ;;  %v4379_v59 = vor.u32 %v4954_v56, %v4378_v55  ;;  %v684_v55 = vperm.slane %v6664_v22, 2 }
 0x159   :  { %2862 = vmatpush.bf16.msra.mxu1 %v4283_v52  ;;  %v4960_v52 = vld [vmem:[%s7594_s8 + $0x244] sm:$0xf] }
 0x15b   :  { %2874 = vmatpush.bf16.msra.mxu2 %v4427_v23  ;;  %v4463_v23 = vor.u32 %v4972_v20, %v4460_v44  ;;  %v4919_v20 = vld [vmem:[%s7594_s8 + $0xf4] sm:$0xf0] }
 0x15c   :  { %2896 = vmatpush.bf16.msrb.mxu0 %v4239_v32  ;;  %v1380_v21 = vpop.f32.mrf.mxu3  ;;  %v1417_v5 = vpop.f32.mrf.mxu2  ;;  %v4395_v32 = vor.u32 %v4958_v40, %v4394_v39  ;;  %v4428_v39 = vld [vmem:[%s7594_s8 + $0x270] sm:$0xf0] }
 0x15d   :  { %v1418_v24 = vadd.f32 %v1417_v5, %v6762_v49  ;;  %v4896_v49 = vld [vmem:[%s7594_s8 + $0x44] sm:$0xf]  ;;  %v4492_v21 = vld [vmem:[%s7594_s8 + $0x2f0] sm:$0xf0] }
 0x15e   :  { %v4159_v34 = vor.u32 %v4896_v49, %v4156_v53  ;;  %v4495_v63 = vor.u32 %v4980_v61, %v4492_v21  ;;  %v4476_v5 = vld [vmem:[%s7594_s8 + $0x2d0] sm:$0xf0]  ;;  %v5006_v53 = vld [vmem:[%s7594_s8 + $0x3ac] sm:$0xf0]  ;;  %v4554_v61 = vld [vmem:[%s7594_s8 + $0x360] sm:$0xf] }
 0x15f   :  { %2875 = vmatpush.bf16.msra.mxu2 %v4411_v31  ;;  %v4479_v7 = vor.u32 %v4976_v4, %v4476_v5  ;;  %v4586_v31 = vld [vmem:[%s7594_s8 + $0x3a0] sm:$0xf]  ;;  %v4998_v21 = vld [vmem:[%s7594_s8 + $0x36c] sm:$0xf0] }
 0x160   :  { %2897 = vmatpush.bf16.msrb.mxu0 %v4223_v57  ;;  %v4888_v57 = vld [vmem:[%s7594_s8 + $0x4] sm:$0xf]  ;;  %v4587_v35 = vor.u32 %v5006_v53, %v4586_v31  ;;  %v4268_v53 = vld [vmem:[%s7594_s8 + $0x130] sm:$0xf0] }
 0x161   :  { %v4127_v62 = vor.u32 %v4888_v57, %v4124_v60  ;;  %v4924_v31 = vld [vmem:[%s7594_s8 + $0x124] sm:$0xf] }
 0x163   :  { %2876 = vmatpush.bf16.msra.mxu2 %v4395_v32  ;;  %v4570_v32 = vld [vmem:[%s7594_s8 + $0x380] sm:$0xf] }
 0x164   :  { %2898 = vmatpush.bf16.msrb.mxu0 %v4207_v0  ;;  %v1430_v26 = vpop.f32.mrf.mxu3  ;;  %v1419_v28 = vpop.f32.mrf.mxu2  ;;  %v4266_v0 = vld [vmem:[%s7594_s8 + $0x120] sm:$0xf] }
 0x165   :  { %v1431_v12 = vadd.f32 %v1430_v26, %v1418_v24  ;;  %v4267_v2 = vor.u32 %v4926_v1, %v4266_v0  ;;  %v4602_v24 = vld [vmem:[%s7594_s8 + $0x3c0] sm:$0xf]  ;;  %v4944_v26 = vld [vmem:[%s7594_s8 + $0x1c4] sm:$0xf]  ;;  %v4300_v0 = vld [vmem:[%s7594_s8 + $0x170] sm:$0xf0]  ;;  %v1444_v1 = vadd.f32 %v6778_v27, %v684_v55 }
 0x166   :  { %v4968_v28 = vld [vmem:[%s7594_s8 + $0x284] sm:$0xf]  ;;  %v4538_v27 = vld [vmem:[%s7594_s8 + $0x340] sm:$0xf] }
 0x167   :  { %v1542_v30 = vrot.slane %v1431_v12, 6  ;;  %2877 = vmatpush.bf16.msra.mxu2 %v4379_v59  ;;  %2863 = vmatpush.bf16.msra.mxu1 %v4267_v2  ;;  %v4348_v12 = vld [vmem:[%s7594_s8 + $0x1d0] sm:$0xf0]  ;;  %v4447_v49 = vor.u32 %v4968_v28, %v4444_v29  ;;  %v685_v2 = vperm.slane %v6664_v22, 3  ;;  %v4994_v22 = vld [vmem:[%s7594_s8 + $0x34c] sm:$0xf0] }
 0x168   :  { %2899 = vmatpush.bf16.msrb.mxu0 %v4191_v11  ;;  %v4351_v3 = vor.u32 %v4944_v26, %v4348_v12  ;;  %v4243_v12 = vor.u32 %v4919_v20, %v4242_v15  ;;  %v4226_v28 = vld [vmem:[%s7594_s8 + $0xc8] sm:$0xf]  ;;  %v4522_v29 = vld [vmem:[%s7594_s8 + $0x320] sm:$0xf]  ;;  %v4920_v55 = vld [vmem:[%s7594_s8 + $0x104] sm:$0xf] }
 0x169   :  { %v6894_v33 = vpop.f32.mrf.mxu0  ;;  %v6904_v37 = vsel %vm1545_vm0, %v6807_v42, %v1542_v30  ;;  %v4140_v42 = vld [vmem:[%s7594_s8 + $0x30] sm:$0xf0]  ;;  %v4895_v20 = vld [vmem:[%s7594_s8 + $0x34] sm:$0xf0] }
 0x16a   :  { %v4143_v46 = vor.u32 %v4892_v41, %v4140_v42  ;;  %v4431_v41 = vor.u32 %v4964_v38, %v4428_v39  ;;  %v5002_v42 = vld [vmem:[%s7594_s8 + $0x38c] sm:$0xf0]  ;;  %v1496_v17 = vadd.f32 %v6894_v33, %v685_v2  ;;  %v4210_v39 = vld [vmem:[%s7594_s8 + $0xa8] sm:$0xf]  ;;  %v4604_v2 = vld [vmem:[%s7594_s8 + $0x3d0] sm:$0xf0] }
 0x16b   :  { %2922 = vmatpush.bf16.msrb.mxu2 %v4495_v63  ;;  %2864 = vmatpush.bf16.msra.mxu1 %v4251_v13  ;;  %v4571_v47 = vor.u32 %v5002_v42, %v4570_v32  ;;  %v4555_v63 = vor.u32 %v4998_v21, %v4554_v61  ;;  %v4911_v32 = vld [vmem:[%s7594_s8 + $0xb4] sm:$0xf0]  ;;  %v4572_v15 = vld [vmem:[%s7594_s8 + $0x390] sm:$0xf0] }
 0x16c   :  { %2900 = vmatpush.bf16.msrb.mxu0 %v4175_v25  ;;  %v1432_v43 = vpop.f32.mrf.mxu3  ;;  %v5010_v25 = vld [vmem:[%s7594_s8 + $0x3cc] sm:$0xf0]  ;;  %v4211_v21 = vor.u32 %v4911_v32, %v4210_v39  ;;  %v4524_v32 = vld [vmem:[%s7594_s8 + $0x330] sm:$0xf0] }
 0x16d   :  { %v4603_v45 = vor.u32 %v5010_v25, %v4602_v24  ;;  %v7023_v43 = vld [vmem:[%s7593_s7] sm:$0xf]  ;;  %v4380_v24 = vld [vmem:[%s7594_s8 + $0x210] sm:$0xf0] }
 0x16e   :  { %v6924_v50 = vpop.f32.mrf.mxu1  ;;  %v1620_v56 = vperm.slane %v7023_v43, 0 }
 0x16f   :  { %v6926_v51 = vpop.f32.mrf.mxu2  ;;  %2923 = vmatpush.bf16.msrb.mxu2 %v4479_v7  ;;  %2909 = vmatpush.bf16.msrb.mxu1 %v4367_v19  ;;  %v4956_v7 = vld [vmem:[%s7594_s8 + $0x224] sm:$0xf]  ;;  %v1509_v33 = vadd.f32 %v6924_v50, %v1496_v17 }
 0x170   :  { %2901 = vmatpush.bf16.msrb.mxu0 %v4159_v34  ;;  %2884 = vmatpush.bf16.msra.mxu3 %v4603_v45  ;;  %v4940_v34 = vld [vmem:[%s7594_s8 + $0x1a4] sm:$0xf]  ;;  %v4399_v9 = vor.u32 %v4956_v7, %v4396_v8  ;;  %v4903_v8 = vld [vmem:[%s7594_s8 + $0x74] sm:$0xf0] }
 0x171   :  { %v1497_v58 = vpop.f32.mrf.mxu0  ;;  %v4335_v40 = vor.u32 %v4940_v34, %v4332_v36 }
 0x172   :  { %v4412_v58 = vld [vmem:[%s7594_s8 + $0x250] sm:$0xf0] }
 0x173   :  { %2924 = vmatpush.bf16.msrb.mxu2 %v4463_v23  ;;  %2910 = vmatpush.bf16.msrb.mxu1 %v4351_v3  ;;  %v4415_v60 = vor.u32 %v4960_v52, %v4412_v58  ;;  %v4952_v23 = vld [vmem:[%s7594_s8 + $0x204] sm:$0xf]  ;;  %v4990_v3 = vld [vmem:[%s7594_s8 + $0x32c] sm:$0xf0] }
 0x174   :  { %2902 = vmatpush.bf16.msrb.mxu0 %v4143_v46  ;;  %v6958_v6 = vpop.f32.mrf.mxu3  ;;  %2885 = vmatpush.bf16.msra.mxu3 %v4587_v35  ;;  %v4936_v46 = vld [vmem:[%s7594_s8 + $0x184] sm:$0xf]  ;;  %v4383_v26 = vor.u32 %v4952_v23, %v4380_v24  ;;  %v4271_v35 = vor.u32 %v4924_v31, %v4268_v53  ;;  %v4556_v23 = vld [vmem:[%s7594_s8 + $0x370] sm:$0xf0]  ;;  %v4498_v53 = vld [vmem:[%s7594_s8 + $0x2e8] sm:$0xf] }
 0x175   :  { %v4319_v57 = vor.u32 %v4936_v46, %v4316_v48  ;;  %v4506_v46 = vld [vmem:[%s7594_s8 + $0x300] sm:$0xf]  ;;  %v5012_v58 = vld [vmem:[%s7594_s8 + $0x3e4] sm:$0xf] }
 0x176   :  { %v1510_v10 = vpop.f32.mrf.mxu1 }
 0x177   :  { %v1471_v11 = vpop.f32.mrf.mxu2  ;;  %2925 = vmatpush.bf16.msrb.mxu2 %v4447_v49  ;;  %2911 = vmatpush.bf16.msrb.mxu1 %v4335_v40  ;;  %v1457_v10 = vadd.f32 %v6793_v54, %v1444_v1  ;;  %v4539_v54 = vor.u32 %v4994_v22, %v4538_v27  ;;  %v5008_v1 = vld [vmem:[%s7594_s8 + $0x3c4] sm:$0xf] }
 0x178   :  { %2903 = vmatpush.bf16.msrb.mxu0 %v4127_v62  ;;  %2886 = vmatpush.bf16.msra.mxu3 %v4571_v47  ;;  %v4932_v62 = vld [vmem:[%s7594_s8 + $0x164] sm:$0xf]  ;;  %v4986_v47 = vld [vmem:[%s7594_s8 + $0x30c] sm:$0xf0] }
 0x179   :  { %v4303_v5 = vor.u32 %v4932_v62, %v4300_v0  ;;  %v4928_v11 = vld [vmem:[%s7594_s8 + $0x144] sm:$0xf]  ;;  %v1470_v18 = vadd.f32 %v6926_v51, %v1457_v10  ;;  %v4507_v52 = vor.u32 %v4986_v47, %v4506_v46  ;;  %v4194_v62 = vld [vmem:[%s7594_s8 + $0x88] sm:$0xf]  ;;  %v4907_v0 = vld [vmem:[%s7594_s8 + $0x94] sm:$0xf0] }
 0x17a   :  { %v4287_v44 = vor.u32 %v4928_v11, %v4284_v16  ;;  %v4195_v7 = vor.u32 %v4907_v0, %v4194_v62  ;;  %v4588_v10 = vld [vmem:[%s7594_s8 + $0x3b0] sm:$0xf0]  ;;  %v4162_v11 = vld [vmem:[%s7594_s8 + $0x48] sm:$0xf]  ;;  %v1622_v16 = vperm.slane %v7023_v43, 2 }
 0x17b   :  { %2926 = vmatpush.bf16.msrb.mxu2 %v4431_v41  ;;  %2912 = vmatpush.bf16.msrb.mxu1 %v4319_v57  ;;  %v1483_v51 = vadd.f32 %v6958_v6, %v1470_v18  ;;  %v4915_v6 = vld [vmem:[%s7594_s8 + $0xd4] sm:$0xf0]  ;;  %v4913_v46 = vld [vmem:[%s7594_s8 + $0xcc] sm:$0xf]  ;;  %v4228_v47 = vld [vmem:[%s7594_s8 + $0xd8] sm:$0xf0] }
 0x17c   :  { %v1484_v30 = vpop.f32.mrf.mxu3  ;;  %2887 = vmatpush.bf16.msra.mxu3 %v4555_v63  ;;  %v4227_v41 = vor.u32 %v4915_v6, %v4226_v28  ;;  %v4540_v28 = vld [vmem:[%s7594_s8 + $0x350] sm:$0xf0]  ;;  %v4244_v6 = vld [vmem:[%s7594_s8 + $0xf8] sm:$0xf0] }
 0x17d   :  { %v4523_v30 = vor.u32 %v4990_v3, %v4522_v29  ;;  %v1543_v36 = vrot.slane %v1483_v51, 4  ;;  %v4130_v51 = vld [vmem:[%s7594_s8 + $0x8] sm:$0xf]  ;;  %v4508_v62 = vld [vmem:[%s7594_s8 + $0x310] sm:$0xf0] }
 0x17f   :  { %2927 = vmatpush.bf16.msrb.mxu2 %v4415_v60  ;;  %2913 = vmatpush.bf16.msrb.mxu1 %v4303_v5  ;;  %v4607_v5 = vor.u32 %v5008_v1, %v4604_v2  ;;  %v4909_v1 = vld [vmem:[%s7594_s8 + $0xac] sm:$0xf]  ;;  %v4212_v2 = vld [vmem:[%s7594_s8 + $0xb8] sm:$0xf0] }
 0x180   :  { %2888 = vmatpush.bf16.msra.mxu3 %v4539_v54 }
 0x183   :  { %2928 = vmatpush.bf16.msrb.mxu2 %v4399_v9  ;;  %2914 = vmatpush.bf16.msrb.mxu1 %v4287_v44  ;;  %v5004_v9 = vld [vmem:[%s7594_s8 + $0x3a4] sm:$0xf] }
 0x184   :  { %2889 = vmatpush.bf16.msra.mxu3 %v4523_v30  ;;  %v4591_v27 = vor.u32 %v5004_v9, %v4588_v10  ;;  %v4996_v44 = vld [vmem:[%s7594_s8 + $0x364] sm:$0xf] }
 0x185   :  { %v4559_v24 = vor.u32 %v4996_v44, %v4556_v23 }
 0x187   :  { %2929 = vmatpush.bf16.msrb.mxu2 %v4383_v26  ;;  %2915 = vmatpush.bf16.msrb.mxu1 %v4271_v35 }
 0x188   :  { %2890 = vmatpush.bf16.msra.mxu3 %v4507_v52 }
 0x189   :  { %v1963_v59 = vpop.f32.mrf.mxu0 }
 0x18a   :  { %v1964_v4 = vadd.f32 %v1963_v59, %v1620_v56  ;;  %v4252_v56 = vld [vmem:[%s7594_s8 + $0x110] sm:$0xf0] }
 0x18b   :  { %v4255_v57 = vor.u32 %v4920_v55, %v4252_v56  ;;  %v4620_v59 = vld [vmem:[%s7594_s8 + $0x3f0] sm:$0xf0]  ;;  %v4482_v56 = vld [vmem:[%s7594_s8 + $0x2c8] sm:$0xf] }
 0x18c   :  { %v4623_v60 = vor.u32 %v5012_v58, %v4620_v59  ;;  %v4370_v59 = vld [vmem:[%s7594_s8 + $0x1e8] sm:$0xf] }
 0x18d   :  { %2916 = vmatpush.bf16.msrb.mxu1 %v4255_v57  ;;  %v4979_v57 = vld [vmem:[%s7594_s8 + $0x2d4] sm:$0xf0] }
 0x18e   :  { %v1976_v14 = vpop.f32.mrf.mxu1  ;;  %2935 = vmatpush.bf16.msrb.mxu3 %v4623_v60  ;;  %v4951_v60 = vld [vmem:[%s7594_s8 + $0x1f4] sm:$0xf0]  ;;  %v4483_v0 = vor.u32 %v4979_v57, %v4482_v56  ;;  %v4889_v56 = vld [vmem:[%s7594_s8 + $0xc] sm:$0xf]  ;;  %v4132_v57 = vld [vmem:[%s7594_s8 + $0x18] sm:$0xf0] }
 0x18f   :  { %v1521_v13 = vpop.f32.mrf.mxu2  ;;  %v1977_v19 = vadd.f32 %v1976_v14, %v1964_v4  ;;  %v5000_v14 = vld [vmem:[%s7594_s8 + $0x384] sm:$0xf] }
 0x190   :  { %v1522_v49 = vadd.f32 %v1521_v13, %v1509_v33  ;;  %v4899_v13 = vld [vmem:[%s7594_s8 + $0x54] sm:$0xf0]  ;;  %v4575_v54 = vor.u32 %v5000_v14, %v4572_v15  ;;  %v1621_v33 = vperm.slane %v7023_v43, 1  ;;  %v4905_v14 = vld [vmem:[%s7594_s8 + $0x8c] sm:$0xf] }
 0x191   :  { %v1965_v25 = vpop.f32.mrf.mxu0  ;;  %v2058_v45 = vmax.f32 %v1977_v19, 0.0  ;;  %v4163_v18 = vor.u32 %v4899_v13, %v4162_v11  ;;  %v4146_v19 = vld [vmem:[%s7594_s8 + $0x28] sm:$0xf]  ;;  %v4215_v11 = vor.u32 %v4909_v1, %v4212_v2  ;;  %v4196_v15 = vld [vmem:[%s7594_s8 + $0x98] sm:$0xf0]  ;;  %v4135_v1 = vor.u32 %v4889_v56, %v4132_v57 }
 0x192   :  { %2936 = vmatpush.bf16.msrb.mxu3 %v4607_v5  ;;  %v4147_v26 = vor.u32 %v4895_v20, %v4146_v19  ;;  %v4338_v19 = vld [vmem:[%s7594_s8 + $0x1a8] sm:$0xf]  ;;  %v4943_v20 = vld [vmem:[%s7594_s8 + $0x1b4] sm:$0xf0]  ;;  %v4199_v44 = vor.u32 %v4905_v14, %v4196_v15  ;;  %v4933_v56 = vld [vmem:[%s7594_s8 + $0x16c] sm:$0xf] }
 0x193   :  { %v7103_v50 = vpack.c.bf16 %v2058_v45, %v2058_v45  ;;  %v4891_v45 = vld [vmem:[%s7594_s8 + $0x14] sm:$0xf0]  ;;  %v4626_v14 = vld [vmem:[%s7594_s8 + $0x3e8] sm:$0xf]  ;;  %v4308_v57 = vld [vmem:[%s7594_s8 + $0x178] sm:$0xf0] }
 0x194   :  { %v1534_v34 = vpop.f32.mrf.mxu3  ;;  %v5015_v15 = vld [vmem:[%s7594_s8 + $0x3f4] sm:$0xf0] }
 0x195   :  { %v1535_v38 = vadd.f32 %v1534_v34, %v1522_v49  ;;  %2852 = vmatmul.bf16.vlgmr.msra.gmra.mxu0 %v7103_v50  ;;  %v4917_v49 = vld [vmem:[%s7594_s8 + $0xec] sm:$0xf]  ;;  %v4983_v34 = vld [vmem:[%s7594_s8 + $0x2f4] sm:$0xf0] }
 0x196   :  { %2948 = vmatpush.bf16.msra.mxu0 %v4243_v12  ;;  %v1978_v42 = vpop.f32.mrf.mxu1  ;;  %2937 = vmatpush.bf16.msrb.mxu3 %v4591_v27  ;;  %v4992_v12 = vld [vmem:[%s7594_s8 + $0x344] sm:$0xf]  ;;  %v4354_v27 = vld [vmem:[%s7594_s8 + $0x1c8] sm:$0xf] }
 0x197   :  { %v1523_v40 = vpop.f32.mrf.mxu2  ;;  %v1544_v48 = vrot.slane %v1535_v38, 2  ;;  %v4543_v30 = vor.u32 %v4992_v12, %v4540_v28  ;;  %v4131_v38 = vor.u32 %v4891_v45, %v4130_v51  ;;  %v4499_v42 = vor.u32 %v4983_v34, %v4498_v53  ;;  %v4967_v51 = vld [vmem:[%s7594_s8 + $0x274] sm:$0xf0]  ;;  %v4322_v45 = vld [vmem:[%s7594_s8 + $0x188] sm:$0xf] }
 0x198   :  { %v4247_v40 = vor.u32 %v4917_v49, %v4244_v6  ;;  %v4939_v12 = vld [vmem:[%s7594_s8 + $0x194] sm:$0xf0]  ;;  %v4164_v49 = vld [vmem:[%s7594_s8 + $0x58] sm:$0xf0]  ;;  %v4306_v53 = vld [vmem:[%s7594_s8 + $0x168] sm:$0xf] }
 0x199   :  { %v1548_v61 = vsel %vm1547_vm1, %v1543_v36, %v1544_v48  ;;  %v4323_v6 = vor.u32 %v4939_v12, %v4322_v45  ;;  %v4935_v34 = vld [vmem:[%s7594_s8 + $0x174] sm:$0xf0] }
 0x19a   :  { %2949 = vmatpush.bf16.msra.mxu0 %v4227_v41  ;;  %v1550_v63 = vsel %vm1549_vm2, %v6904_v37, %v1548_v61  ;;  %v4178_v37 = vld [vmem:[%s7594_s8 + $0x68] sm:$0xf]  ;;  %2938 = vmatpush.bf16.msrb.mxu3 %v4575_v54  ;;  %v4988_v41 = vld [vmem:[%s7594_s8 + $0x324] sm:$0xf]  ;;  %v4231_v61 = vor.u32 %v4913_v46, %v4228_v47  ;;  %v4931_v46 = vld [vmem:[%s7594_s8 + $0x154] sm:$0xf0] }
 0x19b   :  { %1552 = vst [vmem:[#allocation2] sm:$0xff] %v1550_v63  ;;  %v4179_v22 = vor.u32 %v4903_v8, %v4178_v37  ;;  %v4527_v48 = vor.u32 %v4988_v41, %v4524_v32  ;;  %v4466_v37 = vld [vmem:[%s7594_s8 + $0x2a8] sm:$0xf]  ;;  %v4975_v8 = vld [vmem:[%s7594_s8 + $0x2b4] sm:$0xf0]  ;;  %v1623_v47 = vperm.slane %v7023_v43, 3 }
 0x19c   :  { %v1536_v4 = vpop.f32.mrf.mxu3  ;;  %v4467_v13 = vor.u32 %v4975_v8, %v4466_v37  ;;  %v4402_v41 = vld [vmem:[%s7594_s8 + $0x228] sm:$0xf]  ;;  %v4959_v32 = vld [vmem:[%s7594_s8 + $0x234] sm:$0xf0]  ;;  %v4484_v8 = vld [vmem:[%s7594_s8 + $0x2d8] sm:$0xf0] }
 0x19d   :  { %v4386_v43 = vld [vmem:[%s7594_s8 + $0x208] sm:$0xf]  ;;  %3074 = dma.vmem_to_hbm [thread:$0]  %s3070_s17, 128, %s3072_s5, [#allocation3]  }
 0x19e   :  { %2950 = vmatpush.bf16.msra.mxu0 %v4211_v21  ;;  %2939 = vmatpush.bf16.msrb.mxu3 %v4559_v24  ;;  %v4984_v21 = vld [vmem:[%s7594_s8 + $0x304] sm:$0xf]  ;;  %v4901_v24 = vld [vmem:[%s7594_s8 + $0x6c] sm:$0xf] }
 0x19f   :  { %v4511_v9 = vor.u32 %v4984_v21, %v4508_v62  ;;  %v4500_v21 = vld [vmem:[%s7594_s8 + $0x2f8] sm:$0xf0]  ;;  %v4274_v62 = vld [vmem:[%s7594_s8 + $0x128] sm:$0xf] }
 0x1a2   :  { %2951 = vmatpush.bf16.msra.mxu0 %v4195_v7  ;;  %2940 = vmatpush.bf16.msrb.mxu3 %v4543_v30  ;;  %v4371_v7 = vor.u32 %v4951_v60, %v4370_v59  ;;  %v4418_v30 = vld [vmem:[%s7594_s8 + $0x248] sm:$0xf]  ;;  %v4955_v60 = vld [vmem:[%s7594_s8 + $0x214] sm:$0xf0] }
 0x1a3   :  { %v4387_v2 = vor.u32 %v4955_v60, %v4386_v43  ;;  %v4311_v60 = vor.u32 %v4933_v56, %v4308_v57 }
 0x1a5   :  { %2904 = vmatmul.bf16.vlgmr.msrb.gmra.mxu0 %v7103_v50 }
 0x1a6   :  { %2952 = vmatpush.bf16.msra.mxu0 %v4179_v22  ;;  %2941 = vmatpush.bf16.msrb.mxu3 %v4527_v48  ;;  %v4947_v22 = vld [vmem:[%s7594_s8 + $0x1d4] sm:$0xf0] }
 0x1a7   :  { %v4355_v54 = vor.u32 %v4947_v22, %v4354_v27  ;;  %v4923_v27 = vld [vmem:[%s7594_s8 + $0x114] sm:$0xf0] }
 0x1a8   :  { %v2015_v17 = vpop.f32.mrf.mxu0 }
 0x1a9   :  { %v2016_v25 = vadd.f32 %v2015_v17, %v1622_v16  ;;  %v4450_v17 = vld [vmem:[%s7594_s8 + $0x288] sm:$0xf] }
 0x1aa   :  { %2953 = vmatpush.bf16.msra.mxu0 %v4163_v18  ;;  %v4971_v18 = vld [vmem:[%s7594_s8 + $0x294] sm:$0xf0]  ;;  %2942 = vmatpush.bf16.msrb.mxu3 %v4511_v9  ;;  %v4258_v9 = vld [vmem:[%s7594_s8 + $0x108] sm:$0xf] }
 0x1ab   :  { %v4451_v23 = vor.u32 %v4971_v18, %v4450_v17  ;;  %v4259_v18 = vor.u32 %v4923_v27, %v4258_v9  ;;  %v4925_v9 = vld [vmem:[%s7594_s8 + $0x12c] sm:$0xf]  ;;  %v4276_v27 = vld [vmem:[%s7594_s8 + $0x138] sm:$0xf0] }
 0x1ae   :  { %v2028_v29 = vpop.f32.mrf.mxu1  ;;  %2954 = vmatpush.bf16.msra.mxu0 %v4147_v26  ;;  %v4339_v26 = vor.u32 %v4943_v20, %v4338_v19  ;;  %v4973_v20 = vld [vmem:[%s7594_s8 + $0x2ac] sm:$0xf] }
 0x1af   :  { %v1989_v3 = vpop.f32.mrf.mxu2  ;;  %v2029_v31 = vadd.f32 %v2028_v29, %v2016_v25  ;;  %v4180_v25 = vld [vmem:[%s7594_s8 + $0x78] sm:$0xf0] }
 0x1b0   :  { %v2017_v35 = vpop.f32.mrf.mxu0  ;;  %v1990_v36 = vadd.f32 %v1989_v3, %v1621_v33  ;;  %v4434_v33 = vld [vmem:[%s7594_s8 + $0x268] sm:$0xf]  ;;  %v4183_v28 = vor.u32 %v4901_v24, %v4180_v25  ;;  %v4897_v3 = vld [vmem:[%s7594_s8 + $0x4c] sm:$0xf]  ;;  %v4627_v24 = vor.u32 %v5015_v15, %v4626_v14  ;;  %v4279_v14 = vor.u32 %v4925_v9, %v4276_v27 }
 0x1b1   :  { %v2060_v39 = vmax.f32 %v2029_v31, 0.0  ;;  %v4435_v29 = vor.u32 %v4967_v51, %v4434_v33  ;;  %v4963_v31 = vld [vmem:[%s7594_s8 + $0x254] sm:$0xf0]  ;;  %v4167_v35 = vor.u32 %v4897_v3, %v4164_v49  ;;  %v4945_v25 = vld [vmem:[%s7594_s8 + $0x1cc] sm:$0xf] }
 0x1b2   :  { %2955 = vmatpush.bf16.msra.mxu0 %v4131_v38  ;;  %v4893_v38 = vld [vmem:[%s7594_s8 + $0x2c] sm:$0xf]  ;;  %v5011_v33 = vld [vmem:[%s7594_s8 + $0x3d4] sm:$0xf0] }
 0x1b3   :  { %v7229_v52 = vpack.c.bf16 %v2060_v39, %v2060_v39  ;;  %v4148_v39 = vld [vmem:[%s7594_s8 + $0x38] sm:$0xf0]  ;;  %v4941_v49 = vld [vmem:[%s7594_s8 + $0x1ac] sm:$0xf] }
 0x1b4   :  { %v2002_v55 = vpop.f32.mrf.mxu3  ;;  %v4151_v48 = vor.u32 %v4893_v38, %v4148_v39  ;;  %v4937_v39 = vld [vmem:[%s7594_s8 + $0x18c] sm:$0xf] }
 0x1b5   :  { %v2003_v58 = vadd.f32 %v2002_v55, %v1990_v36  ;;  %2878 = vmatmul.bf16.vlgmr.msra.gmra.mxu2 %v7229_v52  ;;  %2956 = vmatmul.bf16.vlgmr.msra.gmra.mxu0 %v7103_v50  ;;  %v4419_v36 = vor.u32 %v4963_v31, %v4418_v30  ;;  %v4403_v55 = vor.u32 %v4959_v32, %v4402_v41  ;;  %v4594_v30 = vld [vmem:[%s7594_s8 + $0x3a8] sm:$0xf]  ;;  %v5007_v31 = vld [vmem:[%s7594_s8 + $0x3b4] sm:$0xf0] }
 0x1b6   :  { %3000 = vmatpush.bf16.msrb.mxu0 %v4247_v40  ;;  %2974 = vmatpush.bf16.msra.mxu2 %v4499_v42  ;;  %v2030_v5 = vpop.f32.mrf.mxu1  ;;  %v4307_v40 = vor.u32 %v4935_v34, %v4306_v53  ;;  %v4290_v42 = vld [vmem:[%s7594_s8 + $0x148] sm:$0xf]  ;;  %v4595_v38 = vor.u32 %v5007_v31, %v4594_v30  ;;  %v5003_v32 = vld [vmem:[%s7594_s8 + $0x394] sm:$0xf0]  ;;  %v4548_v30 = vld [vmem:[%s7594_s8 + $0x358] sm:$0xf0] }
 0x1b7   :  { %v2059_v63 = vmax.f32 %v2003_v58, 0.0  ;;  %v1991_v4 = vpop.f32.mrf.mxu2  ;;  %v4291_v59 = vor.u32 %v4931_v46, %v4290_v42  ;;  %v4578_v41 = vld [vmem:[%s7594_s8 + $0x388] sm:$0xf] }
 0x1b9   :  { %v7263_v10 = vpack.c.bf16 %v2059_v63, %v2059_v63  ;;  %v4927_v63 = vld [vmem:[%s7594_s8 + $0x134] sm:$0xf0] }
 0x1ba   :  { %3001 = vmatpush.bf16.msrb.mxu0 %v4231_v61  ;;  %2975 = vmatpush.bf16.msra.mxu2 %v4483_v0  ;;  %v4981_v61 = vld [vmem:[%s7594_s8 + $0x2ec] sm:$0xf]  ;;  %v4275_v5 = vor.u32 %v4927_v63, %v4274_v62 }
 0x1bb   :  { %2865 = vmatmul.bf16.vlgmr.msra.gmra.mxu1 %v7263_v10  ;;  %v4503_v4 = vor.u32 %v4981_v61, %v4500_v21  ;;  %v4957_v61 = vld [vmem:[%s7594_s8 + $0x22c] sm:$0xf]  ;;  %v4404_v21 = vld [vmem:[%s7594_s8 + $0x238] sm:$0xf0] }
 0x1bc   :  { %2961 = vmatpush.bf16.msra.mxu1 %v4371_v7  ;;  %v2004_v16 = vpop.f32.mrf.mxu3  ;;  %v4977_v7 = vld [vmem:[%s7594_s8 + $0x2cc] sm:$0xf] }
 0x1bd   :  { %v4487_v17 = vor.u32 %v4977_v7, %v4484_v8  ;;  %v4929_v63 = vld [vmem:[%s7594_s8 + $0x14c] sm:$0xf] }
 0x1be   :  { %3002 = vmatpush.bf16.msrb.mxu0 %v4215_v11  ;;  %2976 = vmatpush.bf16.msra.mxu2 %v4467_v13  ;;  %v4949_v11 = vld [vmem:[%s7594_s8 + $0x1ec] sm:$0xf]  ;;  %v4372_v13 = vld [vmem:[%s7594_s8 + $0x1f8] sm:$0xf0] }
 0x1bf   :  { %v4375_v19 = vor.u32 %v4949_v11, %v4372_v13  ;;  %v4953_v7 = vld [vmem:[%s7594_s8 + $0x20c] sm:$0xf]  ;;  %v4991_v11 = vld [vmem:[%s7594_s8 + $0x334] sm:$0xf0] }
 0x1c0   :  { %2962 = vmatpush.bf16.msra.mxu1 %v4355_v54 }
 0x1c2   :  { %3003 = vmatpush.bf16.msrb.mxu0 %v4199_v44  ;;  %2977 = vmatpush.bf16.msra.mxu2 %v4451_v23  ;;  %v4468_v44 = vld [vmem:[%s7594_s8 + $0x2b8] sm:$0xf0] }
 0x1c3   :  { %v4471_v51 = vor.u32 %v4973_v20, %v4468_v44  ;;  %v4628_v20 = vld [vmem:[%s7594_s8 + $0x3f8] sm:$0xf0] }
 0x1c4   :  { %2963 = vmatpush.bf16.msra.mxu1 %v4339_v26  ;;  %v4610_v26 = vld [vmem:[%s7594_s8 + $0x3c8] sm:$0xf] }
 0x1c5   :  { %2930 = vmatmul.bf16.vlgmr.msrb.gmra.mxu2 %v7229_v52  ;;  %v4611_v3 = vor.u32 %v5011_v33, %v4610_v26  ;;  %v4612_v26 = vld [vmem:[%s7594_s8 + $0x3d8] sm:$0xf0] }
 0x1c6   :  { %3004 = vmatpush.bf16.msrb.mxu0 %v4183_v28  ;;  %2978 = vmatpush.bf16.msra.mxu2 %v4435_v29  ;;  %v4969_v28 = vld [vmem:[%s7594_s8 + $0x28c] sm:$0xf]  ;;  %v4452_v29 = vld [vmem:[%s7594_s8 + $0x298] sm:$0xf0] }
 0x1c7   :  { %v4455_v53 = vor.u32 %v4969_v28, %v4452_v29  ;;  %v4997_v29 = vld [vmem:[%s7594_s8 + $0x36c] sm:$0xf] }
 0x1c8   :  { %2964 = vmatpush.bf16.msra.mxu1 %v4323_v6  ;;  %v4340_v6 = vld [vmem:[%s7594_s8 + $0x1b8] sm:$0xf0] }
 0x1c9   :  { %v4343_v34 = vor.u32 %v4941_v49, %v4340_v6  ;;  %v4993_v6 = vld [vmem:[%s7594_s8 + $0x34c] sm:$0xf] }
 0x1ca   :  { %3005 = vmatpush.bf16.msrb.mxu0 %v4167_v35  ;;  %2979 = vmatpush.bf16.msra.mxu2 %v4419_v36  ;;  %v4965_v35 = vld [vmem:[%s7594_s8 + $0x26c] sm:$0xf]  ;;  %v4436_v36 = vld [vmem:[%s7594_s8 + $0x278] sm:$0xf0]  ;;  %v4551_v31 = vor.u32 %v4993_v6, %v4548_v30 }
 0x1cb   :  { %2917 = vmatmul.bf16.vlgmr.msrb.gmra.mxu1 %v7263_v10  ;;  %v4439_v42 = vor.u32 %v4965_v35, %v4436_v36  ;;  %v4985_v36 = vld [vmem:[%s7594_s8 + $0x30c] sm:$0xf] }
 0x1cc   :  { %2965 = vmatpush.bf16.msra.mxu1 %v4307_v40  ;;  %v4324_v40 = vld [vmem:[%s7594_s8 + $0x198] sm:$0xf0] }
 0x1cd   :  { %v2041_v58 = vpop.f32.mrf.mxu2  ;;  %v4327_v46 = vor.u32 %v4937_v39, %v4324_v40 }
 0x1ce   :  { %v2042_v0 = vadd.f32 %v2041_v58, %v1623_v47  ;;  %3006 = vmatpush.bf16.msrb.mxu0 %v4151_v48  ;;  %2980 = vmatpush.bf16.msra.mxu2 %v4403_v55  ;;  %v4961_v47 = vld [vmem:[%s7594_s8 + $0x24c] sm:$0xf]  ;;  %v4420_v48 = vld [vmem:[%s7594_s8 + $0x258] sm:$0xf0]  ;;  %v4579_v55 = vor.u32 %v5003_v32, %v4578_v41  ;;  %v4562_v58 = vld [vmem:[%s7594_s8 + $0x368] sm:$0xf] }
 0x1cf   :  { %v4423_v43 = vor.u32 %v4961_v47, %v4420_v48 }
 0x1d0   :  { %2966 = vmatpush.bf16.msra.mxu1 %v4291_v59  ;;  %v4999_v59 = vld [vmem:[%s7594_s8 + $0x374] sm:$0xf0] }
 0x1d1   :  { %v4563_v62 = vor.u32 %v4999_v59, %v4562_v58 }
 0x1d2   :  { %3007 = vmatpush.bf16.msrb.mxu0 %v4135_v1  ;;  %2981 = vmatpush.bf16.msra.mxu2 %v4387_v2  ;;  %v4546_v1 = vld [vmem:[%s7594_s8 + $0x348] sm:$0xf]  ;;  %v4995_v2 = vld [vmem:[%s7594_s8 + $0x354] sm:$0xf0] }
 0x1d3   :  { %v4547_v8 = vor.u32 %v4995_v2, %v4546_v1 }
 0x1d4   :  { %v2054_v37 = vpop.f32.mrf.mxu3  ;;  %2967 = vmatpush.bf16.msra.mxu1 %v4275_v5 }
 0x1d5   :  { %v2055_v22 = vadd.f32 %v2054_v37, %v2042_v0  ;;  %v2043_v16 = vpop.f32.mrf.mxu2  ;;  %3008 = vmatmul.bf16.vlgmr.msrb.gmra.mxu0 %v7103_v50  ;;  %2982 = vmatmul.bf16.vlgmr.msra.gmra.mxu2 %v7229_v52  ;;  %v4356_v50 = vld [vmem:[%s7594_s8 + $0x1d8] sm:$0xf0] }
 0x1d6   :  { %3026 = vmatpush.bf16.msrb.mxu2 %v4503_v4  ;;  %v4359_v12 = vor.u32 %v4945_v25, %v4356_v50  ;;  %v4292_v0 = vld [vmem:[%s7594_s8 + $0x158] sm:$0xf0]  ;;  %v4407_v4 = vor.u32 %v4957_v61, %v4404_v21  ;;  %v5009_v50 = vld [vmem:[%s7594_s8 + $0x3cc] sm:$0xf] }
 0x1d7   :  { %v2061_v54 = vmax.f32 %v2055_v22, 0.0  ;;  %v4295_v5 = vor.u32 %v4929_v63, %v4292_v0  ;;  %v4388_v37 = vld [vmem:[%s7594_s8 + $0x218] sm:$0xf0]  ;;  %v4530_v22 = vld [vmem:[%s7594_s8 + $0x328] sm:$0xf]  ;;  %v4615_v33 = vor.u32 %v5009_v50, %v4612_v26 }
 0x1d8   :  { %2968 = vmatpush.bf16.msra.mxu1 %v4259_v18  ;;  %v4391_v13 = vor.u32 %v4953_v7, %v4388_v37  ;;  %v4531_v15 = vor.u32 %v4991_v11, %v4530_v22  ;;  %v4260_v16 = vld [vmem:[%s7594_s8 + $0x118] sm:$0xf0]  ;;  %v4987_v18 = vld [vmem:[%s7594_s8 + $0x314] sm:$0xf0] }
 0x1d9   :  { %v7402_v23 = vpack.c.bf16 %v2061_v54, %v2061_v54  ;;  %v4921_v54 = vld [vmem:[%s7594_s8 + $0x10c] sm:$0xf] }
 0x1da   :  { %3027 = vmatpush.bf16.msrb.mxu2 %v4487_v17  ;;  %v4514_v17 = vld [vmem:[%s7594_s8 + $0x308] sm:$0xf]  ;;  %v4263_v44 = vor.u32 %v4921_v54, %v4260_v16 }
 0x1db   :  { %2891 = vmatmul.bf16.vlgmr.msra.gmra.mxu3 %v7402_v23  ;;  %2969 = vmatmul.bf16.vlgmr.msra.gmra.mxu1 %v7263_v10 }
 0x1dc   :  { %3013 = vmatpush.bf16.msrb.mxu1 %v4375_v19  ;;  %v2056_v45 = vpop.f32.mrf.mxu3  ;;  %2987 = vmatpush.bf16.msra.mxu3 %v4627_v24  ;;  %v5013_v19 = vld [vmem:[%s7594_s8 + $0x3ec] sm:$0xf]  ;;  %v4515_v24 = vor.u32 %v4987_v18, %v4514_v17 }
 0x1dd   :  { %v4631_v25 = vor.u32 %v5013_v19, %v4628_v20 }
 0x1de   :  { %3028 = vmatpush.bf16.msrb.mxu2 %v4471_v51  ;;  %v5005_v51 = vld [vmem:[%s7594_s8 + $0x3ac] sm:$0xf] }
 0x1e0   :  { %3014 = vmatpush.bf16.msrb.mxu1 %v4359_v12  ;;  %2988 = vmatpush.bf16.msra.mxu3 %v4611_v3  ;;  %v5001_v12 = vld [vmem:[%s7594_s8 + $0x38c] sm:$0xf]  ;;  %v4564_v3 = vld [vmem:[%s7594_s8 + $0x378] sm:$0xf0] }
 0x1e1   :  { %v4567_v49 = vor.u32 %v4997_v29, %v4564_v3 }
 0x1e2   :  { %3029 = vmatpush.bf16.msrb.mxu2 %v4455_v53  ;;  %v4989_v53 = vld [vmem:[%s7594_s8 + $0x32c] sm:$0xf] }
 0x1e4   :  { %3015 = vmatpush.bf16.msrb.mxu1 %v4343_v34  ;;  %2989 = vmatpush.bf16.msra.mxu3 %v4595_v38  ;;  %v4532_v34 = vld [vmem:[%s7594_s8 + $0x338] sm:$0xf0] }
 0x1e5   :  { %v4535_v35 = vor.u32 %v4989_v53, %v4532_v34  ;;  %v4516_v38 = vld [vmem:[%s7594_s8 + $0x318] sm:$0xf0] }
 0x1e6   :  { %3030 = vmatpush.bf16.msrb.mxu2 %v4439_v42  ;;  %v4519_v39 = vor.u32 %v4985_v36, %v4516_v38 }
 0x1e8   :  { %3016 = vmatpush.bf16.msrb.mxu1 %v4327_v46  ;;  %2990 = vmatpush.bf16.msra.mxu3 %v4579_v55  ;;  %v2194_v46 = vld [vmem:[%s7595_s9] sm:$0xf]  ;;  %s5071_s9 = smov [#allocation4]  }
 0x1e9   :  { %v2196_v47 = vperm.slane %v2194_v46, 0  ;;  %v2197_v61 = vperm.slane %v2194_v46, 1  ;;  %v2198_v50 = vperm.slane %v2194_v46, 2  ;;  %v2199_v26 = vperm.slane %v2194_v46, 3  ;;  %s3080_s10 = sshll.u32 %s5071_s9, 4  ;;  %s3081_s10 = int_to_ptr.vmem [resolvable:$true] %s3080_s10 }
 0x1ea   :  { %3031 = vmatpush.bf16.msrb.mxu2 %v4423_v43 }
 0x1eb   :  { %2943 = vmatmul.bf16.vlgmr.msrb.gmra.mxu3 %v7402_v23 }
 0x1ec   :  { %3017 = vmatpush.bf16.msrb.mxu1 %v4311_v60  ;;  %2991 = vmatpush.bf16.msra.mxu3 %v4563_v62 }
 0x1ee   :  { %3032 = vmatpush.bf16.msrb.mxu2 %v4407_v4 }
 0x1f0   :  { %3018 = vmatpush.bf16.msrb.mxu1 %v4295_v5  ;;  %2992 = vmatpush.bf16.msra.mxu3 %v4547_v8 }
 0x1f2   :  { %3033 = vmatpush.bf16.msrb.mxu2 %v4391_v13 }
 0x1f4   :  { %3019 = vmatpush.bf16.msrb.mxu1 %v4279_v14  ;;  %2993 = vmatpush.bf16.msra.mxu3 %v4531_v15 }
 0x1f5   :  { %3034 = vmatmul.bf16.vlgmr.msrb.gmra.mxu2 %v7229_v52  ;;  %v4596_v52 = vld [vmem:[%s7594_s8 + $0x3b8] sm:$0xf0] }
 0x1f6   :  { %v4599_v45 = vor.u32 %v5005_v51, %v4596_v52 }
 0x1f8   :  { %3020 = vmatpush.bf16.msrb.mxu1 %v4263_v44  ;;  %2994 = vmatpush.bf16.msra.mxu3 %v4515_v24 }
 0x1fb   :  { %3021 = vmatmul.bf16.vlgmr.msrb.gmra.mxu1 %v7263_v10  ;;  %2995 = vmatmul.bf16.vlgmr.msra.gmra.mxu3 %v7402_v23  ;;  %v4580_v10 = vld [vmem:[%s7594_s8 + $0x398] sm:$0xf0] }
 0x1fc   :  { %3039 = vmatpush.bf16.msrb.mxu3 %v4631_v25  ;;  %v4583_v28 = vor.u32 %v5001_v12, %v4580_v10 }
 0x200   :  { %3040 = vmatpush.bf16.msrb.mxu3 %v4615_v33 }
 0x204   :  { %3041 = vmatpush.bf16.msrb.mxu3 %v4599_v45 }
 0x208   :  { %3042 = vmatpush.bf16.msrb.mxu3 %v4583_v28 }
 0x20c   :  { %3043 = vmatpush.bf16.msrb.mxu3 %v4567_v49 }
 0x210   :  { %3044 = vmatpush.bf16.msrb.mxu3 %v4551_v31 }
 0x212   :  { %v2853_v40 = vpop.f32.mrf.mxu0 }
 0x213   :  { %v2854_v48 = vadd.f32 %v2853_v40, %v2196_v47 }
 0x214   :  { %3045 = vmatpush.bf16.msrb.mxu3 %v4535_v35 }
 0x218   :  { %3046 = vmatpush.bf16.msrb.mxu3 %v4519_v39 }
 0x21a   :  { %v2855_v41 = vpop.f32.mrf.mxu0 }
 0x21b   :  { %3047 = vmatmul.bf16.vlgmr.msrb.gmra.mxu3 %v7402_v23 }
 0x222   :  { %v2905_v32 = vpop.f32.mrf.mxu0 }
 0x223   :  { %v2906_v21 = vadd.f32 %v2905_v32, %v2197_v61 }
 0x22a   :  { %v2907_v42 = vpop.f32.mrf.mxu0 }
 0x232   :  { %v2957_v55 = vpop.f32.mrf.mxu0 }
 0x233   :  { %v2958_v33 = vadd.f32 %v2957_v55, %v2198_v50 }
 0x238   :  { %v2866_v23 = vpop.f32.mrf.mxu1  ;;  %v2879_v57 = vpop.f32.mrf.mxu2 }
 0x239   :  { %v2867_v56 = vadd.f32 %v2866_v23, %v2854_v48 }
 0x23a   :  { %v2959_v59 = vpop.f32.mrf.mxu0 }
 0x23b   :  { %v2880_v58 = vadd.f32 %v2879_v57, %v2867_v56 }
 0x240   :  { %v2868_v43 = vpop.f32.mrf.mxu1  ;;  %v2881_v60 = vpop.f32.mrf.mxu2 }
 0x248   :  { %v2918_v62 = vpop.f32.mrf.mxu1  ;;  %v2931_v0 = vpop.f32.mrf.mxu2 }
 0x249   :  { %v2919_v63 = vadd.f32 %v2918_v62, %v2906_v21 }
 0x24b   :  { %v2932_v1 = vadd.f32 %v2931_v0, %v2919_v63 }
 0x250   :  { %v2920_v2 = vpop.f32.mrf.mxu1  ;;  %v2933_v4 = vpop.f32.mrf.mxu2 }
 0x252   :  { %v3009_v5 = vpop.f32.mrf.mxu0 }
 0x253   :  { %v3010_v51 = vadd.f32 %v3009_v5, %v2199_v26 }
 0x258   :  { %v2970_v7 = vpop.f32.mrf.mxu1  ;;  %v2983_v37 = vpop.f32.mrf.mxu2 }
 0x259   :  { %v2971_v52 = vadd.f32 %v2970_v7, %v2958_v33 }
 0x25a   :  { %v3011_v8 = vpop.f32.mrf.mxu0 }
 0x25b   :  { %v2984_v12 = vadd.f32 %v2983_v37, %v2971_v52 }
 0x25e   :  { %v2892_v9 = vpop.f32.mrf.mxu3 }
 0x25f   :  { %v2893_v15 = vadd.f32 %v2892_v9, %v2880_v58 }
 0x260   :  { %v2972_v27 = vpop.f32.mrf.mxu1  ;;  %v2985_v22 = vpop.f32.mrf.mxu2 }
 0x266   :  { %v2894_v11 = vpop.f32.mrf.mxu3 }
 0x26e   :  { %v2944_v13 = vpop.f32.mrf.mxu3 }
 0x26f   :  { %v2945_v14 = vadd.f32 %v2944_v13, %v2932_v1 }
 0x271   :  { %v3056_v54 = vrot.slane %v2945_v14, 6 }
 0x273   :  { %v3059_v16 = vsel %vm1545_vm0, %v2893_v15, %v3056_v54 }
 0x276   :  { %v2946_v17 = vpop.f32.mrf.mxu3 }
 0x278   :  { %v3022_v18 = vpop.f32.mrf.mxu1  ;;  %v3035_v19 = vpop.f32.mrf.mxu2 }
 0x279   :  { %v3023_v45 = vadd.f32 %v3022_v18, %v3010_v51 }
 0x27b   :  { %v3036_v10 = vadd.f32 %v3035_v19, %v3023_v45 }
 0x27e   :  { %v2996_v20 = vpop.f32.mrf.mxu3 }
 0x27f   :  { %v2997_v28 = vadd.f32 %v2996_v20, %v2984_v12 }
 0x280   :  { %v3024_v44 = vpop.f32.mrf.mxu1  ;;  %v3037_v24 = vpop.f32.mrf.mxu2 }
 0x281   :  { %v3057_v49 = vrot.slane %v2997_v28, 4 }
 0x286   :  { %v2998_v25 = vpop.f32.mrf.mxu3 }
 0x29e   :  { %v3048_v29 = vpop.f32.mrf.mxu3 }
 0x29f   :  { %v3049_v3 = vadd.f32 %v3048_v29, %v3036_v10 }
 0x2a1   :  { %v3058_v6 = vrot.slane %v3049_v3, 2 }
 0x2a3   :  { %v3060_v30 = vsel %vm1547_vm1, %v3057_v49, %v3058_v6 }
 0x2a4   :  { %v3061_v31 = vsel %vm1549_vm2, %v3059_v16, %v3060_v30 }
 0x2a5   :  { %3063 = vst [vmem:[#allocation4] sm:$0xff] %v3061_v31 }
 0x2a6   :  { %v3050_v53 = vpop.f32.mrf.mxu3  ;;  %3085 = dma.vmem_to_hbm [thread:$0]  %s3081_s10, 128, %s3083_s21, [#allocation5]  }
 0x2a7   :  { %5066 = dma.done.wait [#allocation3], 128  }
 0x2a8   :  { %5067 = vsyncadd [#allocation3], 4294967168 }
 0x2a9   :  { %5068 = dma.done.wait [#allocation5], 128  }
 0x2aa   :  { %5069 = vsyncadd [#allocation5], 4294967168 }
 0x2ab   :  { %3094 = vsyncpa [#allocation3], 1 }
 0x2ac   :  { %3095 = vsyncpa [#allocation5], 1 }

</bundles_post_ra>
